<compile_context>
chip_gen: v7x
topology: tpu7x:2x2x1
jax: 0.10.0
libtpu: 0.0.40
codegen_flags: <defaults>
</compile_context>

<pallas_src>
import jax
import jax.numpy as jnp
from jax import lax
from jax.experimental import pallas as pl
from jax.experimental.pallas import tpu as pltpu

_SUBLANE = 8  # f32 sublane size


# ----------------------------------------------------------------------------
# Fused Pallas kernel: 2-layer LSTM over the whole sequence + e2s projection
# ----------------------------------------------------------------------------
def _decoder_fused_kernel(x_ref, h0_ref, c0_ref,
                          wih0_ref, whh0_ref, b0_ref,
                          wih1_ref, whh1_ref, b1_ref, we2s_ref,
                          scores_ref, hfin_ref, cfin_ref,
                          g0_s, hseq_s):
    """Fused decoder forward (single invocation, no grid).

    x_ref      : (T*Bp, E)  f32   time-major flattened embeddings (batch padded)
    h0/c0      : (L, Bp, H) f32   initial hidden / cell state (L == 2)
    wih0_ref   : (E, 4H)    bf16  layer-0 input weights (pre-transposed)
    whh0_ref   : (H, 4H)    bf16  layer-0 recurrent weights
    b0_ref     : (1, 4H)    f32   b_ih0 + b_hh0
    wih1_ref   : (H, 4H)    bf16  layer-1 input weights
    whh1_ref   : (H, 4H)    bf16  layer-1 recurrent weights
    b1_ref     : (1, 4H)    f32   b_ih1 + b_hh1
    we2s_ref   : (H, V)     bf16  e2s weight (pre-transposed)
    scores_ref : (T*Bp, V)  f32   output logits (time-major, flattened)
    hfin/cfin  : (L, Bp, H) f32   final hidden / cell state
    g0_s       : (T*Bp, 4H) f32   VMEM scratch: hoisted layer-0 input gates
    hseq_s     : (T*Bp, H)  f32   VMEM scratch: top-layer outputs per step
    PyTorch LSTM gate order: i, f, g, o.
    """
    hsz = whh0_ref.shape[0]
    bsz = h0_ref.shape[1]          # padded batch (multiple of 8)
    n = x_ref.shape[0]
    seqlen = n // bsz

    # --- Hoisted layer-0 input projection for the whole sequence: one
    # MXU-friendly (T*Bp, E) x (E, 4H) matmul instead of T tiny ones on the
    # sequential critical path (bias folded in).
    g0_s[...] = (jnp.dot(x_ref[...].astype(jnp.bfloat16), wih0_ref[...],
                         preferred_element_type=jnp.float32)
                 + b0_ref[...])

    whh0 = whh0_ref[...]
    wih1 = wih1_ref[...]
    whh1 = whh1_ref[...]
    b1 = b1_ref[...]

    def gates_to_hc(gates, c_prev):
        # Gate math in f32 (v5e has no bf16 VPU/EUP path).
        i = jax.nn.sigmoid(gates[:, 0 * hsz:1 * hsz])
        f = jax.nn.sigmoid(gates[:, 1 * hsz:2 * hsz])
        g = jnp.tanh(gates[:, 2 * hsz:3 * hsz])
        o = jax.nn.sigmoid(gates[:, 3 * hsz:4 * hsz])
        c_new = f * c_prev + i * g
        h_new = o * jnp.tanh(c_new)
        return h_new, c_new

    def step(t, carry):
        h_a, c_a, h_b, c_b = carry
        # Padded batch => full, unmasked (8,128)-aligned tile slices.
        r = pl.multiple_of(t * bsz, bsz)
        # Layer-1 recurrent matmul depends only on h_b(t-1): independent of
        # this step's layer-0 output, so it can overlap with h_a @ Whh0 below.
        rec1 = jnp.dot(h_b.astype(jnp.bfloat16), whh1,
                       preferred_element_type=jnp.float32)
        # Layer 0: only the recurrent matmul remains on the sequential path.
        g0 = g0_s[pl.ds(r, bsz), :] + jnp.dot(
            h_a.astype(jnp.bfloat16), whh0,
            preferred_element_type=jnp.float32)
        h_a, c_a = gates_to_hc(g0, c_a)
        # (inter-layer dropout is identity in eval mode)
        # Layer 1: split input/recurrent matmuls (no per-step concatenate).
        g1 = jnp.dot(h_a.astype(jnp.bfloat16), wih1,
                     preferred_element_type=jnp.float32) + rec1 + b1
        h_b, c_b = gates_to_hc(g1, c_b)
        hseq_s[pl.ds(r, bsz), :] = h_b
        return (h_a, c_a, h_b, c_b)

    init = (h0_ref[0], c0_ref[0], h0_ref[1], c0_ref[1])
    # Bounded unroll: enough LLO window to overlap MXU pushes across steps
    # without blowing vreg pressure at larger T.
    h_a, c_a, h_b, c_b = lax.fori_loop(0, seqlen, step, init,
                                       unroll=min(seqlen, 8))

    hfin_ref[0] = h_a
    hfin_ref[1] = h_b
    cfin_ref[0] = c_a
    cfin_ref[1] = c_b

    # --- Fused output projection (o2e is identity since hidden == emb size):
    # a single (T*Bp, H) x (H, V) matmul, lane-dense f32 store.  Single bulk
    # bf16 cast of the activations (no per-step casts in the epilogue).
    scores_ref[...] = jnp.dot(hseq_s[...].astype(jnp.bfloat16), we2s_ref[...],
                              preferred_element_type=jnp.float32)


# ----------------------------------------------------------------------------
# Wrappers
# ----------------------------------------------------------------------------
@jax.jit
def decoder_fused(xes_flat, h0, c0, wih0_bf16, whh0_bf16, b0,
                  wih1_bf16, whh1_bf16, b1, w_e2s_T_bf16):
    """xes_flat: (T*Bp, E) f32 time-major embeddings (batch padded to 8).
    Returns (scores_flat (T*Bp, V) f32, h_n (L,Bp,H), c_n (L,Bp,H))."""
    n, esz = xes_flat.shape
    nlayers, bsz, hsz = h0.shape
    vocab = w_e2s_T_bf16.shape[1]
    seqlen = n // bsz

    # Advisory cost estimate for the XLA scheduler.
    flops = (2 * n * esz * 4 * hsz                      # hoisted layer-0 proj
             + 2 * seqlen * bsz * hsz * 4 * hsz * 3     # whh0, wih1, whh1
             + 2 * n * hsz * vocab)                     # e2s
    transcendentals = seqlen * bsz * hsz * 6            # 3 sigmoid + 2 tanh /layer-ish
    in_bytes = (xes_flat.size * 4 + (h0.size + c0.size) * 4
                + (wih0_bf16.size + whh0_bf16.size + wih1_bf16.size
                   + whh1_bf16.size + w_e2s_T_bf16.size) * 2
                + (b0.size + b1.size) * 4)
    out_bytes = n * vocab * 4 + 2 * (nlayers * bsz * hsz) * 4
    scratch_bytes = n * 4 * hsz * 4 + n * hsz * 4
    # Size the scoped VMEM limit from the actual footprint (default is only
    # 16/32 MiB which is far below physical on v5e/v6e); keep 2x headroom and
    # never go below the default nor above the smallest physical VMEM (64 MiB).
    vmem_limit = int(min(64 * 1024 * 1024,
                         max(32 * 1024 * 1024,
                             2 * (in_bytes + out_bytes + scratch_bytes)
                             + (4 << 20))))

    return pl.pallas_call(
        _decoder_fused_kernel,
        out_shape=(
            jax.ShapeDtypeStruct((n, vocab), jnp.float32),
            jax.ShapeDtypeStruct((nlayers, bsz, hsz), jnp.float32),
            jax.ShapeDtypeStruct((nlayers, bsz, hsz), jnp.float32),
        ),
        scratch_shapes=[
            pltpu.VMEM((n, 4 * hsz), jnp.float32),   # hoisted layer-0 gates
            pltpu.VMEM((n, hsz), jnp.float32),       # top-layer outputs
        ],
        compiler_params=pltpu.CompilerParams(vmem_limit_bytes=vmem_limit),
        cost_estimate=pl.CostEstimate(flops=int(flops),
                                      transcendentals=int(transcendentals),
                                      bytes_accessed=int(in_bytes + out_bytes)),
    )(xes_flat, h0, c0, wih0_bf16, whh0_bf16, b0,
      wih1_bf16, whh1_bf16, b1, w_e2s_T_bf16)


def decoder_forward(xs, hidden, encoder_output, params, attn_mask=None):
    """Mirrors Decoder.forward (attn_type='none', numsoftmax=1, topk=1).

    xs: (B, T) int32 token ids. hidden: (h0, c0) each (L, B, H).
    encoder_output / attn_mask unused (attention 'none').
    Returns (preds (B,T) int32, scores (B,T,V), (h_n, c_n)).
    """
    # TODO(synk): attention variants ('local'/'concat'/'dot'/'general'),
    # numsoftmax>1 mixture-of-softmaxes and topk>1 sampling branches are not
    # translated (defaults: attn='none', numsoftmax=1, topk=1).
    del encoder_output, attn_mask
    bsz, seqlen = xs.shape
    h0, c0 = hidden

    # Pad batch to the f32 sublane size so every per-step slice in the kernel
    # is a full, unmasked (8,128)-aligned tile access.
    bpad = ((bsz + _SUBLANE - 1) // _SUBLANE) * _SUBLANE

    # Embedding lookup + dropout (eval -> identity); gather directly into the
    # time-major layout the kernel wants (no transpose round trips).
    xes = params["emb"][xs.T]                                    # (T, B, E)
    if bpad != bsz:
        xes = jnp.pad(xes, ((0, 0), (0, bpad - bsz), (0, 0)))
        h0p = jnp.pad(h0, ((0, 0), (0, bpad - bsz), (0, 0)))
        c0p = jnp.pad(c0, ((0, 0), (0, bpad - bsz), (0, 0)))
    else:
        h0p, c0p = h0, c0
    xes_flat = xes.reshape(seqlen * bpad, -1)                    # (T*Bp, E)

    scores_flat, h_n_p, c_n_p = decoder_fused(
        xes_flat, h0p, c0p,
        params["wih0_bf16"], params["whh0_bf16"], params["b0"],
        params["wih1_bf16"], params["whh1_bf16"], params["b1"],
        params["w_e2s_T_bf16"])

    vocab = params["w_e2s_T_bf16"].shape[1]
    # Slice off the padded batch rows BEFORE argmax so they can't leak.
    scores = scores_flat.reshape(seqlen, bpad, vocab)[:, :bsz, :]
    scores = jnp.transpose(scores, (1, 0, 2))                    # (B, T, V)
    # torch: scores.narrow(2, 1, V-1).max(2) then idx.add_(1)  (lane-hostile
    # in-kernel; do it in plain JAX on the lane-dense scores).
    preds = jnp.argmax(scores[:, :, 1:], axis=-1).astype(jnp.int32) + 1
    h_n = h_n_p[:, :bsz, :]
    c_n = c_n_p[:, :bsz, :]
    return preds, scores, (h_n, c_n)


# ----------------------------------------------------------------------------
# Pure-JAX reference (same bf16-operand / f32-accumulate math) for sanity check
# ----------------------------------------------------------------------------
def decoder_forward_ref(xs, hidden, params):
    h0, c0 = hidden
    xes = params["emb"][xs]                                 # (B, T, E)
    hsz = h0.shape[-1]

    def mm(a, w_bf16):
        return jnp.dot(a.astype(jnp.bfloat16), w_bf16,
                       preferred_element_type=jnp.float32)

    def cell(x_t, h, c, wih, whh, b):
        g = mm(x_t, wih) + mm(h, whh) + b
        i = jax.nn.sigmoid(g[:, 0 * hsz:1 * hsz])
        f = jax.nn.sigmoid(g[:, 1 * hsz:2 * hsz])
        gg = jnp.tanh(g[:, 2 * hsz:3 * hsz])
        o = jax.nn.sigmoid(g[:, 3 * hsz:4 * hsz])
        c_new = f * c + i * gg
        return o * jnp.tanh(c_new), c_new

    def step(carry, x_t):
        ha, ca, hb, cb = carry
        ha, ca = cell(x_t, ha, ca, params["wih0_bf16"], params["whh0_bf16"],
                      params["b0"])
        hb, cb = cell(ha, hb, cb, params["wih1_bf16"], params["whh1_bf16"],
                      params["b1"])
        return (ha, ca, hb, cb), hb

    x_tm = jnp.transpose(xes, (1, 0, 2))
    (ha, ca, hb, cb), ys = lax.scan(step, (h0[0], c0[0], h0[1], c0[1]), x_tm)
    out = jnp.transpose(ys, (1, 0, 2))                      # (B, T, H)
    scores = mm(out, params["w_e2s_T_bf16"])                # (B, T, V)
    preds = jnp.argmax(scores[:, :, 1:], axis=-1).astype(jnp.int32) + 1
    h_n = jnp.stack([ha, hb], axis=0)
    c_n = jnp.stack([ca, cb], axis=0)
    return preds, scores, (h_n, c_n)


# ----------------------------------------------------------------------------
# Main
# ----------------------------------------------------------------------------
if __name__ == "__main__":
    # Small shapes consistent with the module (defaults: emb == hidden).
    B, T = 2, 8
    V = 384            # num_features (vocab)
    E = 128            # emb_size
    H = 128            # hidden_size (== emb_size -> o2e identity)
    L = 2              # num_layers

    key = jax.random.PRNGKey(0)
    keys = jax.random.split(key, 12)
    k = 1.0 / jnp.sqrt(H)

    emb = 0.1 * jax.random.normal(keys[0], (V, E), jnp.float32)
    emb = emb.at[0].set(0.0)                                # padding_idx=0

    def uni(rk, shape):
        return jax.random.uniform(rk, shape, jnp.float32, -k, k)

    # PyTorch stores (4H, in); we pass transposed (in, 4H). Biases combined
    # b_ih + b_hh. e2s: Linear(E, V, bias=False) stored (V, E) -> pass (E, V).
    wih0 = uni(keys[1], (E, 4 * H))
    whh0 = uni(keys[2], (H, 4 * H))
    b0 = uni(keys[3], (1, 4 * H)) + uni(keys[4], (1, 4 * H))
    wih1 = uni(keys[5], (H, 4 * H))
    whh1 = uni(keys[6], (H, 4 * H))
    b1 = uni(keys[7], (1, 4 * H)) + uni(keys[8], (1, 4 * H))
    w_e2s_T = uni(keys[9], (V, E)).T

    params = {
        "emb": emb,
        "b0": b0,
        "b1": b1,
        # bf16 copies for the MXU fast path (accumulation stays f32).
        "wih0_bf16": wih0.astype(jnp.bfloat16),
        "whh0_bf16": whh0.astype(jnp.bfloat16),
        "wih1_bf16": wih1.astype(jnp.bfloat16),
        "whh1_bf16": whh1.astype(jnp.bfloat16),
        "w_e2s_T_bf16": w_e2s_T.astype(jnp.bfloat16),
    }

    xs = jax.random.randint(keys[10], (B, T), 0, V, jnp.int32)
    h0 = 0.1 * jax.random.normal(keys[11], (L, B, H), jnp.float32)
    c0 = 0.1 * jax.random.normal(jax.random.fold_in(key, 99), (L, B, H),
                                 jnp.float32)
    encoder_output = jnp.zeros((B, T, H), jnp.float32)      # unused (attn='none')

    preds, scores, (h_n, c_n) = decoder_forward(
        xs, (h0, c0), encoder_output, params)
    jax.block_until_ready((preds, scores, h_n, c_n))

    # Sanity check against the pure-JAX reference (same bf16 weight rounding).
    preds_ref, scores_ref, (h_ref, c_ref) = decoder_forward_ref(
        xs, (h0, c0), params)
    assert scores.shape == (B, T, V) and preds.shape == (B, T)
    assert h_n.shape == (L, B, H) and c_n.shape == (L, B, H)
    assert jnp.allclose(scores, scores_ref, rtol=2e-2, atol=2e-2), "scores mismatch"
    assert jnp.allclose(h_n, h_ref, rtol=2e-2, atol=2e-2), "h_n mismatch"
    assert jnp.allclose(c_n, c_ref, rtol=2e-2, atol=2e-2), "c_n mismatch"
    assert jnp.array_equal(preds, preds_ref), "preds mismatch"

    print("KERNEL_OK")
</pallas_src>

<mosaic_0001>
module attributes {stable_mosaic.version = 11 : i64} {
  func.func @_decoder_fused_kernel(%arg0: memref<64x128xf32, #tpu.memory_space<vmem>>, %arg1: memref<2x8x128xf32, #tpu.memory_space<vmem>>, %arg2: memref<2x8x128xf32, #tpu.memory_space<vmem>>, %arg3: memref<128x512xbf16, #tpu.memory_space<vmem>>, %arg4: memref<128x512xbf16, #tpu.memory_space<vmem>>, %arg5: memref<1x512xf32, #tpu.memory_space<vmem>>, %arg6: memref<128x512xbf16, #tpu.memory_space<vmem>>, %arg7: memref<128x512xbf16, #tpu.memory_space<vmem>>, %arg8: memref<1x512xf32, #tpu.memory_space<vmem>>, %arg9: memref<128x384xbf16, #tpu.memory_space<vmem>>, %arg10: memref<64x384xf32, #tpu.memory_space<vmem>>, %arg11: memref<2x8x128xf32, #tpu.memory_space<vmem>>, %arg12: memref<2x8x128xf32, #tpu.memory_space<vmem>>, %arg13: memref<64x512xf32, #tpu.memory_space<vmem>>, %arg14: memref<64x128xf32, #tpu.memory_space<vmem>>) attributes {dimension_semantics = [], scalar_prefetch = 0 : i64, scratch_operands = 2 : i64, tpu.core_type = #tpu.core_type<tc>} {
    %c0 = arith.constant 0 : index
    %c0_0 = arith.constant 0 : index
    %0 = vector.load %arg0[%c0, %c0_0] : memref<64x128xf32, #tpu.memory_space<vmem>>, vector<64x128xf32>
    %1 = arith.truncf %0 : vector<64x128xf32> to vector<64x128xbf16>
    %c0_1 = arith.constant 0 : index
    %c0_2 = arith.constant 0 : index
    %2 = vector.load %arg3[%c0_1, %c0_2] : memref<128x512xbf16, #tpu.memory_space<vmem>>, vector<128x512xbf16>
    %cst = arith.constant dense<0.000000e+00> : vector<64x512xf32>
    %3 = tpu.matmul %1, %2, %cst {dimension_numbers = #tpu.dot_dimension_numbers<[1], [0], [0], [1], [0, 0, 1, 1], [], []>} : vector<64x128xbf16>, vector<128x512xbf16>, vector<64x512xf32> -> vector<64x512xf32>
    %c0_3 = arith.constant 0 : index
    %c0_4 = arith.constant 0 : index
    %4 = vector.load %arg5[%c0_3, %c0_4] : memref<1x512xf32, #tpu.memory_space<vmem>>, vector<1x512xf32>
    %5 = vector.broadcast %4 : vector<1x512xf32> to vector<64x512xf32>
    %6 = arith.addf %3, %5 : vector<64x512xf32>
    %c0_5 = arith.constant 0 : index
    %c0_6 = arith.constant 0 : index
    %7 = vector.load %arg13[%c0_5, %c0_6] : memref<64x512xf32, #tpu.memory_space<vmem>>, vector<64x512xf32>
    tpu.vector_store %arg13[%c0_5, %c0_6], %6 {strides = array<i32>} : memref<64x512xf32, #tpu.memory_space<vmem>>, vector<64x512xf32>,
    %c0_7 = arith.constant 0 : index
    %c0_8 = arith.constant 0 : index
    %8 = vector.load %arg4[%c0_7, %c0_8] : memref<128x512xbf16, #tpu.memory_space<vmem>>, vector<128x512xbf16>
    %c0_9 = arith.constant 0 : index
    %c0_10 = arith.constant 0 : index
    %9 = vector.load %arg6[%c0_9, %c0_10] : memref<128x512xbf16, #tpu.memory_space<vmem>>, vector<128x512xbf16>
    %c0_11 = arith.constant 0 : index
    %c0_12 = arith.constant 0 : index
    %10 = vector.load %arg7[%c0_11, %c0_12] : memref<128x512xbf16, #tpu.memory_space<vmem>>, vector<128x512xbf16>
    %c0_13 = arith.constant 0 : index
    %c0_14 = arith.constant 0 : index
    %11 = vector.load %arg8[%c0_13, %c0_14] : memref<1x512xf32, #tpu.memory_space<vmem>>, vector<1x512xf32>
    %c0_15 = arith.constant 0 : index
    %c0_16 = arith.constant 0 : index
    %c0_17 = arith.constant 0 : index
    %12 = vector.load %arg1[%c0_15, %c0_16, %c0_17] : memref<2x8x128xf32, #tpu.memory_space<vmem>>, vector<1x8x128xf32>
    %13 = vector.shape_cast %12 : vector<1x8x128xf32> to vector<8x128xf32>
    %c0_18 = arith.constant 0 : index
    %c0_19 = arith.constant 0 : index
    %c0_20 = arith.constant 0 : index
    %14 = vector.load %arg2[%c0_18, %c0_19, %c0_20] : memref<2x8x128xf32, #tpu.memory_space<vmem>>, vector<1x8x128xf32>
    %15 = vector.shape_cast %14 : vector<1x8x128xf32> to vector<8x128xf32>
    %c1 = arith.constant 1 : index
    %c0_21 = arith.constant 0 : index
    %c0_22 = arith.constant 0 : index
    %16 = vector.load %arg1[%c1, %c0_21, %c0_22] : memref<2x8x128xf32, #tpu.memory_space<vmem>>, vector<1x8x128xf32>
    %17 = vector.shape_cast %16 : vector<1x8x128xf32> to vector<8x128xf32>
    %c1_23 = arith.constant 1 : index
    %c0_24 = arith.constant 0 : index
    %c0_25 = arith.constant 0 : index
    %18 = vector.load %arg2[%c1_23, %c0_24, %c0_25] : memref<2x8x128xf32, #tpu.memory_space<vmem>>, vector<1x8x128xf32>
    %19 = vector.shape_cast %18 : vector<1x8x128xf32> to vector<8x128xf32>
    %c0_i32 = arith.constant 0 : i32
    %c8_i32 = arith.constant 8 : i32
    %20 = arith.muli %c0_i32, %c8_i32 : i32
    %21 = tpu.assume_multiple %20, 8 : i32
    %22 = arith.truncf %17 : vector<8x128xf32> to vector<8x128xbf16>
    %cst_26 = arith.constant dense<0.000000e+00> : vector<8x512xf32>
    %23 = tpu.matmul %22, %10, %cst_26 {dimension_numbers = #tpu.dot_dimension_numbers<[1], [0], [0], [1], [0, 0, 1, 1], [], []>} : vector<8x128xbf16>, vector<128x512xbf16>, vector<8x512xf32> -> vector<8x512xf32>
    %24 = arith.index_cast %21 : i32 to index
    %c0_27 = arith.constant 0 : index
    %25 = vector.load %arg13[%24, %c0_27] : memref<64x512xf32, #tpu.memory_space<vmem>>, vector<8x512xf32>
    %26 = arith.truncf %13 : vector<8x128xf32> to vector<8x128xbf16>
    %cst_28 = arith.constant dense<0.000000e+00> : vector<8x512xf32>
    %27 = tpu.matmul %26, %8, %cst_28 {dimension_numbers = #tpu.dot_dimension_numbers<[1], [0], [0], [1], [0, 0, 1, 1], [], []>} : vector<8x128xbf16>, vector<128x512xbf16>, vector<8x512xf32> -> vector<8x512xf32>
    %28 = arith.addf %25, %27 : vector<8x512xf32>
    %29 = vector.extract_strided_slice %28 {offsets = [0, 0], sizes = [8, 128], strides = [1, 1]} : vector<8x512xf32> to vector<8x128xf32>
    %30 = arith.negf %29 : vector<8x128xf32>
    %31 = math.exp %30 : vector<8x128xf32>
    %cst_29 = arith.constant 1.000000e+00 : f32
    %32 = vector.broadcast %cst_29 : f32 to vector<8x128xf32>
    %33 = arith.addf %32, %31 : vector<8x128xf32>
    %34 = arith.divf %32, %33 : vector<8x128xf32>
    %35 = vector.extract_strided_slice %28 {offsets = [0, 128], sizes = [8, 128], strides = [1, 1]} : vector<8x512xf32> to vector<8x128xf32>
    %36 = arith.negf %35 : vector<8x128xf32>
    %37 = math.exp %36 : vector<8x128xf32>
    %cst_30 = arith.constant 1.000000e+00 : f32
    %38 = vector.broadcast %cst_30 : f32 to vector<8x128xf32>
    %39 = arith.addf %38, %37 : vector<8x128xf32>
    %40 = arith.divf %38, %39 : vector<8x128xf32>
    %41 = vector.extract_strided_slice %28 {offsets = [0, 256], sizes = [8, 128], strides = [1, 1]} : vector<8x512xf32> to vector<8x128xf32>
    %42 = math.tanh %41 : vector<8x128xf32>
    %43 = vector.extract_strided_slice %28 {offsets = [0, 384], sizes = [8, 128], strides = [1, 1]} : vector<8x512xf32> to vector<8x128xf32>
    %44 = arith.negf %43 : vector<8x128xf32>
    %45 = math.exp %44 : vector<8x128xf32>
    %cst_31 = arith.constant 1.000000e+00 : f32
    %46 = vector.broadcast %cst_31 : f32 to vector<8x128xf32>
    %47 = arith.addf %46, %45 : vector<8x128xf32>
    %48 = arith.divf %46, %47 : vector<8x128xf32>
    %49 = arith.mulf %40, %15 : vector<8x128xf32>
    %50 = arith.mulf %34, %42 : vector<8x128xf32>
    %51 = arith.addf %49, %50 : vector<8x128xf32>
    %52 = math.tanh %51 : vector<8x128xf32>
    %53 = arith.mulf %48, %52 : vector<8x128xf32>
    %54 = arith.truncf %53 : vector<8x128xf32> to vector<8x128xbf16>
    %cst_32 = arith.constant dense<0.000000e+00> : vector<8x512xf32>
    %55 = tpu.matmul %54, %9, %cst_32 {dimension_numbers = #tpu.dot_dimension_numbers<[1], [0], [0], [1], [0, 0, 1, 1], [], []>} : vector<8x128xbf16>, vector<128x512xbf16>, vector<8x512xf32> -> vector<8x512xf32>
    %56 = arith.addf %55, %23 : vector<8x512xf32>
    %57 = vector.broadcast %11 : vector<1x512xf32> to vector<8x512xf32>
    %58 = arith.addf %56, %57 : vector<8x512xf32>
    %59 = vector.extract_strided_slice %58 {offsets = [0, 0], sizes = [8, 128], strides = [1, 1]} : vector<8x512xf32> to vector<8x128xf32>
    %60 = arith.negf %59 : vector<8x128xf32>
    %61 = math.exp %60 : vector<8x128xf32>
    %cst_33 = arith.constant 1.000000e+00 : f32
    %62 = vector.broadcast %cst_33 : f32 to vector<8x128xf32>
    %63 = arith.addf %62, %61 : vector<8x128xf32>
    %64 = arith.divf %62, %63 : vector<8x128xf32>
    %65 = vector.extract_strided_slice %58 {offsets = [0, 128], sizes = [8, 128], strides = [1, 1]} : vector<8x512xf32> to vector<8x128xf32>
    %66 = arith.negf %65 : vector<8x128xf32>
    %67 = math.exp %66 : vector<8x128xf32>
    %cst_34 = arith.constant 1.000000e+00 : f32
    %68 = vector.broadcast %cst_34 : f32 to vector<8x128xf32>
    %69 = arith.addf %68, %67 : vector<8x128xf32>
    %70 = arith.divf %68, %69 : vector<8x128xf32>
    %71 = vector.extract_strided_slice %58 {offsets = [0, 256], sizes = [8, 128], strides = [1, 1]} : vector<8x512xf32> to vector<8x128xf32>
    %72 = math.tanh %71 : vector<8x128xf32>
    %73 = vector.extract_strided_slice %58 {offsets = [0, 384], sizes = [8, 128], strides = [1, 1]} : vector<8x512xf32> to vector<8x128xf32>
    %74 = arith.negf %73 : vector<8x128xf32>
    %75 = math.exp %74 : vector<8x128xf32>
    %cst_35 = arith.constant 1.000000e+00 : f32
    %76 = vector.broadcast %cst_35 : f32 to vector<8x128xf32>
    %77 = arith.addf %76, %75 : vector<8x128xf32>
    %78 = arith.divf %76, %77 : vector<8x128xf32>
    %79 = arith.mulf %70, %19 : vector<8x128xf32>
    %80 = arith.mulf %64, %72 : vector<8x128xf32>
    %81 = arith.addf %79, %80 : vector<8x128xf32>
    %82 = math.tanh %81 : vector<8x128xf32>
    %83 = arith.mulf %78, %82 : vector<8x128xf32>
    %84 = arith.index_cast %21 : i32 to index
    %c0_36 = arith.constant 0 : index
    %85 = vector.load %arg14[%84, %c0_36] : memref<64x128xf32, #tpu.memory_space<vmem>>, vector<8x128xf32>
    tpu.vector_store %arg14[%84, %c0_36], %83 {strides = array<i32>} : memref<64x128xf32, #tpu.memory_space<vmem>>, vector<8x128xf32>,
    %c1_i32 = arith.constant 1 : i32
    %c8_i32_37 = arith.constant 8 : i32
    %86 = arith.muli %c1_i32, %c8_i32_37 : i32
    %87 = tpu.assume_multiple %86, 8 : i32
    %88 = arith.truncf %83 : vector<8x128xf32> to vector<8x128xbf16>
    %cst_38 = arith.constant dense<0.000000e+00> : vector<8x512xf32>
    %89 = tpu.matmul %88, %10, %cst_38 {dimension_numbers = #tpu.dot_dimension_numbers<[1], [0], [0], [1], [0, 0, 1, 1], [], []>} : vector<8x128xbf16>, vector<128x512xbf16>, vector<8x512xf32> -> vector<8x512xf32>
    %90 = arith.index_cast %87 : i32 to index
    %c0_39 = arith.constant 0 : index
    %91 = vector.load %arg13[%90, %c0_39] : memref<64x512xf32, #tpu.memory_space<vmem>>, vector<8x512xf32>
    %92 = arith.truncf %53 : vector<8x128xf32> to vector<8x128xbf16>
    %cst_40 = arith.constant dense<0.000000e+00> : vector<8x512xf32>
    %93 = tpu.matmul %92, %8, %cst_40 {dimension_numbers = #tpu.dot_dimension_numbers<[1], [0], [0], [1], [0, 0, 1, 1], [], []>} : vector<8x128xbf16>, vector<128x512xbf16>, vector<8x512xf32> -> vector<8x512xf32>
    %94 = arith.addf %91, %93 : vector<8x512xf32>
    %95 = vector.extract_strided_slice %94 {offsets = [0, 0], sizes = [8, 128], strides = [1, 1]} : vector<8x512xf32> to vector<8x128xf32>
    %96 = arith.negf %95 : vector<8x128xf32>
    %97 = math.exp %96 : vector<8x128xf32>
    %cst_41 = arith.constant 1.000000e+00 : f32
    %98 = vector.broadcast %cst_41 : f32 to vector<8x128xf32>
    %99 = arith.addf %98, %97 : vector<8x128xf32>
    %100 = arith.divf %98, %99 : vector<8x128xf32>
    %101 = vector.extract_strided_slice %94 {offsets = [0, 128], sizes = [8, 128], strides = [1, 1]} : vector<8x512xf32> to vector<8x128xf32>
    %102 = arith.negf %101 : vector<8x128xf32>
    %103 = math.exp %102 : vector<8x128xf32>
    %cst_42 = arith.constant 1.000000e+00 : f32
    %104 = vector.broadcast %cst_42 : f32 to vector<8x128xf32>
    %105 = arith.addf %104, %103 : vector<8x128xf32>
    %106 = arith.divf %104, %105 : vector<8x128xf32>
    %107 = vector.extract_strided_slice %94 {offsets = [0, 256], sizes = [8, 128], strides = [1, 1]} : vector<8x512xf32> to vector<8x128xf32>
    %108 = math.tanh %107 : vector<8x128xf32>
    %109 = vector.extract_strided_slice %94 {offsets = [0, 384], sizes = [8, 128], strides = [1, 1]} : vector<8x512xf32> to vector<8x128xf32>
    %110 = arith.negf %109 : vector<8x128xf32>
    %111 = math.exp %110 : vector<8x128xf32>
    %cst_43 = arith.constant 1.000000e+00 : f32
    %112 = vector.broadcast %cst_43 : f32 to vector<8x128xf32>
    %113 = arith.addf %112, %111 : vector<8x128xf32>
    %114 = arith.divf %112, %113 : vector<8x128xf32>
    %115 = arith.mulf %106, %51 : vector<8x128xf32>
    %116 = arith.mulf %100, %108 : vector<8x128xf32>
    %117 = arith.addf %115, %116 : vector<8x128xf32>
    %118 = math.tanh %117 : vector<8x128xf32>
    %119 = arith.mulf %114, %118 : vector<8x128xf32>
    %120 = arith.truncf %119 : vector<8x128xf32> to vector<8x128xbf16>
    %cst_44 = arith.constant dense<0.000000e+00> : vector<8x512xf32>
    %121 = tpu.matmul %120, %9, %cst_44 {dimension_numbers = #tpu.dot_dimension_numbers<[1], [0], [0], [1], [0, 0, 1, 1], [], []>} : vector<8x128xbf16>, vector<128x512xbf16>, vector<8x512xf32> -> vector<8x512xf32>
    %122 = arith.addf %121, %89 : vector<8x512xf32>
    %123 = vector.broadcast %11 : vector<1x512xf32> to vector<8x512xf32>
    %124 = arith.addf %122, %123 : vector<8x512xf32>
    %125 = vector.extract_strided_slice %124 {offsets = [0, 0], sizes = [8, 128], strides = [1, 1]} : vector<8x512xf32> to vector<8x128xf32>
    %126 = arith.negf %125 : vector<8x128xf32>
    %127 = math.exp %126 : vector<8x128xf32>
    %cst_45 = arith.constant 1.000000e+00 : f32
    %128 = vector.broadcast %cst_45 : f32 to vector<8x128xf32>
    %129 = arith.addf %128, %127 : vector<8x128xf32>
    %130 = arith.divf %128, %129 : vector<8x128xf32>
    %131 = vector.extract_strided_slice %124 {offsets = [0, 128], sizes = [8, 128], strides = [1, 1]} : vector<8x512xf32> to vector<8x128xf32>
    %132 = arith.negf %131 : vector<8x128xf32>
    %133 = math.exp %132 : vector<8x128xf32>
    %cst_46 = arith.constant 1.000000e+00 : f32
    %134 = vector.broadcast %cst_46 : f32 to vector<8x128xf32>
    %135 = arith.addf %134, %133 : vector<8x128xf32>
    %136 = arith.divf %134, %135 : vector<8x128xf32>
    %137 = vector.extract_strided_slice %124 {offsets = [0, 256], sizes = [8, 128], strides = [1, 1]} : vector<8x512xf32> to vector<8x128xf32>
    %138 = math.tanh %137 : vector<8x128xf32>
    %139 = vector.extract_strided_slice %124 {offsets = [0, 384], sizes = [8, 128], strides = [1, 1]} : vector<8x512xf32> to vector<8x128xf32>
    %140 = arith.negf %139 : vector<8x128xf32>
    %141 = math.exp %140 : vector<8x128xf32>
    %cst_47 = arith.constant 1.000000e+00 : f32
    %142 = vector.broadcast %cst_47 : f32 to vector<8x128xf32>
    %143 = arith.addf %142, %141 : vector<8x128xf32>
    %144 = arith.divf %142, %143 : vector<8x128xf32>
    %145 = arith.mulf %136, %81 : vector<8x128xf32>
    %146 = arith.mulf %130, %138 : vector<8x128xf32>
    %147 = arith.addf %145, %146 : vector<8x128xf32>
    %148 = math.tanh %147 : vector<8x128xf32>
    %149 = arith.mulf %144, %148 : vector<8x128xf32>
    %150 = arith.index_cast %87 : i32 to index
    %c0_48 = arith.constant 0 : index
    %151 = vector.load %arg14[%150, %c0_48] : memref<64x128xf32, #tpu.memory_space<vmem>>, vector<8x128xf32>
    tpu.vector_store %arg14[%150, %c0_48], %149 {strides = array<i32>} : memref<64x128xf32, #tpu.memory_space<vmem>>, vector<8x128xf32>,
    %c2_i32 = arith.constant 2 : i32
    %c8_i32_49 = arith.constant 8 : i32
    %152 = arith.muli %c2_i32, %c8_i32_49 : i32
    %153 = tpu.assume_multiple %152, 8 : i32
    %154 = arith.truncf %149 : vector<8x128xf32> to vector<8x128xbf16>
    %cst_50 = arith.constant dense<0.000000e+00> : vector<8x512xf32>
    %155 = tpu.matmul %154, %10, %cst_50 {dimension_numbers = #tpu.dot_dimension_numbers<[1], [0], [0], [1], [0, 0, 1, 1], [], []>} : vector<8x128xbf16>, vector<128x512xbf16>, vector<8x512xf32> -> vector<8x512xf32>
    %156 = arith.index_cast %153 : i32 to index
    %c0_51 = arith.constant 0 : index
    %157 = vector.load %arg13[%156, %c0_51] : memref<64x512xf32, #tpu.memory_space<vmem>>, vector<8x512xf32>
    %158 = arith.truncf %119 : vector<8x128xf32> to vector<8x128xbf16>
    %cst_52 = arith.constant dense<0.000000e+00> : vector<8x512xf32>
    %159 = tpu.matmul %158, %8, %cst_52 {dimension_numbers = #tpu.dot_dimension_numbers<[1], [0], [0], [1], [0, 0, 1, 1], [], []>} : vector<8x128xbf16>, vector<128x512xbf16>, vector<8x512xf32> -> vector<8x512xf32>
    %160 = arith.addf %157, %159 : vector<8x512xf32>
    %161 = vector.extract_strided_slice %160 {offsets = [0, 0], sizes = [8, 128], strides = [1, 1]} : vector<8x512xf32> to vector<8x128xf32>
    %162 = arith.negf %161 : vector<8x128xf32>
    %163 = math.exp %162 : vector<8x128xf32>
    %cst_53 = arith.constant 1.000000e+00 : f32
    %164 = vector.broadcast %cst_53 : f32 to vector<8x128xf32>
    %165 = arith.addf %164, %163 : vector<8x128xf32>
    %166 = arith.divf %164, %165 : vector<8x128xf32>
    %167 = vector.extract_strided_slice %160 {offsets = [0, 128], sizes = [8, 128], strides = [1, 1]} : vector<8x512xf32> to vector<8x128xf32>
    %168 = arith.negf %167 : vector<8x128xf32>
    %169 = math.exp %168 : vector<8x128xf32>
    %cst_54 = arith.constant 1.000000e+00 : f32
    %170 = vector.broadcast %cst_54 : f32 to vector<8x128xf32>
    %171 = arith.addf %170, %169 : vector<8x128xf32>
    %172 = arith.divf %170, %171 : vector<8x128xf32>
    %173 = vector.extract_strided_slice %160 {offsets = [0, 256], sizes = [8, 128], strides = [1, 1]} : vector<8x512xf32> to vector<8x128xf32>
    %174 = math.tanh %173 : vector<8x128xf32>
    %175 = vector.extract_strided_slice %160 {offsets = [0, 384], sizes = [8, 128], strides = [1, 1]} : vector<8x512xf32> to vector<8x128xf32>
    %176 = arith.negf %175 : vector<8x128xf32>
    %177 = math.exp %176 : vector<8x128xf32>
    %cst_55 = arith.constant 1.000000e+00 : f32
    %178 = vector.broadcast %cst_55 : f32 to vector<8x128xf32>
    %179 = arith.addf %178, %177 : vector<8x128xf32>
    %180 = arith.divf %178, %179 : vector<8x128xf32>
    %181 = arith.mulf %172, %117 : vector<8x128xf32>
    %182 = arith.mulf %166, %174 : vector<8x128xf32>
    %183 = arith.addf %181, %182 : vector<8x128xf32>
    %184 = math.tanh %183 : vector<8x128xf32>
    %185 = arith.mulf %180, %184 : vector<8x128xf32>
    %186 = arith.truncf %185 : vector<8x128xf32> to vector<8x128xbf16>
    %cst_56 = arith.constant dense<0.000000e+00> : vector<8x512xf32>
    %187 = tpu.matmul %186, %9, %cst_56 {dimension_numbers = #tpu.dot_dimension_numbers<[1], [0], [0], [1], [0, 0, 1, 1], [], []>} : vector<8x128xbf16>, vector<128x512xbf16>, vector<8x512xf32> -> vector<8x512xf32>
    %188 = arith.addf %187, %155 : vector<8x512xf32>
    %189 = vector.broadcast %11 : vector<1x512xf32> to vector<8x512xf32>
    %190 = arith.addf %188, %189 : vector<8x512xf32>
    %191 = vector.extract_strided_slice %190 {offsets = [0, 0], sizes = [8, 128], strides = [1, 1]} : vector<8x512xf32> to vector<8x128xf32>
    %192 = arith.negf %191 : vector<8x128xf32>
    %193 = math.exp %192 : vector<8x128xf32>
    %cst_57 = arith.constant 1.000000e+00 : f32
    %194 = vector.broadcast %cst_57 : f32 to vector<8x128xf32>
    %195 = arith.addf %194, %193 : vector<8x128xf32>
    %196 = arith.divf %194, %195 : vector<8x128xf32>
    %197 = vector.extract_strided_slice %190 {offsets = [0, 128], sizes = [8, 128], strides = [1, 1]} : vector<8x512xf32> to vector<8x128xf32>
    %198 = arith.negf %197 : vector<8x128xf32>
    %199 = math.exp %198 : vector<8x128xf32>
    %cst_58 = arith.constant 1.000000e+00 : f32
    %200 = vector.broadcast %cst_58 : f32 to vector<8x128xf32>
    %201 = arith.addf %200, %199 : vector<8x128xf32>
    %202 = arith.divf %200, %201 : vector<8x128xf32>
    %203 = vector.extract_strided_slice %190 {offsets = [0, 256], sizes = [8, 128], strides = [1, 1]} : vector<8x512xf32> to vector<8x128xf32>
    %204 = math.tanh %203 : vector<8x128xf32>
    %205 = vector.extract_strided_slice %190 {offsets = [0, 384], sizes = [8, 128], strides = [1, 1]} : vector<8x512xf32> to vector<8x128xf32>
    %206 = arith.negf %205 : vector<8x128xf32>
    %207 = math.exp %206 : vector<8x128xf32>
    %cst_59 = arith.constant 1.000000e+00 : f32
    %208 = vector.broadcast %cst_59 : f32 to vector<8x128xf32>
    %209 = arith.addf %208, %207 : vector<8x128xf32>
    %210 = arith.divf %208, %209 : vector<8x128xf32>
    %211 = arith.mulf %202, %147 : vector<8x128xf32>
    %212 = arith.mulf %196, %204 : vector<8x128xf32>
    %213 = arith.addf %211, %212 : vector<8x128xf32>
    %214 = math.tanh %213 : vector<8x128xf32>
    %215 = arith.mulf %210, %214 : vector<8x128xf32>
    %216 = arith.index_cast %153 : i32 to index
    %c0_60 = arith.constant 0 : index
    %217 = vector.load %arg14[%216, %c0_60] : memref<64x128xf32, #tpu.memory_space<vmem>>, vector<8x128xf32>
    tpu.vector_store %arg14[%216, %c0_60], %215 {strides = array<i32>} : memref<64x128xf32, #tpu.memory_space<vmem>>, vector<8x128xf32>,
    %c3_i32 = arith.constant 3 : i32
    %c8_i32_61 = arith.constant 8 : i32
    %218 = arith.muli %c3_i32, %c8_i32_61 : i32
    %219 = tpu.assume_multiple %218, 8 : i32
    %220 = arith.truncf %215 : vector<8x128xf32> to vector<8x128xbf16>
    %cst_62 = arith.constant dense<0.000000e+00> : vector<8x512xf32>
    %221 = tpu.matmul %220, %10, %cst_62 {dimension_numbers = #tpu.dot_dimension_numbers<[1], [0], [0], [1], [0, 0, 1, 1], [], []>} : vector<8x128xbf16>, vector<128x512xbf16>, vector<8x512xf32> -> vector<8x512xf32>
    %222 = arith.index_cast %219 : i32 to index
    %c0_63 = arith.constant 0 : index
    %223 = vector.load %arg13[%222, %c0_63] : memref<64x512xf32, #tpu.memory_space<vmem>>, vector<8x512xf32>
    %224 = arith.truncf %185 : vector<8x128xf32> to vector<8x128xbf16>
    %cst_64 = arith.constant dense<0.000000e+00> : vector<8x512xf32>
    %225 = tpu.matmul %224, %8, %cst_64 {dimension_numbers = #tpu.dot_dimension_numbers<[1], [0], [0], [1], [0, 0, 1, 1], [], []>} : vector<8x128xbf16>, vector<128x512xbf16>, vector<8x512xf32> -> vector<8x512xf32>
    %226 = arith.addf %223, %225 : vector<8x512xf32>
    %227 = vector.extract_strided_slice %226 {offsets = [0, 0], sizes = [8, 128], strides = [1, 1]} : vector<8x512xf32> to vector<8x128xf32>
    %228 = arith.negf %227 : vector<8x128xf32>
    %229 = math.exp %228 : vector<8x128xf32>
    %cst_65 = arith.constant 1.000000e+00 : f32
    %230 = vector.broadcast %cst_65 : f32 to vector<8x128xf32>
    %231 = arith.addf %230, %229 : vector<8x128xf32>
    %232 = arith.divf %230, %231 : vector<8x128xf32>
    %233 = vector.extract_strided_slice %226 {offsets = [0, 128], sizes = [8, 128], strides = [1, 1]} : vector<8x512xf32> to vector<8x128xf32>
    %234 = arith.negf %233 : vector<8x128xf32>
    %235 = math.exp %234 : vector<8x128xf32>
    %cst_66 = arith.constant 1.000000e+00 : f32
    %236 = vector.broadcast %cst_66 : f32 to vector<8x128xf32>
    %237 = arith.addf %236, %235 : vector<8x128xf32>
    %238 = arith.divf %236, %237 : vector<8x128xf32>
    %239 = vector.extract_strided_slice %226 {offsets = [0, 256], sizes = [8, 128], strides = [1, 1]} : vector<8x512xf32> to vector<8x128xf32>
    %240 = math.tanh %239 : vector<8x128xf32>
    %241 = vector.extract_strided_slice %226 {offsets = [0, 384], sizes = [8, 128], strides = [1, 1]} : vector<8x512xf32> to vector<8x128xf32>
    %242 = arith.negf %241 : vector<8x128xf32>
    %243 = math.exp %242 : vector<8x128xf32>
    %cst_67 = arith.constant 1.000000e+00 : f32
    %244 = vector.broadcast %cst_67 : f32 to vector<8x128xf32>
    %245 = arith.addf %244, %243 : vector<8x128xf32>
    %246 = arith.divf %244, %245 : vector<8x128xf32>
    %247 = arith.mulf %238, %183 : vector<8x128xf32>
    %248 = arith.mulf %232, %240 : vector<8x128xf32>
    %249 = arith.addf %247, %248 : vector<8x128xf32>
    %250 = math.tanh %249 : vector<8x128xf32>
    %251 = arith.mulf %246, %250 : vector<8x128xf32>
    %252 = arith.truncf %251 : vector<8x128xf32> to vector<8x128xbf16>
    %cst_68 = arith.constant dense<0.000000e+00> : vector<8x512xf32>
    %253 = tpu.matmul %252, %9, %cst_68 {dimension_numbers = #tpu.dot_dimension_numbers<[1], [0], [0], [1], [0, 0, 1, 1], [], []>} : vector<8x128xbf16>, vector<128x512xbf16>, vector<8x512xf32> -> vector<8x512xf32>
    %254 = arith.addf %253, %221 : vector<8x512xf32>
    %255 = vector.broadcast %11 : vector<1x512xf32> to vector<8x512xf32>
    %256 = arith.addf %254, %255 : vector<8x512xf32>
    %257 = vector.extract_strided_slice %256 {offsets = [0, 0], sizes = [8, 128], strides = [1, 1]} : vector<8x512xf32> to vector<8x128xf32>
    %258 = arith.negf %257 : vector<8x128xf32>
    %259 = math.exp %258 : vector<8x128xf32>
    %cst_69 = arith.constant 1.000000e+00 : f32
    %260 = vector.broadcast %cst_69 : f32 to vector<8x128xf32>
    %261 = arith.addf %260, %259 : vector<8x128xf32>
    %262 = arith.divf %260, %261 : vector<8x128xf32>
    %263 = vector.extract_strided_slice %256 {offsets = [0, 128], sizes = [8, 128], strides = [1, 1]} : vector<8x512xf32> to vector<8x128xf32>
    %264 = arith.negf %263 : vector<8x128xf32>
    %265 = math.exp %264 : vector<8x128xf32>
    %cst_70 = arith.constant 1.000000e+00 : f32
    %266 = vector.broadcast %cst_70 : f32 to vector<8x128xf32>
    %267 = arith.addf %266, %265 : vector<8x128xf32>
    %268 = arith.divf %266, %267 : vector<8x128xf32>
    %269 = vector.extract_strided_slice %256 {offsets = [0, 256], sizes = [8, 128], strides = [1, 1]} : vector<8x512xf32> to vector<8x128xf32>
    %270 = math.tanh %269 : vector<8x128xf32>
    %271 = vector.extract_strided_slice %256 {offsets = [0, 384], sizes = [8, 128], strides = [1, 1]} : vector<8x512xf32> to vector<8x128xf32>
    %272 = arith.negf %271 : vector<8x128xf32>
    %273 = math.exp %272 : vector<8x128xf32>
    %cst_71 = arith.constant 1.000000e+00 : f32
    %274 = vector.broadcast %cst_71 : f32 to vector<8x128xf32>
    %275 = arith.addf %274, %273 : vector<8x128xf32>
    %276 = arith.divf %274, %275 : vector<8x128xf32>
    %277 = arith.mulf %268, %213 : vector<8x128xf32>
    %278 = arith.mulf %262, %270 : vector<8x128xf32>
    %279 = arith.addf %277, %278 : vector<8x128xf32>
    %280 = math.tanh %279 : vector<8x128xf32>
    %281 = arith.mulf %276, %280 : vector<8x128xf32>
    %282 = arith.index_cast %219 : i32 to index
    %c0_72 = arith.constant 0 : index
    %283 = vector.load %arg14[%282, %c0_72] : memref<64x128xf32, #tpu.memory_space<vmem>>, vector<8x128xf32>
    tpu.vector_store %arg14[%282, %c0_72], %281 {strides = array<i32>} : memref<64x128xf32, #tpu.memory_space<vmem>>, vector<8x128xf32>,
    %c4_i32 = arith.constant 4 : i32
    %c8_i32_73 = arith.constant 8 : i32
    %284 = arith.muli %c4_i32, %c8_i32_73 : i32
    %285 = tpu.assume_multiple %284, 8 : i32
    %286 = arith.truncf %281 : vector<8x128xf32> to vector<8x128xbf16>
    %cst_74 = arith.constant dense<0.000000e+00> : vector<8x512xf32>
    %287 = tpu.matmul %286, %10, %cst_74 {dimension_numbers = #tpu.dot_dimension_numbers<[1], [0], [0], [1], [0, 0, 1, 1], [], []>} : vector<8x128xbf16>, vector<128x512xbf16>, vector<8x512xf32> -> vector<8x512xf32>
    %288 = arith.index_cast %285 : i32 to index
    %c0_75 = arith.constant 0 : index
    %289 = vector.load %arg13[%288, %c0_75] : memref<64x512xf32, #tpu.memory_space<vmem>>, vector<8x512xf32>
    %290 = arith.truncf %251 : vector<8x128xf32> to vector<8x128xbf16>
    %cst_76 = arith.constant dense<0.000000e+00> : vector<8x512xf32>
    %291 = tpu.matmul %290, %8, %cst_76 {dimension_numbers = #tpu.dot_dimension_numbers<[1], [0], [0], [1], [0, 0, 1, 1], [], []>} : vector<8x128xbf16>, vector<128x512xbf16>, vector<8x512xf32> -> vector<8x512xf32>
    %292 = arith.addf %289, %291 : vector<8x512xf32>
    %293 = vector.extract_strided_slice %292 {offsets = [0, 0], sizes = [8, 128], strides = [1, 1]} : vector<8x512xf32> to vector<8x128xf32>
    %294 = arith.negf %293 : vector<8x128xf32>
    %295 = math.exp %294 : vector<8x128xf32>
    %cst_77 = arith.constant 1.000000e+00 : f32
    %296 = vector.broadcast %cst_77 : f32 to vector<8x128xf32>
    %297 = arith.addf %296, %295 : vector<8x128xf32>
    %298 = arith.divf %296, %297 : vector<8x128xf32>
    %299 = vector.extract_strided_slice %292 {offsets = [0, 128], sizes = [8, 128], strides = [1, 1]} : vector<8x512xf32> to vector<8x128xf32>
    %300 = arith.negf %299 : vector<8x128xf32>
    %301 = math.exp %300 : vector<8x128xf32>
    %cst_78 = arith.constant 1.000000e+00 : f32
    %302 = vector.broadcast %cst_78 : f32 to vector<8x128xf32>
    %303 = arith.addf %302, %301 : vector<8x128xf32>
    %304 = arith.divf %302, %303 : vector<8x128xf32>
    %305 = vector.extract_strided_slice %292 {offsets = [0, 256], sizes = [8, 128], strides = [1, 1]} : vector<8x512xf32> to vector<8x128xf32>
    %306 = math.tanh %305 : vector<8x128xf32>
    %307 = vector.extract_strided_slice %292 {offsets = [0, 384], sizes = [8, 128], strides = [1, 1]} : vector<8x512xf32> to vector<8x128xf32>
    %308 = arith.negf %307 : vector<8x128xf32>
    %309 = math.exp %308 : vector<8x128xf32>
    %cst_79 = arith.constant 1.000000e+00 : f32
    %310 = vector.broadcast %cst_79 : f32 to vector<8x128xf32>
    %311 = arith.addf %310, %309 : vector<8x128xf32>
    %312 = arith.divf %310, %311 : vector<8x128xf32>
    %313 = arith.mulf %304, %249 : vector<8x128xf32>
    %314 = arith.mulf %298, %306 : vector<8x128xf32>
    %315 = arith.addf %313, %314 : vector<8x128xf32>
    %316 = math.tanh %315 : vector<8x128xf32>
    %317 = arith.mulf %312, %316 : vector<8x128xf32>
    %318 = arith.truncf %317 : vector<8x128xf32> to vector<8x128xbf16>
    %cst_80 = arith.constant dense<0.000000e+00> : vector<8x512xf32>
    %319 = tpu.matmul %318, %9, %cst_80 {dimension_numbers = #tpu.dot_dimension_numbers<[1], [0], [0], [1], [0, 0, 1, 1], [], []>} : vector<8x128xbf16>, vector<128x512xbf16>, vector<8x512xf32> -> vector<8x512xf32>
    %320 = arith.addf %319, %287 : vector<8x512xf32>
    %321 = vector.broadcast %11 : vector<1x512xf32> to vector<8x512xf32>
    %322 = arith.addf %320, %321 : vector<8x512xf32>
    %323 = vector.extract_strided_slice %322 {offsets = [0, 0], sizes = [8, 128], strides = [1, 1]} : vector<8x512xf32> to vector<8x128xf32>
    %324 = arith.negf %323 : vector<8x128xf32>
    %325 = math.exp %324 : vector<8x128xf32>
    %cst_81 = arith.constant 1.000000e+00 : f32
    %326 = vector.broadcast %cst_81 : f32 to vector<8x128xf32>
    %327 = arith.addf %326, %325 : vector<8x128xf32>
    %328 = arith.divf %326, %327 : vector<8x128xf32>
    %329 = vector.extract_strided_slice %322 {offsets = [0, 128], sizes = [8, 128], strides = [1, 1]} : vector<8x512xf32> to vector<8x128xf32>
    %330 = arith.negf %329 : vector<8x128xf32>
    %331 = math.exp %330 : vector<8x128xf32>
    %cst_82 = arith.constant 1.000000e+00 : f32
    %332 = vector.broadcast %cst_82 : f32 to vector<8x128xf32>
    %333 = arith.addf %332, %331 : vector<8x128xf32>
    %334 = arith.divf %332, %333 : vector<8x128xf32>
    %335 = vector.extract_strided_slice %322 {offsets = [0, 256], sizes = [8, 128], strides = [1, 1]} : vector<8x512xf32> to vector<8x128xf32>
    %336 = math.tanh %335 : vector<8x128xf32>
    %337 = vector.extract_strided_slice %322 {offsets = [0, 384], sizes = [8, 128], strides = [1, 1]} : vector<8x512xf32> to vector<8x128xf32>
    %338 = arith.negf %337 : vector<8x128xf32>
    %339 = math.exp %338 : vector<8x128xf32>
    %cst_83 = arith.constant 1.000000e+00 : f32
    %340 = vector.broadcast %cst_83 : f32 to vector<8x128xf32>
    %341 = arith.addf %340, %339 : vector<8x128xf32>
    %342 = arith.divf %340, %341 : vector<8x128xf32>
    %343 = arith.mulf %334, %279 : vector<8x128xf32>
    %344 = arith.mulf %328, %336 : vector<8x128xf32>
    %345 = arith.addf %343, %344 : vector<8x128xf32>
    %346 = math.tanh %345 : vector<8x128xf32>
    %347 = arith.mulf %342, %346 : vector<8x128xf32>
    %348 = arith.index_cast %285 : i32 to index
    %c0_84 = arith.constant 0 : index
    %349 = vector.load %arg14[%348, %c0_84] : memref<64x128xf32, #tpu.memory_space<vmem>>, vector<8x128xf32>
    tpu.vector_store %arg14[%348, %c0_84], %347 {strides = array<i32>} : memref<64x128xf32, #tpu.memory_space<vmem>>, vector<8x128xf32>,
    %c5_i32 = arith.constant 5 : i32
    %c8_i32_85 = arith.constant 8 : i32
    %350 = arith.muli %c5_i32, %c8_i32_85 : i32
    %351 = tpu.assume_multiple %350, 8 : i32
    %352 = arith.truncf %347 : vector<8x128xf32> to vector<8x128xbf16>
    %cst_86 = arith.constant dense<0.000000e+00> : vector<8x512xf32>
    %353 = tpu.matmul %352, %10, %cst_86 {dimension_numbers = #tpu.dot_dimension_numbers<[1], [0], [0], [1], [0, 0, 1, 1], [], []>} : vector<8x128xbf16>, vector<128x512xbf16>, vector<8x512xf32> -> vector<8x512xf32>
    %354 = arith.index_cast %351 : i32 to index
    %c0_87 = arith.constant 0 : index
    %355 = vector.load %arg13[%354, %c0_87] : memref<64x512xf32, #tpu.memory_space<vmem>>, vector<8x512xf32>
    %356 = arith.truncf %317 : vector<8x128xf32> to vector<8x128xbf16>
    %cst_88 = arith.constant dense<0.000000e+00> : vector<8x512xf32>
    %357 = tpu.matmul %356, %8, %cst_88 {dimension_numbers = #tpu.dot_dimension_numbers<[1], [0], [0], [1], [0, 0, 1, 1], [], []>} : vector<8x128xbf16>, vector<128x512xbf16>, vector<8x512xf32> -> vector<8x512xf32>
    %358 = arith.addf %355, %357 : vector<8x512xf32>
    %359 = vector.extract_strided_slice %358 {offsets = [0, 0], sizes = [8, 128], strides = [1, 1]} : vector<8x512xf32> to vector<8x128xf32>
    %360 = arith.negf %359 : vector<8x128xf32>
    %361 = math.exp %360 : vector<8x128xf32>
    %cst_89 = arith.constant 1.000000e+00 : f32
    %362 = vector.broadcast %cst_89 : f32 to vector<8x128xf32>
    %363 = arith.addf %362, %361 : vector<8x128xf32>
    %364 = arith.divf %362, %363 : vector<8x128xf32>
    %365 = vector.extract_strided_slice %358 {offsets = [0, 128], sizes = [8, 128], strides = [1, 1]} : vector<8x512xf32> to vector<8x128xf32>
    %366 = arith.negf %365 : vector<8x128xf32>
    %367 = math.exp %366 : vector<8x128xf32>
    %cst_90 = arith.constant 1.000000e+00 : f32
    %368 = vector.broadcast %cst_90 : f32 to vector<8x128xf32>
    %369 = arith.addf %368, %367 : vector<8x128xf32>
    %370 = arith.divf %368, %369 : vector<8x128xf32>
    %371 = vector.extract_strided_slice %358 {offsets = [0, 256], sizes = [8, 128], strides = [1, 1]} : vector<8x512xf32> to vector<8x128xf32>
    %372 = math.tanh %371 : vector<8x128xf32>
    %373 = vector.extract_strided_slice %358 {offsets = [0, 384], sizes = [8, 128], strides = [1, 1]} : vector<8x512xf32> to vector<8x128xf32>
    %374 = arith.negf %373 : vector<8x128xf32>
    %375 = math.exp %374 : vector<8x128xf32>
    %cst_91 = arith.constant 1.000000e+00 : f32
    %376 = vector.broadcast %cst_91 : f32 to vector<8x128xf32>
    %377 = arith.addf %376, %375 : vector<8x128xf32>
    %378 = arith.divf %376, %377 : vector<8x128xf32>
    %379 = arith.mulf %370, %315 : vector<8x128xf32>
    %380 = arith.mulf %364, %372 : vector<8x128xf32>
    %381 = arith.addf %379, %380 : vector<8x128xf32>
    %382 = math.tanh %381 : vector<8x128xf32>
    %383 = arith.mulf %378, %382 : vector<8x128xf32>
    %384 = arith.truncf %383 : vector<8x128xf32> to vector<8x128xbf16>
    %cst_92 = arith.constant dense<0.000000e+00> : vector<8x512xf32>
    %385 = tpu.matmul %384, %9, %cst_92 {dimension_numbers = #tpu.dot_dimension_numbers<[1], [0], [0], [1], [0, 0, 1, 1], [], []>} : vector<8x128xbf16>, vector<128x512xbf16>, vector<8x512xf32> -> vector<8x512xf32>
    %386 = arith.addf %385, %353 : vector<8x512xf32>
    %387 = vector.broadcast %11 : vector<1x512xf32> to vector<8x512xf32>
    %388 = arith.addf %386, %387 : vector<8x512xf32>
    %389 = vector.extract_strided_slice %388 {offsets = [0, 0], sizes = [8, 128], strides = [1, 1]} : vector<8x512xf32> to vector<8x128xf32>
    %390 = arith.negf %389 : vector<8x128xf32>
    %391 = math.exp %390 : vector<8x128xf32>
    %cst_93 = arith.constant 1.000000e+00 : f32
    %392 = vector.broadcast %cst_93 : f32 to vector<8x128xf32>
    %393 = arith.addf %392, %391 : vector<8x128xf32>
    %394 = arith.divf %392, %393 : vector<8x128xf32>
    %395 = vector.extract_strided_slice %388 {offsets = [0, 128], sizes = [8, 128], strides = [1, 1]} : vector<8x512xf32> to vector<8x128xf32>
    %396 = arith.negf %395 : vector<8x128xf32>
    %397 = math.exp %396 : vector<8x128xf32>
    %cst_94 = arith.constant 1.000000e+00 : f32
    %398 = vector.broadcast %cst_94 : f32 to vector<8x128xf32>
    %399 = arith.addf %398, %397 : vector<8x128xf32>
    %400 = arith.divf %398, %399 : vector<8x128xf32>
    %401 = vector.extract_strided_slice %388 {offsets = [0, 256], sizes = [8, 128], strides = [1, 1]} : vector<8x512xf32> to vector<8x128xf32>
    %402 = math.tanh %401 : vector<8x128xf32>
    %403 = vector.extract_strided_slice %388 {offsets = [0, 384], sizes = [8, 128], strides = [1, 1]} : vector<8x512xf32> to vector<8x128xf32>
    %404 = arith.negf %403 : vector<8x128xf32>
    %405 = math.exp %404 : vector<8x128xf32>
    %cst_95 = arith.constant 1.000000e+00 : f32
    %406 = vector.broadcast %cst_95 : f32 to vector<8x128xf32>
    %407 = arith.addf %406, %405 : vector<8x128xf32>
    %408 = arith.divf %406, %407 : vector<8x128xf32>
    %409 = arith.mulf %400, %345 : vector<8x128xf32>
    %410 = arith.mulf %394, %402 : vector<8x128xf32>
    %411 = arith.addf %409, %410 : vector<8x128xf32>
    %412 = math.tanh %411 : vector<8x128xf32>
    %413 = arith.mulf %408, %412 : vector<8x128xf32>
    %414 = arith.index_cast %351 : i32 to index
    %c0_96 = arith.constant 0 : index
    %415 = vector.load %arg14[%414, %c0_96] : memref<64x128xf32, #tpu.memory_space<vmem>>, vector<8x128xf32>
    tpu.vector_store %arg14[%414, %c0_96], %413 {strides = array<i32>} : memref<64x128xf32, #tpu.memory_space<vmem>>, vector<8x128xf32>,
    %c6_i32 = arith.constant 6 : i32
    %c8_i32_97 = arith.constant 8 : i32
    %416 = arith.muli %c6_i32, %c8_i32_97 : i32
    %417 = tpu.assume_multiple %416, 8 : i32
    %418 = arith.truncf %413 : vector<8x128xf32> to vector<8x128xbf16>
    %cst_98 = arith.constant dense<0.000000e+00> : vector<8x512xf32>
    %419 = tpu.matmul %418, %10, %cst_98 {dimension_numbers = #tpu.dot_dimension_numbers<[1], [0], [0], [1], [0, 0, 1, 1], [], []>} : vector<8x128xbf16>, vector<128x512xbf16>, vector<8x512xf32> -> vector<8x512xf32>
    %420 = arith.index_cast %417 : i32 to index
    %c0_99 = arith.constant 0 : index
    %421 = vector.load %arg13[%420, %c0_99] : memref<64x512xf32, #tpu.memory_space<vmem>>, vector<8x512xf32>
    %422 = arith.truncf %383 : vector<8x128xf32> to vector<8x128xbf16>
    %cst_100 = arith.constant dense<0.000000e+00> : vector<8x512xf32>
    %423 = tpu.matmul %422, %8, %cst_100 {dimension_numbers = #tpu.dot_dimension_numbers<[1], [0], [0], [1], [0, 0, 1, 1], [], []>} : vector<8x128xbf16>, vector<128x512xbf16>, vector<8x512xf32> -> vector<8x512xf32>
    %424 = arith.addf %421, %423 : vector<8x512xf32>
    %425 = vector.extract_strided_slice %424 {offsets = [0, 0], sizes = [8, 128], strides = [1, 1]} : vector<8x512xf32> to vector<8x128xf32>
    %426 = arith.negf %425 : vector<8x128xf32>
    %427 = math.exp %426 : vector<8x128xf32>
    %cst_101 = arith.constant 1.000000e+00 : f32
    %428 = vector.broadcast %cst_101 : f32 to vector<8x128xf32>
    %429 = arith.addf %428, %427 : vector<8x128xf32>
    %430 = arith.divf %428, %429 : vector<8x128xf32>
    %431 = vector.extract_strided_slice %424 {offsets = [0, 128], sizes = [8, 128], strides = [1, 1]} : vector<8x512xf32> to vector<8x128xf32>
    %432 = arith.negf %431 : vector<8x128xf32>
    %433 = math.exp %432 : vector<8x128xf32>
    %cst_102 = arith.constant 1.000000e+00 : f32
    %434 = vector.broadcast %cst_102 : f32 to vector<8x128xf32>
    %435 = arith.addf %434, %433 : vector<8x128xf32>
    %436 = arith.divf %434, %435 : vector<8x128xf32>
    %437 = vector.extract_strided_slice %424 {offsets = [0, 256], sizes = [8, 128], strides = [1, 1]} : vector<8x512xf32> to vector<8x128xf32>
    %438 = math.tanh %437 : vector<8x128xf32>
    %439 = vector.extract_strided_slice %424 {offsets = [0, 384], sizes = [8, 128], strides = [1, 1]} : vector<8x512xf32> to vector<8x128xf32>
    %440 = arith.negf %439 : vector<8x128xf32>
    %441 = math.exp %440 : vector<8x128xf32>
    %cst_103 = arith.constant 1.000000e+00 : f32
    %442 = vector.broadcast %cst_103 : f32 to vector<8x128xf32>
    %443 = arith.addf %442, %441 : vector<8x128xf32>
    %444 = arith.divf %442, %443 : vector<8x128xf32>
    %445 = arith.mulf %436, %381 : vector<8x128xf32>
    %446 = arith.mulf %430, %438 : vector<8x128xf32>
    %447 = arith.addf %445, %446 : vector<8x128xf32>
    %448 = math.tanh %447 : vector<8x128xf32>
    %449 = arith.mulf %444, %448 : vector<8x128xf32>
    %450 = arith.truncf %449 : vector<8x128xf32> to vector<8x128xbf16>
    %cst_104 = arith.constant dense<0.000000e+00> : vector<8x512xf32>
    %451 = tpu.matmul %450, %9, %cst_104 {dimension_numbers = #tpu.dot_dimension_numbers<[1], [0], [0], [1], [0, 0, 1, 1], [], []>} : vector<8x128xbf16>, vector<128x512xbf16>, vector<8x512xf32> -> vector<8x512xf32>
    %452 = arith.addf %451, %419 : vector<8x512xf32>
    %453 = vector.broadcast %11 : vector<1x512xf32> to vector<8x512xf32>
    %454 = arith.addf %452, %453 : vector<8x512xf32>
    %455 = vector.extract_strided_slice %454 {offsets = [0, 0], sizes = [8, 128], strides = [1, 1]} : vector<8x512xf32> to vector<8x128xf32>
    %456 = arith.negf %455 : vector<8x128xf32>
    %457 = math.exp %456 : vector<8x128xf32>
    %cst_105 = arith.constant 1.000000e+00 : f32
    %458 = vector.broadcast %cst_105 : f32 to vector<8x128xf32>
    %459 = arith.addf %458, %457 : vector<8x128xf32>
    %460 = arith.divf %458, %459 : vector<8x128xf32>
    %461 = vector.extract_strided_slice %454 {offsets = [0, 128], sizes = [8, 128], strides = [1, 1]} : vector<8x512xf32> to vector<8x128xf32>
    %462 = arith.negf %461 : vector<8x128xf32>
    %463 = math.exp %462 : vector<8x128xf32>
    %cst_106 = arith.constant 1.000000e+00 : f32
    %464 = vector.broadcast %cst_106 : f32 to vector<8x128xf32>
    %465 = arith.addf %464, %463 : vector<8x128xf32>
    %466 = arith.divf %464, %465 : vector<8x128xf32>
    %467 = vector.extract_strided_slice %454 {offsets = [0, 256], sizes = [8, 128], strides = [1, 1]} : vector<8x512xf32> to vector<8x128xf32>
    %468 = math.tanh %467 : vector<8x128xf32>
    %469 = vector.extract_strided_slice %454 {offsets = [0, 384], sizes = [8, 128], strides = [1, 1]} : vector<8x512xf32> to vector<8x128xf32>
    %470 = arith.negf %469 : vector<8x128xf32>
    %471 = math.exp %470 : vector<8x128xf32>
    %cst_107 = arith.constant 1.000000e+00 : f32
    %472 = vector.broadcast %cst_107 : f32 to vector<8x128xf32>
    %473 = arith.addf %472, %471 : vector<8x128xf32>
    %474 = arith.divf %472, %473 : vector<8x128xf32>
    %475 = arith.mulf %466, %411 : vector<8x128xf32>
    %476 = arith.mulf %460, %468 : vector<8x128xf32>
    %477 = arith.addf %475, %476 : vector<8x128xf32>
    %478 = math.tanh %477 : vector<8x128xf32>
    %479 = arith.mulf %474, %478 : vector<8x128xf32>
    %480 = arith.index_cast %417 : i32 to index
    %c0_108 = arith.constant 0 : index
    %481 = vector.load %arg14[%480, %c0_108] : memref<64x128xf32, #tpu.memory_space<vmem>>, vector<8x128xf32>
    tpu.vector_store %arg14[%480, %c0_108], %479 {strides = array<i32>} : memref<64x128xf32, #tpu.memory_space<vmem>>, vector<8x128xf32>,
    %c7_i32 = arith.constant 7 : i32
    %c8_i32_109 = arith.constant 8 : i32
    %482 = arith.muli %c7_i32, %c8_i32_109 : i32
    %483 = tpu.assume_multiple %482, 8 : i32
    %484 = arith.truncf %479 : vector<8x128xf32> to vector<8x128xbf16>
    %cst_110 = arith.constant dense<0.000000e+00> : vector<8x512xf32>
    %485 = tpu.matmul %484, %10, %cst_110 {dimension_numbers = #tpu.dot_dimension_numbers<[1], [0], [0], [1], [0, 0, 1, 1], [], []>} : vector<8x128xbf16>, vector<128x512xbf16>, vector<8x512xf32> -> vector<8x512xf32>
    %486 = arith.index_cast %483 : i32 to index
    %c0_111 = arith.constant 0 : index
    %487 = vector.load %arg13[%486, %c0_111] : memref<64x512xf32, #tpu.memory_space<vmem>>, vector<8x512xf32>
    %488 = arith.truncf %449 : vector<8x128xf32> to vector<8x128xbf16>
    %cst_112 = arith.constant dense<0.000000e+00> : vector<8x512xf32>
    %489 = tpu.matmul %488, %8, %cst_112 {dimension_numbers = #tpu.dot_dimension_numbers<[1], [0], [0], [1], [0, 0, 1, 1], [], []>} : vector<8x128xbf16>, vector<128x512xbf16>, vector<8x512xf32> -> vector<8x512xf32>
    %490 = arith.addf %487, %489 : vector<8x512xf32>
    %491 = vector.extract_strided_slice %490 {offsets = [0, 0], sizes = [8, 128], strides = [1, 1]} : vector<8x512xf32> to vector<8x128xf32>
    %492 = arith.negf %491 : vector<8x128xf32>
    %493 = math.exp %492 : vector<8x128xf32>
    %cst_113 = arith.constant 1.000000e+00 : f32
    %494 = vector.broadcast %cst_113 : f32 to vector<8x128xf32>
    %495 = arith.addf %494, %493 : vector<8x128xf32>
    %496 = arith.divf %494, %495 : vector<8x128xf32>
    %497 = vector.extract_strided_slice %490 {offsets = [0, 128], sizes = [8, 128], strides = [1, 1]} : vector<8x512xf32> to vector<8x128xf32>
    %498 = arith.negf %497 : vector<8x128xf32>
    %499 = math.exp %498 : vector<8x128xf32>
    %cst_114 = arith.constant 1.000000e+00 : f32
    %500 = vector.broadcast %cst_114 : f32 to vector<8x128xf32>
    %501 = arith.addf %500, %499 : vector<8x128xf32>
    %502 = arith.divf %500, %501 : vector<8x128xf32>
    %503 = vector.extract_strided_slice %490 {offsets = [0, 256], sizes = [8, 128], strides = [1, 1]} : vector<8x512xf32> to vector<8x128xf32>
    %504 = math.tanh %503 : vector<8x128xf32>
    %505 = vector.extract_strided_slice %490 {offsets = [0, 384], sizes = [8, 128], strides = [1, 1]} : vector<8x512xf32> to vector<8x128xf32>
    %506 = arith.negf %505 : vector<8x128xf32>
    %507 = math.exp %506 : vector<8x128xf32>
    %cst_115 = arith.constant 1.000000e+00 : f32
    %508 = vector.broadcast %cst_115 : f32 to vector<8x128xf32>
    %509 = arith.addf %508, %507 : vector<8x128xf32>
    %510 = arith.divf %508, %509 : vector<8x128xf32>
    %511 = arith.mulf %502, %447 : vector<8x128xf32>
    %512 = arith.mulf %496, %504 : vector<8x128xf32>
    %513 = arith.addf %511, %512 : vector<8x128xf32>
    %514 = math.tanh %513 : vector<8x128xf32>
    %515 = arith.mulf %510, %514 : vector<8x128xf32>
    %516 = arith.truncf %515 : vector<8x128xf32> to vector<8x128xbf16>
    %cst_116 = arith.constant dense<0.000000e+00> : vector<8x512xf32>
    %517 = tpu.matmul %516, %9, %cst_116 {dimension_numbers = #tpu.dot_dimension_numbers<[1], [0], [0], [1], [0, 0, 1, 1], [], []>} : vector<8x128xbf16>, vector<128x512xbf16>, vector<8x512xf32> -> vector<8x512xf32>
    %518 = arith.addf %517, %485 : vector<8x512xf32>
    %519 = vector.broadcast %11 : vector<1x512xf32> to vector<8x512xf32>
    %520 = arith.addf %518, %519 : vector<8x512xf32>
    %521 = vector.extract_strided_slice %520 {offsets = [0, 0], sizes = [8, 128], strides = [1, 1]} : vector<8x512xf32> to vector<8x128xf32>
    %522 = arith.negf %521 : vector<8x128xf32>
    %523 = math.exp %522 : vector<8x128xf32>
    %cst_117 = arith.constant 1.000000e+00 : f32
    %524 = vector.broadcast %cst_117 : f32 to vector<8x128xf32>
    %525 = arith.addf %524, %523 : vector<8x128xf32>
    %526 = arith.divf %524, %525 : vector<8x128xf32>
    %527 = vector.extract_strided_slice %520 {offsets = [0, 128], sizes = [8, 128], strides = [1, 1]} : vector<8x512xf32> to vector<8x128xf32>
    %528 = arith.negf %527 : vector<8x128xf32>
    %529 = math.exp %528 : vector<8x128xf32>
    %cst_118 = arith.constant 1.000000e+00 : f32
    %530 = vector.broadcast %cst_118 : f32 to vector<8x128xf32>
    %531 = arith.addf %530, %529 : vector<8x128xf32>
    %532 = arith.divf %530, %531 : vector<8x128xf32>
    %533 = vector.extract_strided_slice %520 {offsets = [0, 256], sizes = [8, 128], strides = [1, 1]} : vector<8x512xf32> to vector<8x128xf32>
    %534 = math.tanh %533 : vector<8x128xf32>
    %535 = vector.extract_strided_slice %520 {offsets = [0, 384], sizes = [8, 128], strides = [1, 1]} : vector<8x512xf32> to vector<8x128xf32>
    %536 = arith.negf %535 : vector<8x128xf32>
    %537 = math.exp %536 : vector<8x128xf32>
    %cst_119 = arith.constant 1.000000e+00 : f32
    %538 = vector.broadcast %cst_119 : f32 to vector<8x128xf32>
    %539 = arith.addf %538, %537 : vector<8x128xf32>
    %540 = arith.divf %538, %539 : vector<8x128xf32>
    %541 = arith.mulf %532, %477 : vector<8x128xf32>
    %542 = arith.mulf %526, %534 : vector<8x128xf32>
    %543 = arith.addf %541, %542 : vector<8x128xf32>
    %544 = math.tanh %543 : vector<8x128xf32>
    %545 = arith.mulf %540, %544 : vector<8x128xf32>
    %546 = arith.index_cast %483 : i32 to index
    %c0_120 = arith.constant 0 : index
    %547 = vector.load %arg14[%546, %c0_120] : memref<64x128xf32, #tpu.memory_space<vmem>>, vector<8x128xf32>
    tpu.vector_store %arg14[%546, %c0_120], %545 {strides = array<i32>} : memref<64x128xf32, #tpu.memory_space<vmem>>, vector<8x128xf32>,
    %c8_i32_121 = arith.constant 8 : i32
    %c0_122 = arith.constant 0 : index
    %c0_123 = arith.constant 0 : index
    %c0_124 = arith.constant 0 : index
    %548 = vector.load %arg11[%c0_122, %c0_123, %c0_124] : memref<2x8x128xf32, #tpu.memory_space<vmem>>, vector<1x8x128xf32>
    %549 = vector.shape_cast %548 : vector<1x8x128xf32> to vector<8x128xf32>
    %550 = vector.shape_cast %515 : vector<8x128xf32> to vector<1x8x128xf32>
    tpu.vector_store %arg11[%c0_122, %c0_123, %c0_124], %550 {strides = array<i32>} : memref<2x8x128xf32, #tpu.memory_space<vmem>>, vector<1x8x128xf32>,
    %c1_125 = arith.constant 1 : index
    %c0_126 = arith.constant 0 : index
    %c0_127 = arith.constant 0 : index
    %551 = vector.load %arg11[%c1_125, %c0_126, %c0_127] : memref<2x8x128xf32, #tpu.memory_space<vmem>>, vector<1x8x128xf32>
    %552 = vector.shape_cast %551 : vector<1x8x128xf32> to vector<8x128xf32>
    %553 = vector.shape_cast %545 : vector<8x128xf32> to vector<1x8x128xf32>
    tpu.vector_store %arg11[%c1_125, %c0_126, %c0_127], %553 {strides = array<i32>} : memref<2x8x128xf32, #tpu.memory_space<vmem>>, vector<1x8x128xf32>,
    %c0_128 = arith.constant 0 : index
    %c0_129 = arith.constant 0 : index
    %c0_130 = arith.constant 0 : index
    %554 = vector.load %arg12[%c0_128, %c0_129, %c0_130] : memref<2x8x128xf32, #tpu.memory_space<vmem>>, vector<1x8x128xf32>
    %555 = vector.shape_cast %554 : vector<1x8x128xf32> to vector<8x128xf32>
    %556 = vector.shape_cast %513 : vector<8x128xf32> to vector<1x8x128xf32>
    tpu.vector_store %arg12[%c0_128, %c0_129, %c0_130], %556 {strides = array<i32>} : memref<2x8x128xf32, #tpu.memory_space<vmem>>, vector<1x8x128xf32>,
    %c1_131 = arith.constant 1 : index
    %c0_132 = arith.constant 0 : index
    %c0_133 = arith.constant 0 : index
    %557 = vector.load %arg12[%c1_131, %c0_132, %c0_133] : memref<2x8x128xf32, #tpu.memory_space<vmem>>, vector<1x8x128xf32>
    %558 = vector.shape_cast %557 : vector<1x8x128xf32> to vector<8x128xf32>
    %559 = vector.shape_cast %543 : vector<8x128xf32> to vector<1x8x128xf32>
    tpu.vector_store %arg12[%c1_131, %c0_132, %c0_133], %559 {strides = array<i32>} : memref<2x8x128xf32, #tpu.memory_space<vmem>>, vector<1x8x128xf32>,
    %c0_134 = arith.constant 0 : index
    %c0_135 = arith.constant 0 : index
    %560 = vector.load %arg14[%c0_134, %c0_135] : memref<64x128xf32, #tpu.memory_space<vmem>>, vector<64x128xf32>
    %561 = arith.truncf %560 : vector<64x128xf32> to vector<64x128xbf16>
    %c0_136 = arith.constant 0 : index
    %c0_137 = arith.constant 0 : index
    %562 = vector.load %arg9[%c0_136, %c0_137] : memref<128x384xbf16, #tpu.memory_space<vmem>>, vector<128x384xbf16>
    %cst_138 = arith.constant dense<0.000000e+00> : vector<64x384xf32>
    %563 = tpu.matmul %561, %562, %cst_138 {dimension_numbers = #tpu.dot_dimension_numbers<[1], [0], [0], [1], [0, 0, 1, 1], [], []>} : vector<64x128xbf16>, vector<128x384xbf16>, vector<64x384xf32> -> vector<64x384xf32>
    %c0_139 = arith.constant 0 : index
    %c0_140 = arith.constant 0 : index
    %564 = vector.load %arg10[%c0_139, %c0_140] : memref<64x384xf32, #tpu.memory_space<vmem>>, vector<64x384xf32>
    tpu.vector_store %arg10[%c0_139, %c0_140], %563 {strides = array<i32>} : memref<64x384xf32, #tpu.memory_space<vmem>>, vector<64x384xf32>,
    return
  }
}

</mosaic_0001>

<bundles_post_ra>
// kernel: decoder_fused.1
= control target key start
LH: loop header
LB: loop body
LE: loop exit
PB: predicated region body
PF: predicated region fallthrough
CT: control target
= control target key end

     0   :  { %18 = vsyncpa [#allocation5], 0  ;;  %s7354_s0 = inlined_call_operand.hbm [shape: f32[64,128], index: 0, kind: input, shape index: {}]   ;;  %s7355_s1 = inlined_call_operand.hbm [shape: f32[2,8,128], index: 1, kind: input, shape index: {}]   ;;  %s7356_s2 = inlined_call_operand.hbm [shape: f32[2,8,128], index: 2, kind: input, shape index: {}]   ;;  %s7357_s3 = inlined_call_operand.hbm [shape: bf16[128,512], index: 3, kind: input, shape index: {}]   ;;  %s7358_s4 = inlined_call_operand.hbm [shape: bf16[128,512], index: 4, kind: input, shape index: {}]   ;;  %s7359_s5 = inlined_call_operand.vmem [shape: f32[1,512], index: 5, kind: input, shape index: {}]   ;;  %s7360_s6 = inlined_call_operand.hbm [shape: bf16[128,512], index: 6, kind: input, shape index: {}]   ;;  %s7361_s7 = inlined_call_operand.hbm [shape: bf16[128,512], index: 7, kind: input, shape index: {}]   ;;  %s7362_s8 = inlined_call_operand.vmem [shape: f32[1,512], index: 8, kind: input, shape index: {}]   ;;  %s7363_s9 = inlined_call_operand.hbm [shape: bf16[128,384], index: 9, kind: input, shape index: {}]   ;;  %s7364_s10 = inlined_call_operand.hbm [shape: f32[64,384], index: 10, kind: output, shape index: {0}]   ;;  %s7365_s11 = inlined_call_operand.hbm [shape: f32[2,8,128], index: 11, kind: output, shape index: {1}]   ;;  %s7366_s12 = inlined_call_operand.hbm [shape: f32[2,8,128], index: 12, kind: output, shape index: {2}]  }
   0x1   :  { %19 = vsyncpa [#allocation8], 0 }
   0x2   :  { %20 = vsyncpa [#allocation11], 0 }
   0x3   :  { %21 = vsyncpa [#allocation14], 0 }
   0x4   :  { %22 = vsyncpa [#allocation17], 0 }
   0x5   :  { %23 = vsyncpa [#allocation6], 0 }
   0x6   :  { %24 = vsyncpa [#allocation20], 0  ;;  %s5245_s21 = smov [#allocation7]   ;;  %s5246_s23 = smov [#allocation10]  }
   0x7   :  { %s42_s22 = sshll.u32 %s5245_s21, 4  ;;  %s66_s24 = sshll.u32 %s5246_s23, 4  ;;  %s43_s22 = int_to_ptr.vmem [resolvable:$true] %s42_s22  ;;  %s5330_s24 = int_to_ptr.vmem [resolvable:$true] %s66_s24 }
   0x8   :  { %s4989_s27 = scalar_lea.hbm %s7355_s1, 256 }
   0x9   :  { %p4990_p0 = scmp.ne.s32.totalorder %s7355_s1, %s4989_s27  ;;  %p4993_p1 = scmp.lt.u32.totalorder %s4989_s27, %s7355_s1 }
   0xb   :  { %p4995_p2 = pnand %p4993_p1, %p4990_p0 }
   0xd   :  { %4998 = shalt.err (!%p4995_p2)
}
   0xe   :  { %s4999_s14 = scalar_lea.vmem %s43_s22, 256  ;;  %p5004_p4 = scmp.lt.s32.totalorder %s43_s22, %s43_s22 }
   0xf   :  { %p5000_p3 = scmp.ne.s32.totalorder %s43_s22, %s4999_s14  ;;  %p5005_p5 = scmp.lt.s32.totalorder %s4999_s14, %s4999_s14 }
  0x11   :  { %p5006_p6 = por %p5005_p5, %p5004_p4 }
  0x13   :  { %p5007_p7 = pnand %p5006_p6, %p5000_p3 }
  0x15   :  { %5010 = shalt.err (!%p5007_p7)
}
  0x16   :  { %s5247_s15 = smov 128   ;;  %s5248_s16 = smov 8  }
  0x17   :  { %48 = dma.hbm_to_vmem [thread:$0]  %s7355_s1, 256, %s43_s22, [#allocation8], %s5247_s15, %s5247_s15, %s5248_s16  }
  0x18   :  { %s5011_s21 = scalar_lea.hbm %s7357_s3, 4096 }
  0x19   :  { %p5012_p8 = scmp.ne.s32.totalorder %s7357_s3, %s5011_s21  ;;  %p5015_p9 = scmp.lt.u32.totalorder %s5011_s21, %s7357_s3 }
  0x1b   :  { %p5017_p10 = pnand %p5015_p9, %p5012_p8 }
  0x1d   :  { %5020 = shalt.err (!%p5017_p10)
}
  0x1e   :  { %s5021_s28 = scalar_lea.vmem %s5330_s24, 4096  ;;  %p5026_p12 = scmp.lt.s32.totalorder %s5330_s24, %s5330_s24 }
  0x1f   :  { %p5022_p11 = scmp.ne.s32.totalorder %s5330_s24, %s5021_s28  ;;  %p5027_p13 = scmp.lt.s32.totalorder %s5021_s28, %s5021_s28 }
  0x21   :  { %p5028_p0 = por %p5027_p13, %p5026_p12 }
  0x23   :  { %p5029_p1 = pnand %p5028_p0, %p5022_p11 }
  0x25   :  { %5032 = shalt.err (!%p5029_p1)
}
  0x26   :  { %s5249_s1 = smov 256   ;;  %s5250_s22 = smov 16  }
  0x27   :  { %72 = dma.hbm_to_vmem [thread:$0]  %s7357_s3, 4096, %s5330_s24, [#allocation11], %s5249_s1, %s5249_s1, %s5250_s22  }
  0x28   :  { %s5251_s13 = smov [#allocation13]   ;;  %s5252_s17 = smov [#allocation4]  }
  0x29   :  { %s92_s14 = sshll.u32 %s5251_s13, 4  ;;  %s30_s18 = sshll.u32 %s5252_s17, 4  ;;  %s93_s14 = int_to_ptr.vmem [resolvable:$true] %s92_s14  ;;  %s5367_s18 = int_to_ptr.vmem [resolvable:$true] %s30_s18 }
  0x2a   :  { %s5033_s21 = scalar_lea.hbm %s7360_s6, 4096 }
  0x2b   :  { %p5034_p2 = scmp.ne.s32.totalorder %s7360_s6, %s5033_s21  ;;  %p5037_p3 = scmp.lt.u32.totalorder %s5033_s21, %s7360_s6 }
  0x2d   :  { %p5039_p4 = pnand %p5037_p3, %p5034_p2 }
  0x2f   :  { %5042 = shalt.err (!%p5039_p4)
}
  0x30   :  { %s5043_s3 = scalar_lea.vmem %s93_s14, 4096  ;;  %p5048_p6 = scmp.lt.s32.totalorder %s93_s14, %s93_s14 }
  0x31   :  { %p5044_p5 = scmp.ne.s32.totalorder %s93_s14, %s5043_s3  ;;  %p5049_p7 = scmp.lt.s32.totalorder %s5043_s3, %s5043_s3 }
  0x33   :  { %p5050_p8 = por %p5049_p7, %p5048_p6 }
  0x35   :  { %p5051_p9 = pnand %p5050_p8, %p5044_p5 }
  0x37   :  { %5054 = shalt.err (!%p5051_p9)
}
  0x38   :  { %98 = dma.hbm_to_vmem [thread:$0]  %s7360_s6, 4096, %s93_s14, [#allocation14], %s5249_s1, %s5249_s1, %s5250_s22  }
  0x39   :  { %s5055_s13 = scalar_lea.hbm %s7354_s0, 1024 }
  0x3a   :  { %p5056_p10 = scmp.ne.s32.totalorder %s7354_s0, %s5055_s13  ;;  %p5059_p11 = scmp.lt.u32.totalorder %s5055_s13, %s7354_s0 }
  0x3c   :  { %p5061_p12 = pnand %p5059_p11, %p5056_p10 }
  0x3e   :  { %5064 = shalt.err (!%p5061_p12)
}
  0x3f   :  { %s5065_s23 = scalar_lea.vmem %s5367_s18, 1024  ;;  %p5070_p0 = scmp.lt.s32.totalorder %s5367_s18, %s5367_s18 }
  0x40   :  { %p5066_p13 = scmp.ne.s32.totalorder %s5367_s18, %s5065_s23  ;;  %p5071_p1 = scmp.lt.s32.totalorder %s5065_s23, %s5065_s23 }
  0x42   :  { %p5072_p2 = por %p5071_p1, %p5070_p0 }
  0x44   :  { %p5073_p3 = pnand %p5072_p2, %p5066_p13 }
  0x46   :  { %5076 = shalt.err (!%p5073_p3)
}
  0x47   :  { %36 = dma.hbm_to_vmem [thread:$0]  %s7354_s0, 1024, %s5367_s18, [#allocation5], %s5247_s15, %s5247_s15, %s5248_s16  }
  0x48   :  { %s5253_s25 = smov [#allocation9]   ;;  %s5254_s27 = smov [#allocation12]  }
  0x49   :  { %s54_s26 = sshll.u32 %s5253_s25, 4  ;;  %s78_s3 = sshll.u32 %s5254_s27, 4  ;;  %s55_s26 = int_to_ptr.vmem [resolvable:$true] %s54_s26  ;;  %s5404_s3 = int_to_ptr.vmem [resolvable:$true] %s78_s3 }
  0x4a   :  { %s5077_s29 = scalar_lea.hbm %s7356_s2, 256 }
  0x4b   :  { %p5078_p4 = scmp.ne.s32.totalorder %s7356_s2, %s5077_s29  ;;  %p5081_p5 = scmp.lt.u32.totalorder %s5077_s29, %s7356_s2 }
  0x4d   :  { %p5083_p6 = pnand %p5081_p5, %p5078_p4 }
  0x4f   :  { %5086 = shalt.err (!%p5083_p6)
}
  0x50   :  { %s5087_s0 = scalar_lea.vmem %s55_s26, 256  ;;  %p5092_p8 = scmp.lt.s32.totalorder %s55_s26, %s55_s26 }
  0x51   :  { %p5088_p7 = scmp.ne.s32.totalorder %s55_s26, %s5087_s0  ;;  %p5093_p9 = scmp.lt.s32.totalorder %s5087_s0, %s5087_s0 }
  0x53   :  { %p5094_p10 = por %p5093_p9, %p5092_p8 }
  0x55   :  { %p5095_p11 = pnand %p5094_p10, %p5088_p7 }
  0x57   :  { %5098 = shalt.err (!%p5095_p11)
}
  0x58   :  { %60 = dma.hbm_to_vmem [thread:$0]  %s7356_s2, 256, %s55_s26, [#allocation8], %s5247_s15, %s5247_s15, %s5248_s16  }
  0x59   :  { %s5099_s6 = scalar_lea.hbm %s7358_s4, 4096 }
  0x5a   :  { %p5100_p12 = scmp.ne.s32.totalorder %s7358_s4, %s5099_s6  ;;  %p5103_p13 = scmp.lt.u32.totalorder %s5099_s6, %s7358_s4 }
  0x5c   :  { %p5105_p0 = pnand %p5103_p13, %p5100_p12 }
  0x5e   :  { %5108 = shalt.err (!%p5105_p0)
}
  0x5f   :  { %s5109_s28 = scalar_lea.vmem %s5404_s3, 4096  ;;  %p5114_p2 = scmp.lt.s32.totalorder %s5404_s3, %s5404_s3 }
  0x60   :  { %p5110_p1 = scmp.ne.s32.totalorder %s5404_s3, %s5109_s28  ;;  %p5115_p3 = scmp.lt.s32.totalorder %s5109_s28, %s5109_s28 }
  0x62   :  { %p5116_p4 = por %p5115_p3, %p5114_p2 }
  0x64   :  { %p5117_p5 = pnand %p5116_p4, %p5110_p1 }
  0x66   :  { %5120 = shalt.err (!%p5117_p5)
}
  0x67   :  { %84 = dma.hbm_to_vmem [thread:$0]  %s7358_s4, 4096, %s5404_s3, [#allocation11], %s5249_s1, %s5249_s1, %s5250_s22  }
  0x68   :  { %s5255_s29 = smov [#allocation15]   ;;  %s5256_s13 = smov [#allocation16]  }
  0x69   :  { %s104_s30 = sshll.u32 %s5255_s29, 4  ;;  %s118_s17 = sshll.u32 %s5256_s13, 4  ;;  %s105_s30 = int_to_ptr.vmem [resolvable:$true] %s104_s30  ;;  %s5441_s17 = int_to_ptr.vmem [resolvable:$true] %s118_s17 }
  0x6a   :  { %s5121_s18 = scalar_lea.hbm %s7361_s7, 4096 }
  0x6b   :  { %p5122_p6 = scmp.ne.s32.totalorder %s7361_s7, %s5121_s18  ;;  %p5125_p7 = scmp.lt.u32.totalorder %s5121_s18, %s7361_s7 }
  0x6d   :  { %p5127_p8 = pnand %p5125_p7, %p5122_p6 }
  0x6f   :  { %5130 = shalt.err (!%p5127_p8)
}
  0x70   :  { %s5131_s4 = scalar_lea.vmem %s105_s30, 4096  ;;  %p5136_p10 = scmp.lt.s32.totalorder %s105_s30, %s105_s30 }
  0x71   :  { %p5132_p9 = scmp.ne.s32.totalorder %s105_s30, %s5131_s4  ;;  %p5137_p11 = scmp.lt.s32.totalorder %s5131_s4, %s5131_s4 }
  0x73   :  { %p5138_p12 = por %p5137_p11, %p5136_p10 }
  0x75   :  { %p5139_p13 = pnand %p5138_p12, %p5132_p9 }
  0x77   :  { %5142 = shalt.err (!%p5139_p13)
}
  0x78   :  { %110 = dma.hbm_to_vmem [thread:$0]  %s7361_s7, 4096, %s105_s30, [#allocation14], %s5249_s1, %s5249_s1, %s5250_s22  }
  0x79   :  { %s5143_s24 = scalar_lea.hbm %s7363_s9, 3072 }
  0x7a   :  { %p5144_p0 = scmp.ne.s32.totalorder %s7363_s9, %s5143_s24  ;;  %p5147_p1 = scmp.lt.u32.totalorder %s5143_s24, %s7363_s9 }
  0x7c   :  { %p5149_p2 = pnand %p5147_p1, %p5144_p0 }
  0x7e   :  { %5152 = shalt.err (!%p5149_p2)
}
  0x7f   :  { %s5153_s13 = scalar_lea.vmem %s5441_s17, 3072  ;;  %p5158_p4 = scmp.lt.s32.totalorder %s5441_s17, %s5441_s17 }
  0x80   :  { %p5154_p3 = scmp.ne.s32.totalorder %s5441_s17, %s5153_s13  ;;  %p5159_p5 = scmp.lt.s32.totalorder %s5153_s13, %s5153_s13 }
  0x82   :  { %p5160_p6 = por %p5159_p5, %p5158_p4 }
  0x84   :  { %p5161_p7 = pnand %p5160_p6, %p5154_p3 }
  0x86   :  { %5164 = shalt.err (!%p5161_p7)
}
  0x87   :  { %s5257_s7 = smov 192   ;;  %s5258_s1 = smov 12  }
  0x88   :  { %124 = dma.hbm_to_vmem [thread:$0]  %s7363_s9, 3072, %s5441_s17, [#allocation17], %s5257_s7, %s5257_s7, %s5258_s1  }
  0x89   :  { %5231 = dma.done.wait [#allocation5], 1024  }
  0x8a   :  { %5232 = vsyncadd [#allocation5], 4294966272 }
  0x8b   :  { %5233 = dma.done.wait [#allocation8], 512  }
  0x8c   :  { %5234 = vsyncadd [#allocation8], 4294966784 }
  0x8d   :  { %5235 = dma.done.wait [#allocation11], 8192  }
  0x8e   :  { %5236 = vsyncadd [#allocation11], 4294959104 }
  0x8f   :  { %5237 = dma.done.wait [#allocation14], 8192  }
  0x90   :  { %5238 = vsyncadd [#allocation14], 4294959104 }
  0x91   :  { %5239 = dma.done.wait [#allocation17], 3072  }
  0x92   :  { %5240 = vsyncadd [#allocation17], 4294964224  ;;  %v7367_v0 = vmov 0   ;;  %v4317_v1 = vld [vmem:[#allocation10 + $0x4] ss:$16 sps:$4 sm:$0xff]   ;;  %v151_v34 = vld [vmem:[#allocation4 + $0x8] sm:$0xff] }
  0x93   :  { %408 = vmatprep.mubr.bf16.mxu0 %v7367_v0  ;;  %481 = vmatprep.mubr.bf16.mxu1 %v7367_v0  ;;  %v4319_v2 = vld [vmem:[#allocation10 + $0xc] ss:$16 sps:$4 sm:$0xff]   ;;  %v4321_v3 = vld [vmem:[#allocation10] ss:$16 sps:$4 sm:$0xff]   ;;  %v4322_v4 = vld [vmem:[#allocation10 + $0x8] ss:$16 sps:$4 sm:$0xff]  }
  0x94   :  { %376 = vmatprep.subr.bf16.mxu0 %v4317_v1  ;;  %449 = vmatprep.subr.bf16.mxu1 %v4319_v2  ;;  %v4323_v5 = vld [vmem:[#allocation10 + $0x24] ss:$16 sps:$4 sm:$0xff]   ;;  %v4325_v6 = vld [vmem:[#allocation10 + $0x2c] ss:$16 sps:$4 sm:$0xff]   ;;  %v4327_v7 = vld [vmem:[#allocation10 + $0x20] ss:$16 sps:$4 sm:$0xff]  }
  0x95   :  { %377 = vmatpush1.bf16.msra.mxu0 %v4321_v3  ;;  %450 = vmatpush1.bf16.msra.mxu1 %v4322_v4  ;;  %v4328_v8 = vld [vmem:[#allocation10 + $0x28] ss:$16 sps:$4 sm:$0xff]   ;;  %v4329_v9 = vld [vmem:[#allocation10 + $0x44] ss:$16 sps:$4 sm:$0xff]   ;;  %v4331_v10 = vld [vmem:[#allocation10 + $0x4c] ss:$16 sps:$4 sm:$0xff]  }
  0x96   :  { %378 = vmatprep.subr.bf16.mxu0 %v4323_v5  ;;  %451 = vmatprep.subr.bf16.mxu1 %v4325_v6  ;;  %v4333_v11 = vld [vmem:[#allocation10 + $0x40] ss:$16 sps:$4 sm:$0xff]   ;;  %v4334_v12 = vld [vmem:[#allocation10 + $0x48] ss:$16 sps:$4 sm:$0xff]   ;;  %v4335_v13 = vld [vmem:[#allocation10 + $0x64] ss:$16 sps:$4 sm:$0xff]  }
  0x97   :  { %v4337_v14 = vld [vmem:[#allocation10 + $0x6c] ss:$16 sps:$4 sm:$0xff]   ;;  %v4339_v15 = vld [vmem:[#allocation10 + $0x60] ss:$16 sps:$4 sm:$0xff]   ;;  %v4340_v16 = vld [vmem:[#allocation10 + $0x68] ss:$16 sps:$4 sm:$0xff]  }
  0x98   :  { %v4341_v17 = vld [vmem:[#allocation10 + $0x84] ss:$16 sps:$4 sm:$0xff]   ;;  %v4343_v18 = vld [vmem:[#allocation10 + $0x8c] ss:$16 sps:$4 sm:$0xff]   ;;  %v4345_v19 = vld [vmem:[#allocation10 + $0x80] ss:$16 sps:$4 sm:$0xff]  }
  0x99   :  { %379 = vmatpush1.bf16.msra.mxu0 %v4327_v7  ;;  %452 = vmatpush1.bf16.msra.mxu1 %v4328_v8  ;;  %v4346_v20 = vld [vmem:[#allocation10 + $0x88] ss:$16 sps:$4 sm:$0xff]   ;;  %v4347_v21 = vld [vmem:[#allocation10 + $0xa4] ss:$16 sps:$4 sm:$0xff]   ;;  %v4349_v22 = vld [vmem:[#allocation10 + $0xac] ss:$16 sps:$4 sm:$0xff]  }
  0x9a   :  { %380 = vmatprep.subr.bf16.mxu0 %v4329_v9  ;;  %453 = vmatprep.subr.bf16.mxu1 %v4331_v10  ;;  %v4351_v23 = vld [vmem:[#allocation10 + $0xa0] ss:$16 sps:$4 sm:$0xff]   ;;  %v4352_v24 = vld [vmem:[#allocation10 + $0xa8] ss:$16 sps:$4 sm:$0xff]   ;;  %v4353_v25 = vld [vmem:[#allocation10 + $0xc4] ss:$16 sps:$4 sm:$0xff]  }
  0x9b   :  { %v4355_v26 = vld [vmem:[#allocation10 + $0xcc] ss:$16 sps:$4 sm:$0xff]   ;;  %v4357_v27 = vld [vmem:[#allocation10 + $0xc0] ss:$16 sps:$4 sm:$0xff]   ;;  %v4358_v28 = vld [vmem:[#allocation10 + $0xc8] ss:$16 sps:$4 sm:$0xff]  }
  0x9c   :  { %v4359_v29 = vld [vmem:[#allocation10 + $0xe4] ss:$16 sps:$4 sm:$0xff]   ;;  %v4361_v30 = vld [vmem:[#allocation10 + $0xec] ss:$16 sps:$4 sm:$0xff]   ;;  %v4363_v31 = vld [vmem:[#allocation10 + $0xe0] ss:$16 sps:$4 sm:$0xff]  }
  0x9d   :  { %381 = vmatpush1.bf16.msra.mxu0 %v4333_v11  ;;  %454 = vmatpush1.bf16.msra.mxu1 %v4334_v12  ;;  %v4364_v32 = vld [vmem:[#allocation10 + $0xe8] ss:$16 sps:$4 sm:$0xff]   ;;  %v150_v33 = vld [vmem:[#allocation4] sm:$0xff]  ;;  %v5479_v36 = vld [vmem:[#allocation15 + $0xc] ss:$16 sps:$4 sm:$0xff]  }
  0x9e   :  { %382 = vmatprep.subr.bf16.mxu0 %v4335_v13  ;;  %455 = vmatprep.subr.bf16.mxu1 %v4337_v14  ;;  %v5477_v35 = vld [vmem:[#allocation15 + $0x4] ss:$16 sps:$4 sm:$0xff]   ;;  %v158_v37 = vpack.c.bf16 %v151_v34, %v150_v33  ;;  %v5481_v38 = vld [vmem:[#allocation15] ss:$16 sps:$4 sm:$0xff]   ;;  %v5483_v39 = vld [vmem:[#allocation15 + $0x8] ss:$16 sps:$4 sm:$0xff]  }
  0x9f   :  { %v5487_v40 = vld [vmem:[#allocation15 + $0x24] ss:$16 sps:$4 sm:$0xff]   ;;  %v5489_v41 = vld [vmem:[#allocation15 + $0x2c] ss:$16 sps:$4 sm:$0xff]   ;;  %v5491_v42 = vld [vmem:[#allocation15 + $0x20] ss:$16 sps:$4 sm:$0xff]  }
  0xa0   :  { %v5493_v43 = vld [vmem:[#allocation15 + $0x28] ss:$16 sps:$4 sm:$0xff]   ;;  %v152_v44 = vld [vmem:[#allocation4 + $0x10] sm:$0xff]  ;;  %v5501_v47 = vld [vmem:[#allocation15 + $0x4c] ss:$16 sps:$4 sm:$0xff]  }
  0xa1   :  { %383 = vmatpush1.bf16.msra.mxu0 %v4339_v15  ;;  %456 = vmatpush1.bf16.msra.mxu1 %v4340_v16  ;;  %v153_v45 = vld [vmem:[#allocation4 + $0x18] sm:$0xff]  ;;  %v5497_v46 = vld [vmem:[#allocation15 + $0x44] ss:$16 sps:$4 sm:$0xff]   ;;  %v5505_v49 = vld [vmem:[#allocation15 + $0x40] ss:$16 sps:$4 sm:$0xff]  }
  0xa2   :  { %384 = vmatprep.subr.bf16.mxu0 %v4341_v17  ;;  %457 = vmatprep.subr.bf16.mxu1 %v4343_v18  ;;  %v159_v48 = vpack.c.bf16 %v153_v45, %v152_v44  ;;  %v5507_v50 = vld [vmem:[#allocation15 + $0x48] ss:$16 sps:$4 sm:$0xff]   ;;  %v5511_v51 = vld [vmem:[#allocation15 + $0x64] ss:$16 sps:$4 sm:$0xff]   ;;  %v5515_v52 = vld [vmem:[#allocation15 + $0x6c] ss:$16 sps:$4 sm:$0xff]  }
  0xa3   :  { %v5517_v53 = vld [vmem:[#allocation15 + $0x60] ss:$16 sps:$4 sm:$0xff]   ;;  %v5519_v54 = vld [vmem:[#allocation15 + $0x68] ss:$16 sps:$4 sm:$0xff]   ;;  %v5525_v57 = vld [vmem:[#allocation15 + $0x84] ss:$16 sps:$4 sm:$0xff]  }
  0xa4   :  { %v154_v55 = vld [vmem:[#allocation4 + $0x20] sm:$0xff]  ;;  %v155_v56 = vld [vmem:[#allocation4 + $0x28] sm:$0xff]  ;;  %v156_v3 = vld [vmem:[#allocation4 + $0x30] sm:$0xff] }
  0xa5   :  { %385 = vmatpush1.bf16.msra.mxu0 %v4345_v19  ;;  %458 = vmatpush1.bf16.msra.mxu1 %v4346_v20  ;;  %v5527_v58 = vld [vmem:[#allocation15 + $0x8c] ss:$16 sps:$4 sm:$0xff]   ;;  %v160_v59 = vpack.c.bf16 %v155_v56, %v154_v55  ;;  %v5531_v60 = vld [vmem:[#allocation15 + $0x80] ss:$16 sps:$4 sm:$0xff]   ;;  %v5533_v61 = vld [vmem:[#allocation15 + $0x88] ss:$16 sps:$4 sm:$0xff]  }
  0xa6   :  { %386 = vmatprep.subr.bf16.mxu0 %v4347_v21  ;;  %459 = vmatprep.subr.bf16.mxu1 %v4349_v22  ;;  %v5537_v62 = vld [vmem:[#allocation15 + $0xa4] ss:$16 sps:$4 sm:$0xff]   ;;  %v5541_v63 = vld [vmem:[#allocation15 + $0xac] ss:$16 sps:$4 sm:$0xff]   ;;  %v5543_v1 = vld [vmem:[#allocation15 + $0xa0] ss:$16 sps:$4 sm:$0xff]  }
  0xa7   :  { %v5545_v2 = vld [vmem:[#allocation15 + $0xa8] ss:$16 sps:$4 sm:$0xff]   ;;  %v5551_v5 = vld [vmem:[#allocation15 + $0xc4] ss:$16 sps:$4 sm:$0xff]   ;;  %v5553_v6 = vld [vmem:[#allocation15 + $0xcc] ss:$16 sps:$4 sm:$0xff]  }
  0xa8   :  { %v157_v4 = vld [vmem:[#allocation4 + $0x38] sm:$0xff]  ;;  %v5557_v8 = vld [vmem:[#allocation15 + $0xc0] ss:$16 sps:$4 sm:$0xff]   ;;  %v5563_v10 = vld [vmem:[#allocation15 + $0xe4] ss:$16 sps:$4 sm:$0xff]  }
  0xa9   :  { %387 = vmatpush1.bf16.msra.mxu0 %v4351_v23  ;;  %460 = vmatpush1.bf16.msra.mxu1 %v4352_v24  ;;  %v161_v7 = vpack.c.bf16 %v157_v4, %v156_v3  ;;  %v5559_v9 = vld [vmem:[#allocation15 + $0xc8] ss:$16 sps:$4 sm:$0xff]   ;;  %v5567_v11 = vld [vmem:[#allocation15 + $0xec] ss:$16 sps:$4 sm:$0xff]   ;;  %v5569_v12 = vld [vmem:[#allocation15 + $0xe0] ss:$16 sps:$4 sm:$0xff]  }
  0xaa   :  { %388 = vmatprep.subr.bf16.mxu0 %v4353_v25  ;;  %461 = vmatprep.subr.bf16.mxu1 %v4355_v26  ;;  %v5571_v13 = vld [vmem:[#allocation15 + $0xe8] ss:$16 sps:$4 sm:$0xff]   ;;  %v5577_v15 = vld [vmem:[#allocation12 + $0x4] ss:$16 sps:$4 sm:$0xff]   ;;  %v5579_v16 = vld [vmem:[#allocation12 + $0xc] ss:$16 sps:$4 sm:$0xff]  }
  0xab   :  { %v654_v14 = vld [vmem:[#allocation7 + $0x8] sm:$0xff]  ;;  %v5583_v18 = vld [vmem:[#allocation12] ss:$16 sps:$4 sm:$0xff]   ;;  %v5589_v20 = vld [vmem:[#allocation12 + $0x24] ss:$16 sps:$4 sm:$0xff]  }
  0xac   :  { %v657_v17 = vpack.c.bf16 %v654_v14, %v654_v14  ;;  %v5585_v19 = vld [vmem:[#allocation12 + $0x8] ss:$16 sps:$4 sm:$0xff]   ;;  %v5593_v21 = vld [vmem:[#allocation12 + $0x2c] ss:$16 sps:$4 sm:$0xff]   ;;  %v5595_v22 = vld [vmem:[#allocation12 + $0x20] ss:$16 sps:$4 sm:$0xff]  }
  0xad   :  { %389 = vmatpush1.bf16.msra.mxu0 %v4357_v27  ;;  %462 = vmatpush1.bf16.msra.mxu1 %v4358_v28  ;;  %7738 = vst [vmem:[#allocation29_spill] sm:$0xff] %v5593_v21  ;;  %7739 = vst [vmem:[#allocation30_spill] sm:$0xff] %v5595_v22  ;;  %v5597_v23 = vld [vmem:[#allocation12 + $0x28] ss:$16 sps:$4 sm:$0xff]   ;;  %v5599_v24 = vld [vmem:[#allocation12 + $0x44] ss:$16 sps:$4 sm:$0xff]  }
  0xae   :  { %390 = vmatprep.subr.bf16.mxu0 %v4359_v29  ;;  %463 = vmatprep.subr.bf16.mxu1 %v4361_v30  ;;  %7740 = vst [vmem:[#allocation31_spill] sm:$0xff] %v5597_v23  ;;  %7741 = vst [vmem:[#allocation32_spill] sm:$0xff] %v5599_v24  ;;  %v5601_v25 = vld [vmem:[#allocation12 + $0x4c] ss:$16 sps:$4 sm:$0xff]   ;;  %v5607_v26 = vld [vmem:[#allocation12 + $0x40] ss:$16 sps:$4 sm:$0xff]  }
  0xaf   :  { %7742 = vst [vmem:[#allocation33_spill] sm:$0xff] %v5601_v25  ;;  %7743 = vst [vmem:[#allocation34_spill] sm:$0xff] %v5607_v26  ;;  %v5609_v27 = vld [vmem:[#allocation12 + $0x48] ss:$16 sps:$4 sm:$0xff]   ;;  %v5613_v28 = vld [vmem:[#allocation12 + $0x64] ss:$16 sps:$4 sm:$0xff]  }
  0xb0   :  { %7744 = vst [vmem:[#allocation35_spill] sm:$0xff] %v5609_v27  ;;  %7745 = vst [vmem:[#allocation36_spill] sm:$0xff] %v5613_v28  ;;  %v5615_v29 = vld [vmem:[#allocation12 + $0x6c] ss:$16 sps:$4 sm:$0xff]   ;;  %v5621_v30 = vld [vmem:[#allocation12 + $0x60] ss:$16 sps:$4 sm:$0xff]  }
  0xb1   :  { %391 = vmatpush1.bf16.msra.mxu0 %v4363_v31  ;;  %464 = vmatpush1.bf16.msra.mxu1 %v4364_v32  ;;  %7746 = vst [vmem:[#allocation37_spill] sm:$0xff] %v5615_v29  ;;  %7747 = vst [vmem:[#allocation38_spill] sm:$0xff] %v5621_v30  ;;  %v5623_v31 = vld [vmem:[#allocation12 + $0x68] ss:$16 sps:$4 sm:$0xff]   ;;  %v5625_v32 = vld [vmem:[#allocation12 + $0x84] ss:$16 sps:$4 sm:$0xff]  }
  0xb2   :  { %818 = vmatprep.subr.bf16.mxu0 %v5477_v35  ;;  %859 = vmatprep.subr.bf16.mxu1 %v5479_v36  ;;  %7748 = vst [vmem:[#allocation39_spill] sm:$0xff] %v5623_v31  ;;  %7749 = vst [vmem:[#allocation40_spill] sm:$0xff] %v5625_v32  ;;  %v5627_v33 = vld [vmem:[#allocation12 + $0x8c] ss:$16 sps:$4 sm:$0xff]   ;;  %v5633_v34 = vld [vmem:[#allocation12 + $0x80] ss:$16 sps:$4 sm:$0xff]  }
  0xb3   :  { %7750 = vst [vmem:[#allocation41_spill] sm:$0xff] %v5627_v33  ;;  %7751 = vst [vmem:[#allocation42_spill] sm:$0xff] %v5633_v34  ;;  %v5637_v44 = vld [vmem:[#allocation12 + $0xa4] ss:$16 sps:$4 sm:$0xff]   ;;  %v5639_v45 = vld [vmem:[#allocation12 + $0xac] ss:$16 sps:$4 sm:$0xff]  }
  0xb4   :  { %409 = vmatmul.mubr.bf16.vlgmr.msra.gmra.mrb[0].mxu0 %v158_v37  ;;  %482 = vmatmul.mubr.bf16.vlgmr.msra.gmra.mrb[0].mxu1 %v158_v37  ;;  %v5635_v37 = vld [vmem:[#allocation12 + $0x88] ss:$16 sps:$4 sm:$0xff]   ;;  %7753 = vst [vmem:[#allocation44_spill] sm:$0xff] %v5637_v44  ;;  %7754 = vst [vmem:[#allocation45_spill] sm:$0xff] %v5639_v45  ;;  %v5649_v56 = vld [vmem:[#allocation12 + $0xc4] ss:$16 sps:$4 sm:$0xff]  }
  0xb5   :  { %819 = vmatpush1.bf16.msra.mxu0 %v5481_v38  ;;  %860 = vmatpush1.bf16.msra.mxu1 %v5483_v39  ;;  %7752 = vst [vmem:[#allocation43_spill] sm:$0xff] %v5635_v37  ;;  %v5647_v55 = vld [vmem:[#allocation12 + $0xa8] ss:$16 sps:$4 sm:$0xff]   ;;  %7757 = vst [vmem:[#allocation48_spill] sm:$0xff] %v5649_v56  ;;  %v5657_v3 = vld [vmem:[#allocation12 + $0xc0] ss:$16 sps:$4 sm:$0xff]  }
  0xb6   :  { %820 = vmatprep.subr.bf16.mxu0 %v5487_v40  ;;  %861 = vmatprep.subr.bf16.mxu1 %v5489_v41  ;;  %7756 = vst [vmem:[#allocation47_spill] sm:$0xff] %v5647_v55  ;;  %7759 = vst [vmem:[#allocation50_spill] sm:$0xff] %v5657_v3  ;;  %v5659_v4 = vld [vmem:[#allocation12 + $0xc8] ss:$16 sps:$4 sm:$0xff]   ;;  %v5667_v14 = vld [vmem:[#allocation12 + $0xec] ss:$16 sps:$4 sm:$0xff]  }
  0xb7   :  { %418 = vmatprep.mubr.bf16.mxu0 %v7367_v0  ;;  %491 = vmatprep.mubr.bf16.mxu1 %v7367_v0  ;;  %7760 = vst [vmem:[#allocation51_spill] sm:$0xff] %v5659_v4  ;;  %7762 = vst [vmem:[#allocation53_spill] sm:$0xff] %v5667_v14 }
  0xb9   :  { %821 = vmatpush1.bf16.msra.mxu0 %v5491_v42  ;;  %862 = vmatpush1.bf16.msra.mxu1 %v5493_v43 }
  0xba   :  { %822 = vmatprep.subr.bf16.mxu0 %v5497_v46  ;;  %863 = vmatprep.subr.bf16.mxu1 %v5501_v47 }
  0xbc   :  { %419 = vmatmul.mubr.bf16.gmra.mrb[4].mxu0 %v159_v48  ;;  %492 = vmatmul.mubr.bf16.gmra.mrb[4].mxu1 %v159_v48  ;;  %v5645_v48 = vld [vmem:[#allocation12 + $0xa0] ss:$16 sps:$4 sm:$0xff]  }
  0xbd   :  { %823 = vmatpush1.bf16.msra.mxu0 %v5505_v49  ;;  %864 = vmatpush1.bf16.msra.mxu1 %v5507_v50  ;;  %7755 = vst [vmem:[#allocation46_spill] sm:$0xff] %v5645_v48 }
  0xbe   :  { %824 = vmatprep.subr.bf16.mxu0 %v5511_v51  ;;  %865 = vmatprep.subr.bf16.mxu1 %v5515_v52 }
  0xbf   :  { %428 = vmatprep.mubr.bf16.mxu0 %v7367_v0  ;;  %501 = vmatprep.mubr.bf16.mxu1 %v7367_v0 }
  0xc1   :  { %825 = vmatpush1.bf16.msra.mxu0 %v5517_v53  ;;  %866 = vmatpush1.bf16.msra.mxu1 %v5519_v54 }
  0xc2   :  { %826 = vmatprep.subr.bf16.mxu0 %v5525_v57  ;;  %867 = vmatprep.subr.bf16.mxu1 %v5527_v58 }
  0xc4   :  { %429 = vmatmul.mubr.bf16.gmra.mrb[8].mxu0 %v160_v59  ;;  %502 = vmatmul.mubr.bf16.gmra.mrb[8].mxu1 %v160_v59  ;;  %v5651_v59 = vld [vmem:[#allocation12 + $0xcc] ss:$16 sps:$4 sm:$0xff]  }
  0xc5   :  { %827 = vmatpush1.bf16.msra.mxu0 %v5531_v60  ;;  %868 = vmatpush1.bf16.msra.mxu1 %v5533_v61  ;;  %7758 = vst [vmem:[#allocation49_spill] sm:$0xff] %v5651_v59 }
  0xc6   :  { %828 = vmatprep.subr.bf16.mxu0 %v5537_v62  ;;  %869 = vmatprep.subr.bf16.mxu1 %v5541_v63 }
  0xc7   :  { %438 = vmatprep.mubr.bf16.mxu0 %v7367_v0  ;;  %511 = vmatprep.mubr.bf16.mxu1 %v7367_v0 }
  0xc9   :  { %829 = vmatpush1.bf16.msra.mxu0 %v5543_v1  ;;  %870 = vmatpush1.bf16.msra.mxu1 %v5545_v2 }
  0xca   :  { %830 = vmatprep.subr.bf16.mxu0 %v5551_v5  ;;  %871 = vmatprep.subr.bf16.mxu1 %v5553_v6 }
  0xcc   :  { %439 = vmatmul.mubr.bf16.gmra.mrb[12].mxu0 %v161_v7  ;;  %512 = vmatmul.mubr.bf16.gmra.mrb[12].mxu1 %v161_v7  ;;  %v5665_v7 = vld [vmem:[#allocation12 + $0xe4] ss:$16 sps:$4 sm:$0xff]  }
  0xcd   :  { %831 = vmatpush1.bf16.msra.mxu0 %v5557_v8  ;;  %872 = vmatpush1.bf16.msra.mxu1 %v5559_v9  ;;  %7761 = vst [vmem:[#allocation52_spill] sm:$0xff] %v5665_v7 }
  0xce   :  { %832 = vmatprep.subr.bf16.mxu0 %v5563_v10  ;;  %873 = vmatprep.subr.bf16.mxu1 %v5567_v11 }
  0xcf   :  { %850 = vmatprep.mubr.bf16.mxu0 %v7367_v0  ;;  %891 = vmatprep.mubr.bf16.mxu1 %v7367_v0 }
  0xd1   :  { %833 = vmatpush1.bf16.msra.mxu0 %v5569_v12  ;;  %874 = vmatpush1.bf16.msra.mxu1 %v5571_v13 }
  0xd2   :  { %1068 = vmatprep.subr.bf16.mxu0 %v5577_v15  ;;  %1109 = vmatprep.subr.bf16.mxu1 %v5579_v16 }
  0xd4   :  { %851 = vmatmul.mubr.bf16.vlgmr.msra.gmra.mrb[16].mxu0 %v657_v17  ;;  %892 = vmatmul.mubr.bf16.vlgmr.msra.gmra.mrb[16].mxu1 %v657_v17  ;;  %v5671_v17 = vld [vmem:[#allocation12 + $0xe0] ss:$16 sps:$4 sm:$0xff]  }
  0xd5   :  { %1069 = vmatpush1.bf16.msra.mxu0 %v5583_v18  ;;  %1110 = vmatpush1.bf16.msra.mxu1 %v5585_v19  ;;  %7763 = vst [vmem:[#allocation54_spill] sm:$0xff] %v5671_v17 }
  0xd6   :  { %1070 = vmatprep.subr.bf16.mxu0 %v5589_v20  ;;  %1111 = vmatprep.subr.bf16.mxu1 %v5593_v21 }
  0xd7   :  { %1100 = vmatprep.mubr.bf16.mxu0 %v7367_v0  ;;  %1141 = vmatprep.mubr.bf16.mxu1 %v7367_v0  ;;  %v5673_v0 = vld [vmem:[#allocation12 + $0xe8] ss:$16 sps:$4 sm:$0xff]  }
  0xd8   :  { %7764 = vst [vmem:[#allocation55_spill] sm:$0xff] %v5673_v0 }
  0xd9   :  { %1071 = vmatpush1.bf16.msra.mxu0 %v5595_v22  ;;  %1112 = vmatpush1.bf16.msra.mxu1 %v5597_v23 }
  0xda   :  { %1072 = vmatprep.subr.bf16.mxu0 %v5599_v24  ;;  %1113 = vmatprep.subr.bf16.mxu1 %v5601_v25 }
  0xdd   :  { %1073 = vmatpush1.bf16.msra.mxu0 %v5607_v26  ;;  %1114 = vmatpush1.bf16.msra.mxu1 %v5609_v27 }
  0xde   :  { %1074 = vmatprep.subr.bf16.mxu0 %v5613_v28  ;;  %1115 = vmatprep.subr.bf16.mxu1 %v5615_v29 }
  0xe1   :  { %1075 = vmatpush1.bf16.msra.mxu0 %v5621_v30  ;;  %1116 = vmatpush1.bf16.msra.mxu1 %v5623_v31 }
  0xe2   :  { %1076 = vmatprep.subr.bf16.mxu0 %v5625_v32  ;;  %1117 = vmatprep.subr.bf16.mxu1 %v5627_v33 }
  0xe5   :  { %1077 = vmatpush1.bf16.msra.mxu0 %v5633_v34  ;;  %1118 = vmatpush1.bf16.msra.mxu1 %v5635_v37 }
  0xe6   :  { %1078 = vmatprep.subr.bf16.mxu0 %v5637_v44  ;;  %1119 = vmatprep.subr.bf16.mxu1 %v5639_v45  ;;  %v651_v45 = vld [vmem:[#allocation7] sm:$0xff] }
  0xe9   :  { %1079 = vmatpush1.bf16.msra.mxu0 %v5645_v48  ;;  %1120 = vmatpush1.bf16.msra.mxu1 %v5647_v55  ;;  %v5685_v55 = vld [vmem:[#allocation13] ss:$16 sps:$4 sm:$0xff]   ;;  %v5739_v48 = vld [vmem:[#allocation13 + $0xac] ss:$16 sps:$4 sm:$0xff]  }
  0xea   :  { %1080 = vmatprep.subr.bf16.mxu0 %v5649_v56  ;;  %1121 = vmatprep.subr.bf16.mxu1 %v5651_v59  ;;  %v907_v56 = vpack.c.bf16 %v651_v45, %v651_v45  ;;  %v7765_v59 = vmov 0   ;;  %7768 = vst [vmem:[#allocation58_spill] sm:$0xff] %v5685_v55  ;;  %v5693_v45 = vld [vmem:[#allocation13 + $0x24] ss:$16 sps:$4 sm:$0xff]   ;;  %7787 = vst [vmem:[#allocation77_spill] sm:$0xff] %v5739_v48 }
  0xeb   :  { %7770 = vst [vmem:[#allocation60_spill] sm:$0xff] %v5693_v45 }
  0xed   :  { %1081 = vmatpush1.bf16.msra.mxu0 %v5657_v3  ;;  %1122 = vmatpush1.bf16.msra.mxu1 %v5659_v4  ;;  %v5681_v4 = vld [vmem:[#allocation13 + $0x4] ss:$16 sps:$4 sm:$0xff]   ;;  %v5683_v3 = vld [vmem:[#allocation13 + $0xc] ss:$16 sps:$4 sm:$0xff]  }
  0xee   :  { %1082 = vmatprep.subr.bf16.mxu0 %v5665_v7  ;;  %1123 = vmatprep.subr.bf16.mxu1 %v5667_v14  ;;  %7766 = vst [vmem:[#allocation56_spill] sm:$0xff] %v5681_v4  ;;  %7767 = vst [vmem:[#allocation57_spill] sm:$0xff] %v5683_v3  ;;  %v5687_v7 = vld [vmem:[#allocation13 + $0x8] ss:$16 sps:$4 sm:$0xff]   ;;  %v5737_v14 = vld [vmem:[#allocation13 + $0xa4] ss:$16 sps:$4 sm:$0xff]  }
  0xef   :  { %7769 = vst [vmem:[#allocation59_spill] sm:$0xff] %v5687_v7  ;;  %7786 = vst [vmem:[#allocation76_spill] sm:$0xff] %v5737_v14 }
  0xf1   :  { %1083 = vmatpush1.bf16.msra.mxu0 %v5671_v17  ;;  %1124 = vmatpush1.bf16.msra.mxu1 %v5673_v0  ;;  %v5697_v0 = vld [vmem:[#allocation13 + $0x20] ss:$16 sps:$4 sm:$0xff]   ;;  %v5699_v17 = vld [vmem:[#allocation13 + $0x28] ss:$16 sps:$4 sm:$0xff]  }
  0xf2   :  { %1339 = vmatprep.subr.bf16.mxu0 %v5681_v4  ;;  %1380 = vmatprep.subr.bf16.mxu1 %v5683_v3  ;;  %7772 = vst [vmem:[#allocation62_spill] sm:$0xff] %v5697_v0  ;;  %7773 = vst [vmem:[#allocation63_spill] sm:$0xff] %v5699_v17  ;;  %v5705_v3 = vld [vmem:[#allocation13 + $0x44] ss:$16 sps:$4 sm:$0xff]   ;;  %v5711_v4 = vld [vmem:[#allocation13 + $0x48] ss:$16 sps:$4 sm:$0xff]  }
  0xf3   :  { %7774 = vst [vmem:[#allocation64_spill] sm:$0xff] %v5705_v3  ;;  %7777 = vst [vmem:[#allocation67_spill] sm:$0xff] %v5711_v4 }
  0xf4   :  { %1101 = vmatmul.mubr.bf16.vlgmr.msra.gmra.mrb[20].mxu0 %v907_v56  ;;  %1142 = vmatmul.mubr.bf16.vlgmr.msra.gmra.mrb[20].mxu1 %v907_v56  ;;  %v5695_v56 = vld [vmem:[#allocation13 + $0x2c] ss:$16 sps:$4 sm:$0xff]  }
  0xf5   :  { %1371 = vmatprep.mubr.bf16.mxu0 %v7765_v59  ;;  %1412 = vmatprep.mubr.bf16.mxu1 %v7765_v59  ;;  %7771 = vst [vmem:[#allocation61_spill] sm:$0xff] %v5695_v56 }
  0xf6   :  { %1340 = vmatpush1.bf16.msra.mxu0 %v5685_v55  ;;  %1381 = vmatpush1.bf16.msra.mxu1 %v5687_v7  ;;  %v5707_v55 = vld [vmem:[#allocation13 + $0x4c] ss:$16 sps:$4 sm:$0xff]   ;;  %v5709_v7 = vld [vmem:[#allocation13 + $0x40] ss:$16 sps:$4 sm:$0xff]  }
  0xf7   :  { %1341 = vmatprep.subr.bf16.mxu0 %v5693_v45  ;;  %1382 = vmatprep.subr.bf16.mxu1 %v5695_v56  ;;  %7775 = vst [vmem:[#allocation65_spill] sm:$0xff] %v5707_v55  ;;  %7776 = vst [vmem:[#allocation66_spill] sm:$0xff] %v5709_v7  ;;  %v5717_v56 = vld [vmem:[#allocation13 + $0x64] ss:$16 sps:$4 sm:$0xff]   ;;  %v5723_v45 = vld [vmem:[#allocation13 + $0x68] ss:$16 sps:$4 sm:$0xff]  }
  0xf8   :  { %7778 = vst [vmem:[#allocation68_spill] sm:$0xff] %v5717_v56  ;;  %7781 = vst [vmem:[#allocation71_spill] sm:$0xff] %v5723_v45 }
  0xfa   :  { %1342 = vmatpush1.bf16.msra.mxu0 %v5697_v0  ;;  %1383 = vmatpush1.bf16.msra.mxu1 %v5699_v17  ;;  %v5719_v0 = vld [vmem:[#allocation13 + $0x6c] ss:$16 sps:$4 sm:$0xff]   ;;  %v5721_v17 = vld [vmem:[#allocation13 + $0x60] ss:$16 sps:$4 sm:$0xff]  }
  0xfb   :  { %1343 = vmatprep.subr.bf16.mxu0 %v5705_v3  ;;  %1384 = vmatprep.subr.bf16.mxu1 %v5707_v55  ;;  %7779 = vst [vmem:[#allocation69_spill] sm:$0xff] %v5719_v0  ;;  %7780 = vst [vmem:[#allocation70_spill] sm:$0xff] %v5721_v17  ;;  %v5729_v55 = vld [vmem:[#allocation13 + $0x84] ss:$16 sps:$4 sm:$0xff]   ;;  %v5735_v3 = vld [vmem:[#allocation13 + $0x88] ss:$16 sps:$4 sm:$0xff]  }
  0xfc   :  { %7782 = vst [vmem:[#allocation72_spill] sm:$0xff] %v5729_v55  ;;  %7785 = vst [vmem:[#allocation75_spill] sm:$0xff] %v5735_v3 }
  0xfe   :  { %1344 = vmatpush1.bf16.msra.mxu0 %v5709_v7  ;;  %1385 = vmatpush1.bf16.msra.mxu1 %v5711_v4  ;;  %v5731_v7 = vld [vmem:[#allocation13 + $0x8c] ss:$16 sps:$4 sm:$0xff]   ;;  %v5733_v4 = vld [vmem:[#allocation13 + $0x80] ss:$16 sps:$4 sm:$0xff]  }
  0xff   :  { %1345 = vmatprep.subr.bf16.mxu0 %v5717_v56  ;;  %1386 = vmatprep.subr.bf16.mxu1 %v5719_v0  ;;  %7783 = vst [vmem:[#allocation73_spill] sm:$0xff] %v5731_v7  ;;  %7784 = vst [vmem:[#allocation74_spill] sm:$0xff] %v5733_v4  ;;  %v5751_v0 = vld [vmem:[#allocation13 + $0xc4] ss:$16 sps:$4 sm:$0xff]   ;;  %v5753_v56 = vld [vmem:[#allocation13 + $0xcc] ss:$16 sps:$4 sm:$0xff]  }
 0x100   :  { %7790 = vst [vmem:[#allocation80_spill] sm:$0xff] %v5751_v0  ;;  %7791 = vst [vmem:[#allocation81_spill] sm:$0xff] %v5753_v56 }
 0x102   :  { %1346 = vmatpush1.bf16.msra.mxu0 %v5721_v17  ;;  %1387 = vmatpush1.bf16.msra.mxu1 %v5723_v45  ;;  %v5745_v45 = vld [vmem:[#allocation13 + $0xa0] ss:$16 sps:$4 sm:$0xff]   ;;  %v5747_v17 = vld [vmem:[#allocation13 + $0xa8] ss:$16 sps:$4 sm:$0xff]  }
 0x103   :  { %1347 = vmatprep.subr.bf16.mxu0 %v5729_v55  ;;  %1388 = vmatprep.subr.bf16.mxu1 %v5731_v7  ;;  %7788 = vst [vmem:[#allocation78_spill] sm:$0xff] %v5745_v45  ;;  %7789 = vst [vmem:[#allocation79_spill] sm:$0xff] %v5747_v17  ;;  %v5757_v7 = vld [vmem:[#allocation13 + $0xc0] ss:$16 sps:$4 sm:$0xff]  }
 0x104   :  { %7792 = vst [vmem:[#allocation82_spill] sm:$0xff] %v5757_v7 }
 0x106   :  { %1348 = vmatpush1.bf16.msra.mxu0 %v5733_v4  ;;  %1389 = vmatpush1.bf16.msra.mxu1 %v5735_v3  ;;  %v5759_v4 = vld [vmem:[#allocation13 + $0xc8] ss:$16 sps:$4 sm:$0xff]   ;;  %v5763_v3 = vld [vmem:[#allocation13 + $0xe4] ss:$16 sps:$4 sm:$0xff]  }
 0x107   :  { %1349 = vmatprep.subr.bf16.mxu0 %v5737_v14  ;;  %1390 = vmatprep.subr.bf16.mxu1 %v5739_v48  ;;  %7793 = vst [vmem:[#allocation83_spill] sm:$0xff] %v5759_v4  ;;  %7794 = vst [vmem:[#allocation84_spill] sm:$0xff] %v5763_v3  ;;  %v5765_v14 = vld [vmem:[#allocation13 + $0xec] ss:$16 sps:$4 sm:$0xff]   ;;  %v5769_v48 = vld [vmem:[#allocation13 + $0xe0] ss:$16 sps:$4 sm:$0xff]  }
 0x108   :  { %7795 = vst [vmem:[#allocation85_spill] sm:$0xff] %v5765_v14  ;;  %7796 = vst [vmem:[#allocation86_spill] sm:$0xff] %v5769_v48 }
 0x10a   :  { %1350 = vmatpush1.bf16.msra.mxu0 %v5745_v45  ;;  %1391 = vmatpush1.bf16.msra.mxu1 %v5747_v17  ;;  %v5771_v45 = vld [vmem:[#allocation13 + $0xe8] ss:$16 sps:$4 sm:$0xff]  }
 0x10b   :  { %1351 = vmatprep.subr.bf16.mxu0 %v5751_v0  ;;  %1392 = vmatprep.subr.bf16.mxu1 %v5753_v56  ;;  %7797 = vst [vmem:[#allocation87_spill] sm:$0xff] %v5771_v45  ;;  %v196_v56 = vlaneseq }
 0x10e   :  { %1352 = vmatpush1.bf16.msra.mxu0 %v5757_v7  ;;  %1393 = vmatpush1.bf16.msra.mxu1 %v5759_v4  ;;  %v5779_v7 = vshrl.u32 %v196_v56, 7 }
 0x10f   :  { %1353 = vmatprep.subr.bf16.mxu0 %v5763_v3  ;;  %1394 = vmatprep.subr.bf16.mxu1 %v5765_v14  ;;  %v194_v3 = vld [vmem:[%s7359_s5] sm:$0xf] }
 0x110   :  { %v7445_v4 = vsub.s32 0, %v5779_v7  ;;  %v7448_v0 = vsub.s32 2, %v5779_v7  ;;  %v7452_v14 = vsub.s32 3, %v5779_v7 }
 0x112   :  { %1354 = vmatpush1.bf16.msra.mxu0 %v5769_v48  ;;  %1395 = vmatpush1.bf16.msra.mxu1 %v5771_v45  ;;  %v7456_v48 = vsub.s32 1, %v5779_v7  ;;  %v5802_v17 = vrot.slane %v194_v3, %v7452_v14 }
 0x113   :  { %1472 = vmatprep.subr.bf16.mxu0 %v5477_v35  ;;  %1513 = vmatprep.subr.bf16.mxu1 %v5479_v36  ;;  %v5790_v35 = vrot.slane %v194_v3, %v7445_v4  ;;  %v5794_v36 = vrot.slane %v194_v3, %v7448_v0 }
 0x114   :  { %v5810_v4 = vrot.slane %v194_v3, %v7456_v48 }
 0x187   :  { %v5796_v56 = vpop.f32.mrb[0].mxu0  ;;  %v5798_v45 = vpop.f32.mrb[0].mxu1 }
 0x188   :  { %v5804_v55 = vpop.f32.mrb[1].mxu0  ;;  %v5806_v44 = vpop.f32.mrb[1].mxu1 }
 0x189   :  { %v414_v37 = vpop.f32.mrb[2].mxu0  ;;  %v487_v34 = vpop.f32.mrb[2].mxu1 }
 0x18a   :  { %v5813_v0 = vadd.f32 %v414_v37, %v5790_v35  ;;  %v416_v33 = vpop.f32.mrb[3].mxu0  ;;  %v5816_v32 = vadd.f32 %v487_v34, %v5794_v36  ;;  %v489_v31 = vpop.f32.mrb[3].mxu1 }
 0x18b   :  { %v5819_v14 = vadd.f32 %v416_v33, %v5810_v4  ;;  %v5822_v30 = vadd.f32 %v489_v31, %v5802_v17 }
 0x18c   :  { %7798 = vst [vmem:[#allocation88_spill] sm:$0xff] %v5813_v0  ;;  %7799 = vst [vmem:[#allocation89_spill] sm:$0xff] %v5816_v32 }
 0x18d   :  { %7800 = vst [vmem:[#allocation90_spill] sm:$0xff] %v5819_v14  ;;  %7801 = vst [vmem:[#allocation91_spill] sm:$0xff] %v5822_v30 }
 0x18f   :  { %v420_v29 = vpop.f32.mrb[4].mxu0  ;;  %v493_v28 = vpop.f32.mrb[4].mxu1 }
 0x190   :  { %v5825_v3 = vadd.f32 %v420_v29, %v5790_v35  ;;  %v422_v48 = vpop.f32.mrb[5].mxu0  ;;  %v5828_v37 = vadd.f32 %v493_v28, %v5794_v36  ;;  %v495_v0 = vpop.f32.mrb[5].mxu1 }
 0x191   :  { %v5831_v34 = vadd.f32 %v422_v48, %v5810_v4  ;;  %v424_v32 = vpop.f32.mrb[6].mxu0  ;;  %v5834_v33 = vadd.f32 %v495_v0, %v5802_v17  ;;  %v497_v14 = vpop.f32.mrb[6].mxu1 }
 0x192   :  { %7802 = vst [vmem:[#allocation92_spill] sm:$0xff] %v5825_v3  ;;  %7803 = vst [vmem:[#allocation93_spill] sm:$0xff] %v5828_v37  ;;  %v5837_v31 = vadd.f32 %v424_v32, %v5790_v35  ;;  %v426_v30 = vpop.f32.mrb[7].mxu0  ;;  %v5840_v29 = vadd.f32 %v497_v14, %v5794_v36  ;;  %v499_v3 = vpop.f32.mrb[7].mxu1 }
 0x193   :  { %7804 = vst [vmem:[#allocation94_spill] sm:$0xff] %v5831_v34  ;;  %7805 = vst [vmem:[#allocation95_spill] sm:$0xff] %v5834_v33  ;;  %v5843_v28 = vadd.f32 %v426_v30, %v5810_v4  ;;  %v5846_v37 = vadd.f32 %v499_v3, %v5802_v17 }
 0x194   :  { %7806 = vst [vmem:[#allocation96_spill] sm:$0xff] %v5837_v31  ;;  %7807 = vst [vmem:[#allocation97_spill] sm:$0xff] %v5840_v29 }
 0x195   :  { %7808 = vst [vmem:[#allocation98_spill] sm:$0xff] %v5843_v28  ;;  %7809 = vst [vmem:[#allocation99_spill] sm:$0xff] %v5846_v37 }
 0x197   :  { %v430_v48 = vpop.f32.mrb[8].mxu0  ;;  %v503_v34 = vpop.f32.mrb[8].mxu1 }
 0x198   :  { %v5849_v0 = vadd.f32 %v430_v48, %v5790_v35  ;;  %v432_v33 = vpop.f32.mrb[9].mxu0  ;;  %v5852_v32 = vadd.f32 %v503_v34, %v5794_v36  ;;  %v505_v31 = vpop.f32.mrb[9].mxu1 }
 0x199   :  { %v5855_v14 = vadd.f32 %v432_v33, %v5810_v4  ;;  %v434_v29 = vpop.f32.mrb[10].mxu0  ;;  %v5858_v30 = vadd.f32 %v505_v31, %v5802_v17  ;;  %v507_v28 = vpop.f32.mrb[10].mxu1 }
 0x19a   :  { %7810 = vst [vmem:[#allocation100_spill] sm:$0xff] %v5849_v0  ;;  %7811 = vst [vmem:[#allocation101_spill] sm:$0xff] %v5852_v32  ;;  %v5861_v3 = vadd.f32 %v434_v29, %v5790_v35  ;;  %v436_v37 = vpop.f32.mrb[11].mxu0  ;;  %v5864_v48 = vadd.f32 %v507_v28, %v5794_v36  ;;  %v509_v0 = vpop.f32.mrb[11].mxu1 }
 0x19b   :  { %7812 = vst [vmem:[#allocation102_spill] sm:$0xff] %v5855_v14  ;;  %7813 = vst [vmem:[#allocation103_spill] sm:$0xff] %v5858_v30  ;;  %v5867_v34 = vadd.f32 %v436_v37, %v5810_v4  ;;  %v5870_v32 = vadd.f32 %v509_v0, %v5802_v17 }
 0x19c   :  { %7814 = vst [vmem:[#allocation104_spill] sm:$0xff] %v5861_v3  ;;  %7815 = vst [vmem:[#allocation105_spill] sm:$0xff] %v5864_v48 }
 0x19d   :  { %7816 = vst [vmem:[#allocation106_spill] sm:$0xff] %v5867_v34  ;;  %7817 = vst [vmem:[#allocation107_spill] sm:$0xff] %v5870_v32 }
 0x19f   :  { %v440_v33 = vpop.f32.mrb[12].mxu0  ;;  %v513_v14 = vpop.f32.mrb[12].mxu1 }
 0x1a0   :  { %v5873_v31 = vadd.f32 %v440_v33, %v5790_v35  ;;  %v442_v30 = vpop.f32.mrb[13].mxu0  ;;  %v5876_v29 = vadd.f32 %v513_v14, %v5794_v36  ;;  %v515_v3 = vpop.f32.mrb[13].mxu1 }
 0x1a1   :  { %v5879_v28 = vadd.f32 %v442_v30, %v5810_v4  ;;  %v444_v48 = vpop.f32.mrb[14].mxu0  ;;  %v5882_v37 = vadd.f32 %v515_v3, %v5802_v17  ;;  %v517_v34 = vpop.f32.mrb[14].mxu1 }
 0x1a2   :  { %7818 = vst [vmem:[#allocation108_spill] sm:$0xff] %v5873_v31  ;;  %7819 = vst [vmem:[#allocation109_spill] sm:$0xff] %v5876_v29  ;;  %v5885_v0 = vadd.f32 %v444_v48, %v5790_v35  ;;  %v446_v32 = vpop.f32.mrb[15].mxu0  ;;  %v5888_v33 = vadd.f32 %v517_v34, %v5794_v36  ;;  %v519_v31 = vpop.f32.mrb[15].mxu1 }
 0x1a3   :  { %7820 = vst [vmem:[#allocation110_spill] sm:$0xff] %v5879_v28  ;;  %7821 = vst [vmem:[#allocation111_spill] sm:$0xff] %v5882_v37  ;;  %v5891_v14 = vadd.f32 %v446_v32, %v5810_v4  ;;  %v5894_v29 = vadd.f32 %v519_v31, %v5802_v17  ;;  %v484_v32 = vadd.f32 %v5798_v45, %v5794_v36 }
 0x1a4   :  { %7822 = vst [vmem:[#allocation112_spill] sm:$0xff] %v5885_v0  ;;  %7823 = vst [vmem:[#allocation113_spill] sm:$0xff] %v5888_v33  ;;  %v411_v33 = vadd.f32 %v5796_v56, %v5790_v35  ;;  %v413_v31 = vadd.f32 %v5804_v55, %v5810_v4 }
 0x1a5   :  { %7824 = vst [vmem:[#allocation114_spill] sm:$0xff] %v5891_v14  ;;  %7825 = vst [vmem:[#allocation115_spill] sm:$0xff] %v5894_v29  ;;  %v486_v29 = vadd.f32 %v5806_v44, %v5802_v17 }
 0x1a7   :  { %v5896_v30 = vpop.f32.mrb[16].mxu0  ;;  %v5898_v28 = vpop.f32.mrb[16].mxu1 }
 0x1a8   :  { %v5900_v3 = vpop.f32.mrb[17].mxu0  ;;  %v5902_v37 = vpop.f32.mrb[17].mxu1 }
 0x1a9   :  { %v856_v48 = vpop.f32.mrb[18].mxu0  ;;  %v897_v0 = vpop.f32.mrb[18].mxu1 }
 0x1aa   :  { %v857_v27 = vpop.f32.mrb[19].mxu0  ;;  %v898_v34 = vpop.f32.mrb[19].mxu1 }
 0x1c7   :  { %v1102_v14 = vpop.f32.mrb[20].mxu0  ;;  %v1143_v26 = vpop.f32.mrb[20].mxu1 }
 0x1c8   :  { %v1150_v25 = vadd.f32 %v1102_v14, %v411_v33  ;;  %v1152_v24 = vadd.f32 %v1143_v26, %v484_v32  ;;  %v1104_v48 = vpop.f32.mrb[21].mxu0  ;;  %v1145_v0 = vpop.f32.mrb[21].mxu1 }
 0x1c9   :  { %v1151_v27 = vadd.f32 %v1104_v48, %v413_v31  ;;  %v1153_v34 = vadd.f32 %v1145_v0, %v486_v29  ;;  %v1106_v23 = vpop.f32.mrb[22].mxu0  ;;  %v1147_v22 = vpop.f32.mrb[22].mxu1  ;;  %v652_v29 = vld [vmem:[#allocation9] sm:$0xff] }
 0x1ca   :  { %v4157_v35 = vmul.f32 -1.442695, %v1150_v25  ;;  %v1107_v56 = vpop.f32.mrb[23].mxu0  ;;  %v1148_v21 = vpop.f32.mrb[23].mxu1 }
 0x1cb   :  { %v4158_v45 = vmul.f32 -1.442695, %v1151_v27  ;;  %v4159_v55 = vmul.f32 -1.442695, %v1153_v34 }
 0x1cc   :  { %4541 = vpow2.f32 %v4157_v35 }
 0x1cd   :  { %4543 = vpow2.f32 %v4158_v45 }
 0x1ce   :  { %4545 = vpow2.f32 %v4159_v55 }
 0x1cf   :  { %4547 = vtanh.f32 %v1152_v24 }
 0x1d6   :  { %v4542_v4 = vpop.eup %4541 }
 0x1d7   :  { %v4544_v36 = vpop.eup %4543  ;;  %v1157_v44 = vadd.f32 1.0, %v4542_v4 }
 0x1d8   :  { %v1163_v17 = vadd.f32 1.0, %v4544_v36  ;;  %v4546_v26 = vpop.eup %4545 }
 0x1d9   :  { %4549 = vrcp.f32 %v1157_v44  ;;  %v4548_v33 = vpop.eup %4547  ;;  %v1170_v14 = vadd.f32 1.0, %v4546_v26  ;;  %v7831_v44 = vld [vmem:[#allocation29_spill] sm:$0xff]  ;;  %v7833_v26 = vld [vmem:[#allocation31_spill] sm:$0xff] }
 0x1da   :  { %4551 = vrcp.f32 %v1163_v17  ;;  %v7832_v17 = vld [vmem:[#allocation30_spill] sm:$0xff] }
 0x1db   :  { %4553 = vrcp.f32 %v1170_v14  ;;  %v7842_v14 = vld [vmem:[#allocation40_spill] sm:$0xff] }
 0x1e3   :  { %v4550_v23 = vpop.eup %4549 }
 0x1e4   :  { %v4552_v22 = vpop.eup %4551  ;;  %v1174_v25 = vmul.f32 %v4550_v23, %v4548_v33  ;;  %v7834_v33 = vld [vmem:[#allocation32_spill] sm:$0xff]  ;;  %v7836_v23 = vld [vmem:[#allocation34_spill] sm:$0xff] }
 0x1e5   :  { %v1173_v21 = vmul.f32 %v4552_v22, %v652_v29  ;;  %v4554_v31 = vpop.eup %4553  ;;  %v7835_v29 = vld [vmem:[#allocation33_spill] sm:$0xff]  ;;  %v7840_v22 = vld [vmem:[#allocation38_spill] sm:$0xff] }
 0x1e7   :  { %v5912_v32 = vadd.f32 %v1174_v25, %v1173_v21  ;;  %v7841_v25 = vld [vmem:[#allocation39_spill] sm:$0xff]  ;;  %v7843_v21 = vld [vmem:[#allocation41_spill] sm:$0xff] }
 0x1e9   :  { %4555 = vtanh.f32 %v5912_v32 }
 0x1f3   :  { %v4556_v48 = vpop.eup %4555 }
 0x1f4   :  { %v1177_v0 = vmul.f32 %v4556_v48, %v4554_v31  ;;  %v7844_v31 = vld [vmem:[#allocation42_spill] sm:$0xff]  ;;  %v7845_v48 = vld [vmem:[#allocation43_spill] sm:$0xff] }
 0x1f6   :  { %v5915_v24 = vpack.c.bf16 %v1177_v0, %v1177_v0  ;;  %v7846_v0 = vld [vmem:[#allocation44_spill] sm:$0xff] }
 0x1f8   :  { %1372 = vmatmul.mubr.bf16.vlgmr.msra.gmra.mrb[24].mxu0 %v5915_v24  ;;  %1413 = vmatmul.mubr.bf16.vlgmr.msra.gmra.mrb[24].mxu1 %v5915_v24 }
 0x1f9   :  { %1473 = vmatpush1.bf16.msra.mxu0 %v5481_v38  ;;  %1514 = vmatpush1.bf16.msra.mxu1 %v5483_v39  ;;  %v650_v38 = vld [vmem:[%s7362_s8] sm:$0xf]  ;;  %v7826_v39 = vsub.s32 0, %v5779_v7  ;;  %s5260_s8 = smov [#allocation19]  }
 0x1fa   :  { %1474 = vmatprep.subr.bf16.mxu0 %v5487_v40  ;;  %1515 = vmatprep.subr.bf16.mxu1 %v5489_v41  ;;  %s4019_s0 = sshll.u32 %s5260_s8, 4  ;;  %s4020_s0 = int_to_ptr.vmem [resolvable:$true] %s4019_s0 }
 0x1fb   :  { %1504 = vmatprep.mubr.bf16.mxu0 %v7765_v59  ;;  %1545 = vmatprep.mubr.bf16.mxu1 %v7765_v59  ;;  %v5958_v40 = vrot.slane %v650_v38, %v7826_v39  ;;  %v7848_v39 = vld [vmem:[#allocation46_spill] sm:$0xff]  ;;  %s5165_s18 = scalar_lea.vmem %s4020_s0, 256  ;;  %p5170_p9 = scmp.lt.s32.totalorder %s4020_s0, %s4020_s0 }
 0x1fc   :  { %p5166_p8 = scmp.ne.s32.totalorder %s4020_s0, %s5165_s18  ;;  %p5171_p10 = scmp.lt.s32.totalorder %s5165_s18, %s5165_s18 }
 0x1fd   :  { %1475 = vmatpush1.bf16.msra.mxu0 %v5491_v42  ;;  %1516 = vmatpush1.bf16.msra.mxu1 %v5493_v43  ;;  %v7827_v43 = vsub.s32 1, %v5779_v7 }
 0x1fe   :  { %1476 = vmatprep.subr.bf16.mxu0 %v5497_v46  ;;  %1517 = vmatprep.subr.bf16.mxu1 %v5501_v47  ;;  %p5172_p11 = por %p5171_p10, %p5170_p9 }
 0x1ff   :  { %v5962_v46 = vrot.slane %v650_v38, %v7827_v43  ;;  %v7851_v43 = vld [vmem:[#allocation49_spill] sm:$0xff] }
 0x200   :  { %p5173_p12 = pnand %p5172_p11, %p5166_p8 }
 0x201   :  { %1477 = vmatpush1.bf16.msra.mxu0 %v5505_v49  ;;  %1518 = vmatpush1.bf16.msra.mxu1 %v5507_v50 }
 0x202   :  { %1478 = vmatprep.subr.bf16.mxu0 %v5511_v51  ;;  %1519 = vmatprep.subr.bf16.mxu1 %v5515_v52 }
 0x205   :  { %1479 = vmatpush1.bf16.msra.mxu0 %v5517_v53  ;;  %1520 = vmatpush1.bf16.msra.mxu1 %v5519_v54 }
 0x206   :  { %1480 = vmatprep.subr.bf16.mxu0 %v5525_v57  ;;  %1521 = vmatprep.subr.bf16.mxu1 %v5527_v58 }
 0x209   :  { %1481 = vmatpush1.bf16.msra.mxu0 %v5531_v60  ;;  %1522 = vmatpush1.bf16.msra.mxu1 %v5533_v61 }
 0x20a   :  { %1482 = vmatprep.subr.bf16.mxu0 %v5537_v62  ;;  %1523 = vmatprep.subr.bf16.mxu1 %v5541_v63 }
 0x20d   :  { %1483 = vmatpush1.bf16.msra.mxu0 %v5543_v1  ;;  %1524 = vmatpush1.bf16.msra.mxu1 %v5545_v2  ;;  %v7828_v2 = vsub.s32 3, %v5779_v7 }
 0x20e   :  { %1484 = vmatprep.subr.bf16.mxu0 %v5551_v5  ;;  %1525 = vmatprep.subr.bf16.mxu1 %v5553_v6 }
 0x20f   :  { %v5972_v5 = vrot.slane %v650_v38, %v7828_v2  ;;  %v7866_v2 = vld [vmem:[#allocation64_spill] sm:$0xff] }
 0x211   :  { %1485 = vmatpush1.bf16.msra.mxu0 %v5557_v8  ;;  %1526 = vmatpush1.bf16.msra.mxu1 %v5559_v9  ;;  %v7829_v8 = vsub.s32 2, %v5779_v7 }
 0x212   :  { %1486 = vmatprep.subr.bf16.mxu0 %v5563_v10  ;;  %1527 = vmatprep.subr.bf16.mxu1 %v5567_v11 }
 0x213   :  { %v5977_v9 = vrot.slane %v650_v38, %v7829_v8  ;;  %v7847_v38 = vld [vmem:[#allocation45_spill] sm:$0xff]  ;;  %v7869_v8 = vld [vmem:[#allocation67_spill] sm:$0xff] }
 0x215   :  { %1487 = vmatpush1.bf16.msra.mxu0 %v5569_v12  ;;  %1528 = vmatpush1.bf16.msra.mxu1 %v5571_v13 }
 0x216   :  { %1561 = vmatprep.subr.bf16.mxu0 %v5577_v15  ;;  %1602 = vmatprep.subr.bf16.mxu1 %v5579_v16 }
 0x2cb   :  { %v1373_v41 = vpop.f32.mrb[24].mxu0  ;;  %v1414_v42 = vpop.f32.mrb[24].mxu1 }
 0x2cc   :  { %v1374_v47 = vadd.f32 %v1373_v41, %v5896_v30  ;;  %v1415_v49 = vadd.f32 %v1414_v42, %v5898_v28  ;;  %v1375_v50 = vpop.f32.mrb[25].mxu0  ;;  %v1416_v51 = vpop.f32.mrb[25].mxu1  ;;  %v656_v30 = vld [vmem:[#allocation9 + $0x8] sm:$0xff]  ;;  %v7849_v41 = vld [vmem:[#allocation47_spill] sm:$0xff] }
 0x2cd   :  { %v1376_v52 = vadd.f32 %v1375_v50, %v5900_v3  ;;  %v1417_v53 = vadd.f32 %v1416_v51, %v5902_v37  ;;  %v1377_v54 = vpop.f32.mrb[26].mxu0  ;;  %v1418_v57 = vpop.f32.mrb[26].mxu1  ;;  %v7850_v42 = vld [vmem:[#allocation48_spill] sm:$0xff]  ;;  %v7855_v51 = vld [vmem:[#allocation53_spill] sm:$0xff] }
 0x2ce   :  { %v1442_v58 = vadd.f32 %v5958_v40, %v1374_v47  ;;  %v1378_v60 = vpop.f32.mrb[27].mxu0  ;;  %v1419_v61 = vpop.f32.mrb[27].mxu1  ;;  %v1444_v11 = vadd.f32 %v5977_v9, %v1415_v49  ;;  %v7852_v47 = vld [vmem:[#allocation50_spill] sm:$0xff]  ;;  %v7853_v49 = vld [vmem:[#allocation51_spill] sm:$0xff]  ;;  %v7854_v50 = vld [vmem:[#allocation52_spill] sm:$0xff] }
 0x2cf   :  { %v1443_v62 = vadd.f32 %v5962_v46, %v1376_v52  ;;  %v1445_v6 = vadd.f32 %v5972_v5, %v1417_v53  ;;  %v7856_v52 = vld [vmem:[#allocation54_spill] sm:$0xff]  ;;  %v7857_v53 = vld [vmem:[#allocation55_spill] sm:$0xff]  ;;  %v7858_v54 = vld [vmem:[#allocation56_spill] sm:$0xff] }
 0x2d0   :  { %v4192_v63 = vmul.f32 -1.442695, %v1442_v58  ;;  %v7859_v57 = vld [vmem:[#allocation57_spill] sm:$0xff]  ;;  %v7860_v58 = vld [vmem:[#allocation58_spill] sm:$0xff]  ;;  %v7861_v60 = vld [vmem:[#allocation59_spill] sm:$0xff] }
 0x2d1   :  { %v4193_v1 = vmul.f32 -1.442695, %v1443_v62  ;;  %v4194_v10 = vmul.f32 -1.442695, %v1445_v6  ;;  %v7862_v61 = vld [vmem:[#allocation60_spill] sm:$0xff]  ;;  %v7863_v62 = vld [vmem:[#allocation61_spill] sm:$0xff] }
 0x2d2   :  { %4557 = vpow2.f32 %v4192_v63  ;;  %v7864_v63 = vld [vmem:[#allocation62_spill] sm:$0xff]  ;;  %v7867_v6 = vld [vmem:[#allocation65_spill] sm:$0xff] }
 0x2d3   :  { %4559 = vpow2.f32 %v4193_v1  ;;  %v7865_v1 = vld [vmem:[#allocation63_spill] sm:$0xff] }
 0x2d4   :  { %4561 = vpow2.f32 %v4194_v10  ;;  %v7870_v10 = vld [vmem:[#allocation68_spill] sm:$0xff] }
 0x2d5   :  { %4563 = vtanh.f32 %v1444_v11  ;;  %v7871_v11 = vld [vmem:[#allocation69_spill] sm:$0xff] }
 0x2dc   :  { %v4558_v12 = vpop.eup %4557 }
 0x2dd   :  { %v4560_v13 = vpop.eup %4559  ;;  %v1449_v15 = vadd.f32 1.0, %v4558_v12  ;;  %v7872_v12 = vld [vmem:[#allocation70_spill] sm:$0xff] }
 0x2de   :  { %v1455_v16 = vadd.f32 1.0, %v4560_v13  ;;  %v4562_v28 = vpop.eup %4561  ;;  %v7873_v13 = vld [vmem:[#allocation71_spill] sm:$0xff] }
 0x2df   :  { %4565 = vrcp.f32 %v1449_v15  ;;  %v4564_v37 = vpop.eup %4563  ;;  %v1462_v7 = vadd.f32 1.0, %v4562_v28  ;;  %v7874_v15 = vld [vmem:[#allocation72_spill] sm:$0xff]  ;;  %v7876_v28 = vld [vmem:[#allocation74_spill] sm:$0xff] }
 0x2e0   :  { %4567 = vrcp.f32 %v1455_v16  ;;  %v7875_v16 = vld [vmem:[#allocation73_spill] sm:$0xff] }
 0x2e1   :  { %4569 = vrcp.f32 %v1462_v7  ;;  %v7882_v7 = vld [vmem:[#allocation80_spill] sm:$0xff] }
 0x2e9   :  { %v4566_v3 = vpop.eup %4565 }
 0x2ea   :  { %v4568_v27 = vpop.eup %4567  ;;  %v1466_v34 = vmul.f32 %v4566_v3, %v4564_v37  ;;  %v7877_v37 = vld [vmem:[#allocation75_spill] sm:$0xff]  ;;  %v7879_v3 = vld [vmem:[#allocation77_spill] sm:$0xff] }
 0x2eb   :  { %v1465_v35 = vmul.f32 %v4568_v27, %v656_v30  ;;  %v4570_v45 = vpop.eup %4569  ;;  %v7878_v30 = vld [vmem:[#allocation76_spill] sm:$0xff]  ;;  %v7880_v27 = vld [vmem:[#allocation78_spill] sm:$0xff] }
 0x2ed   :  { %v5980_v56 = vadd.f32 %v1466_v34, %v1465_v35  ;;  %v7881_v34 = vld [vmem:[#allocation79_spill] sm:$0xff]  ;;  %v7883_v35 = vld [vmem:[#allocation81_spill] sm:$0xff] }
 0x2ef   :  { %4571 = vtanh.f32 %v5980_v56 }
 0x2f9   :  { %v4572_v55 = vpop.eup %4571 }
 0x2fa   :  { %v5983_v4 = vmul.f32 %v4572_v55, %v4570_v45  ;;  %v7884_v45 = vld [vmem:[#allocation82_spill] sm:$0xff]  ;;  %v7885_v55 = vld [vmem:[#allocation83_spill] sm:$0xff] }
 0x2fc   :  { %7830 = vst [vmem:[#allocation116_spill] sm:$0xff] %v5983_v4  ;;  %v1471_v36 = vpack.c.bf16 %v5983_v4, %v5983_v4 }
 0x2fe   :  { %1505 = vmatmul.mubr.bf16.vlgmr.msra.gmra.mrb[28].mxu0 %v1471_v36  ;;  %1546 = vmatmul.mubr.bf16.vlgmr.msra.gmra.mrb[28].mxu1 %v1471_v36  ;;  %v7886_v36 = vld [vmem:[#allocation84_spill] sm:$0xff] }
 0x2ff   :  { %1562 = vmatpush1.bf16.msra.mxu0 %v5583_v18  ;;  %1603 = vmatpush1.bf16.msra.mxu1 %v5585_v19  ;;  %v7837_v18 = vld [vmem:[#allocation35_spill] sm:$0xff]  ;;  %v7838_v19 = vld [vmem:[#allocation36_spill] sm:$0xff] }
 0x300   :  { %1563 = vmatprep.subr.bf16.mxu0 %v5589_v20  ;;  %1604 = vmatprep.subr.bf16.mxu1 %v7831_v44  ;;  %v7839_v20 = vld [vmem:[#allocation37_spill] sm:$0xff] }
 0x301   :  { %1593 = vmatprep.mubr.bf16.mxu0 %v7765_v59  ;;  %1634 = vmatprep.mubr.bf16.mxu1 %v7765_v59  ;;  %v7887_v44 = vld [vmem:[#allocation85_spill] sm:$0xff] }
 0x303   :  { %1564 = vmatpush1.bf16.msra.mxu0 %v7832_v17  ;;  %1605 = vmatpush1.bf16.msra.mxu1 %v7833_v26  ;;  %v7888_v17 = vld [vmem:[#allocation86_spill] sm:$0xff]  ;;  %v7889_v26 = vld [vmem:[#allocation87_spill] sm:$0xff] }
 0x304   :  { %1565 = vmatprep.subr.bf16.mxu0 %v7834_v33  ;;  %1606 = vmatprep.subr.bf16.mxu1 %v7835_v29  ;;  %v6055_v33 = vld [vmem:[#allocation15 + $0x4] ss:$16 sps:$4 sm:$0xff]   ;;  %v6058_v29 = vld [vmem:[#allocation15 + $0xc] ss:$16 sps:$4 sm:$0xff]  }
 0x305   :  { %7890 = vst [vmem:[#allocation29_spill] sm:$0xff] %v6055_v33  ;;  %7891 = vst [vmem:[#allocation30_spill] sm:$0xff] %v6058_v29 }
 0x307   :  { %1566 = vmatpush1.bf16.msra.mxu0 %v7836_v23  ;;  %1607 = vmatpush1.bf16.msra.mxu1 %v7837_v18 }
 0x308   :  { %1567 = vmatprep.subr.bf16.mxu0 %v7838_v19  ;;  %1608 = vmatprep.subr.bf16.mxu1 %v7839_v20 }
 0x30b   :  { %1568 = vmatpush1.bf16.msra.mxu0 %v7840_v22  ;;  %1609 = vmatpush1.bf16.msra.mxu1 %v7841_v25 }
 0x30c   :  { %1569 = vmatprep.subr.bf16.mxu0 %v7842_v14  ;;  %1610 = vmatprep.subr.bf16.mxu1 %v7843_v21 }
 0x30f   :  { %1570 = vmatpush1.bf16.msra.mxu0 %v7844_v31  ;;  %1611 = vmatpush1.bf16.msra.mxu1 %v7845_v48 }
 0x310   :  { %1571 = vmatprep.subr.bf16.mxu0 %v7846_v0  ;;  %1612 = vmatprep.subr.bf16.mxu1 %v7847_v38  ;;  %v7892_v0 = vld [vmem:[#allocation88_spill] sm:$0xff] }
 0x313   :  { %1572 = vmatpush1.bf16.msra.mxu0 %v7848_v39  ;;  %1613 = vmatpush1.bf16.msra.mxu1 %v7849_v41  ;;  %v7893_v39 = vld [vmem:[#allocation89_spill] sm:$0xff] }
 0x314   :  { %1573 = vmatprep.subr.bf16.mxu0 %v7850_v42  ;;  %1614 = vmatprep.subr.bf16.mxu1 %v7851_v43 }
 0x317   :  { %1574 = vmatpush1.bf16.msra.mxu0 %v7852_v47  ;;  %1615 = vmatpush1.bf16.msra.mxu1 %v7853_v49  ;;  %v7894_v47 = vld [vmem:[#allocation90_spill] sm:$0xff] }
 0x318   :  { %1575 = vmatprep.subr.bf16.mxu0 %v7854_v50  ;;  %1616 = vmatprep.subr.bf16.mxu1 %v7855_v51  ;;  %v7895_v50 = vld [vmem:[#allocation91_spill] sm:$0xff] }
 0x31b   :  { %1576 = vmatpush1.bf16.msra.mxu0 %v7856_v52  ;;  %1617 = vmatpush1.bf16.msra.mxu1 %v7857_v53 }
 0x31c   :  { %1672 = vmatprep.subr.bf16.mxu0 %v7858_v54  ;;  %1713 = vmatprep.subr.bf16.mxu1 %v7859_v57 }
 0x31e   :  { %1594 = vmatmul.mubr.bf16.vlgmr.msra.gmra.mrb[32].mxu0 %v5915_v24  ;;  %1635 = vmatmul.mubr.bf16.vlgmr.msra.gmra.mrb[32].mxu1 %v5915_v24  ;;  %v7868_v24 = vld [vmem:[#allocation66_spill] sm:$0xff] }
 0x31f   :  { %1673 = vmatpush1.bf16.msra.mxu0 %v7860_v58  ;;  %1714 = vmatpush1.bf16.msra.mxu1 %v7861_v60 }
 0x320   :  { %1674 = vmatprep.subr.bf16.mxu0 %v7862_v61  ;;  %1715 = vmatprep.subr.bf16.mxu1 %v7863_v62 }
 0x321   :  { %1704 = vmatprep.mubr.bf16.mxu0 %v7765_v59  ;;  %1745 = vmatprep.mubr.bf16.mxu1 %v7765_v59 }
 0x323   :  { %1675 = vmatpush1.bf16.msra.mxu0 %v7864_v63  ;;  %1716 = vmatpush1.bf16.msra.mxu1 %v7865_v1 }
 0x324   :  { %1676 = vmatprep.subr.bf16.mxu0 %v7866_v2  ;;  %1717 = vmatprep.subr.bf16.mxu1 %v7867_v6 }
 0x327   :  { %1677 = vmatpush1.bf16.msra.mxu0 %v7868_v24  ;;  %1718 = vmatpush1.bf16.msra.mxu1 %v7869_v8 }
 0x328   :  { %1678 = vmatprep.subr.bf16.mxu0 %v7870_v10  ;;  %1719 = vmatprep.subr.bf16.mxu1 %v7871_v11 }
 0x32b   :  { %1679 = vmatpush1.bf16.msra.mxu0 %v7872_v12  ;;  %1720 = vmatpush1.bf16.msra.mxu1 %v7873_v13 }
 0x32c   :  { %1680 = vmatprep.subr.bf16.mxu0 %v7874_v15  ;;  %1721 = vmatprep.subr.bf16.mxu1 %v7875_v16 }
 0x32f   :  { %1681 = vmatpush1.bf16.msra.mxu0 %v7876_v28  ;;  %1722 = vmatpush1.bf16.msra.mxu1 %v7877_v37 }
 0x330   :  { %1682 = vmatprep.subr.bf16.mxu0 %v7878_v30  ;;  %1723 = vmatprep.subr.bf16.mxu1 %v7879_v3 }
 0x333   :  { %1683 = vmatpush1.bf16.msra.mxu0 %v7880_v27  ;;  %1724 = vmatpush1.bf16.msra.mxu1 %v7881_v34 }
 0x334   :  { %1684 = vmatprep.subr.bf16.mxu0 %v7882_v7  ;;  %1725 = vmatprep.subr.bf16.mxu1 %v7883_v35 }
 0x337   :  { %1685 = vmatpush1.bf16.msra.mxu0 %v7884_v45  ;;  %1726 = vmatpush1.bf16.msra.mxu1 %v7885_v55 }
 0x338   :  { %1686 = vmatprep.subr.bf16.mxu0 %v7886_v36  ;;  %1727 = vmatprep.subr.bf16.mxu1 %v7887_v44 }
 0x33b   :  { %1687 = vmatpush1.bf16.msra.mxu0 %v7888_v17  ;;  %1728 = vmatpush1.bf16.msra.mxu1 %v7889_v26 }
 0x33c   :  { %1785 = vmatprep.subr.bf16.mxu0 %v6055_v33  ;;  %1826 = vmatprep.subr.bf16.mxu1 %v6058_v29 }
 0x3d1   :  { %v6061_v23 = vpop.f32.mrb[28].mxu0  ;;  %v6063_v18 = vpop.f32.mrb[28].mxu1 }
 0x3d2   :  { %v6065_v19 = vpop.f32.mrb[29].mxu0  ;;  %v6067_v20 = vpop.f32.mrb[29].mxu1 }
 0x3d3   :  { %v1510_v22 = vpop.f32.mrb[30].mxu0  ;;  %v1551_v25 = vpop.f32.mrb[30].mxu1 }
 0x3d4   :  { %v1511_v14 = vpop.f32.mrb[31].mxu0  ;;  %v1552_v21 = vpop.f32.mrb[31].mxu1 }
 0x3f1   :  { %v1595_v31 = vpop.f32.mrb[32].mxu0  ;;  %v1636_v48 = vpop.f32.mrb[32].mxu1 }
 0x3f2   :  { %v1643_v38 = vadd.f32 %v1595_v31, %v7892_v0  ;;  %v1645_v41 = vadd.f32 %v1636_v48, %v7893_v39  ;;  %v1597_v42 = vpop.f32.mrb[33].mxu0  ;;  %v1638_v43 = vpop.f32.mrb[33].mxu1 }
 0x3f3   :  { %v1644_v49 = vadd.f32 %v1597_v42, %v7894_v47  ;;  %v1646_v51 = vadd.f32 %v1638_v43, %v7895_v50  ;;  %v1599_v52 = vpop.f32.mrb[34].mxu0  ;;  %v1640_v53 = vpop.f32.mrb[34].mxu1 }
 0x3f4   :  { %v4195_v4 = vmul.f32 -1.442695, %v1643_v38  ;;  %v1600_v29 = vpop.f32.mrb[35].mxu0  ;;  %v1641_v22 = vpop.f32.mrb[35].mxu1  ;;  %v6084_v52 = vld [vmem:[#allocation15 + $0x8] ss:$16 sps:$4 sm:$0xff]  }
 0x3f5   :  { %v4196_v25 = vmul.f32 -1.442695, %v1644_v49  ;;  %v4197_v14 = vmul.f32 -1.442695, %v1646_v51  ;;  %v6090_v53 = vld [vmem:[#allocation15 + $0x2c] ss:$16 sps:$4 sm:$0xff]  }
 0x3f6   :  { %4573 = vpow2.f32 %v4195_v4  ;;  %v6095_v22 = vld [vmem:[#allocation15 + $0x20] ss:$16 sps:$4 sm:$0xff]  }
 0x3f7   :  { %4575 = vpow2.f32 %v4196_v25  ;;  %7896 = vst [vmem:[#allocation31_spill] sm:$0xff] %v6095_v22  ;;  %v6098_v25 = vld [vmem:[#allocation15 + $0x28] ss:$16 sps:$4 sm:$0xff]  }
 0x3f8   :  { %4577 = vpow2.f32 %v4197_v14  ;;  %7897 = vst [vmem:[#allocation32_spill] sm:$0xff] %v6098_v25  ;;  %v6101_v14 = vld [vmem:[#allocation15 + $0x44] ss:$16 sps:$4 sm:$0xff]  }
 0x3f9   :  { %4579 = vtanh.f32 %v1645_v41  ;;  %7898 = vst [vmem:[#allocation33_spill] sm:$0xff] %v6101_v14 }
 0x400   :  { %v4574_v21 = vpop.eup %4573 }
 0x401   :  { %v4576_v33 = vpop.eup %4575  ;;  %v1650_v31 = vadd.f32 1.0, %v4574_v21  ;;  %v6104_v21 = vld [vmem:[#allocation15 + $0x4c] ss:$16 sps:$4 sm:$0xff]  }
 0x402   :  { %v1656_v48 = vadd.f32 1.0, %v4576_v33  ;;  %v4578_v0 = vpop.eup %4577  ;;  %v6081_v33 = vld [vmem:[#allocation15] ss:$16 sps:$4 sm:$0xff]   ;;  %7899 = vst [vmem:[#allocation34_spill] sm:$0xff] %v6104_v21 }
 0x403   :  { %4581 = vrcp.f32 %v1650_v31  ;;  %v4580_v39 = vpop.eup %4579  ;;  %v1663_v38 = vadd.f32 1.0, %v4578_v0  ;;  %v6107_v31 = vld [vmem:[#allocation15 + $0x40] ss:$16 sps:$4 sm:$0xff]   ;;  %v6113_v0 = vld [vmem:[#allocation15 + $0x64] ss:$16 sps:$4 sm:$0xff]  }
 0x404   :  { %4583 = vrcp.f32 %v1656_v48  ;;  %7900 = vst [vmem:[#allocation35_spill] sm:$0xff] %v6107_v31  ;;  %v6110_v48 = vld [vmem:[#allocation15 + $0x48] ss:$16 sps:$4 sm:$0xff]   ;;  %7902 = vst [vmem:[#allocation37_spill] sm:$0xff] %v6113_v0 }
 0x405   :  { %4585 = vrcp.f32 %v1663_v38  ;;  %7901 = vst [vmem:[#allocation36_spill] sm:$0xff] %v6110_v48  ;;  %v6128_v38 = vld [vmem:[#allocation15 + $0x8c] ss:$16 sps:$4 sm:$0xff]  }
 0x406   :  { %7907 = vst [vmem:[#allocation42_spill] sm:$0xff] %v6128_v38 }
 0x40d   :  { %v4582_v42 = vpop.eup %4581 }
 0x40e   :  { %v4584_v43 = vpop.eup %4583  ;;  %v1667_v47 = vmul.f32 %v4582_v42, %v4580_v39  ;;  %v6116_v39 = vld [vmem:[#allocation15 + $0x6c] ss:$16 sps:$4 sm:$0xff]   ;;  %v6119_v42 = vld [vmem:[#allocation15 + $0x60] ss:$16 sps:$4 sm:$0xff]  }
 0x40f   :  { %v1666_v29 = vmul.f32 %v4584_v43, %v5912_v32  ;;  %v4586_v4 = vpop.eup %4585  ;;  %v6087_v32 = vld [vmem:[#allocation15 + $0x24] ss:$16 sps:$4 sm:$0xff]   ;;  %7903 = vst [vmem:[#allocation38_spill] sm:$0xff] %v6116_v39  ;;  %7904 = vst [vmem:[#allocation39_spill] sm:$0xff] %v6119_v42  ;;  %v6122_v43 = vld [vmem:[#allocation15 + $0x68] ss:$16 sps:$4 sm:$0xff]  }
 0x410   :  { %7905 = vst [vmem:[#allocation40_spill] sm:$0xff] %v6122_v43 }
 0x411   :  { %v6074_v49 = vadd.f32 %v1667_v47, %v1666_v29  ;;  %v6125_v47 = vld [vmem:[#allocation15 + $0x84] ss:$16 sps:$4 sm:$0xff]   ;;  %v6131_v29 = vld [vmem:[#allocation15 + $0x80] ss:$16 sps:$4 sm:$0xff]  }
 0x412   :  { %7906 = vst [vmem:[#allocation41_spill] sm:$0xff] %v6125_v47  ;;  %7908 = vst [vmem:[#allocation43_spill] sm:$0xff] %v6131_v29 }
 0x413   :  { %4587 = vtanh.f32 %v6074_v49 }
 0x41d   :  { %v4588_v50 = vpop.eup %4587 }
 0x41e   :  { %v1670_v51 = vmul.f32 %v4588_v50, %v4586_v4  ;;  %v6134_v4 = vld [vmem:[#allocation15 + $0x88] ss:$16 sps:$4 sm:$0xff]   ;;  %v6137_v50 = vld [vmem:[#allocation15 + $0xa4] ss:$16 sps:$4 sm:$0xff]  }
 0x41f   :  { %7909 = vst [vmem:[#allocation44_spill] sm:$0xff] %v6134_v4  ;;  %7910 = vst [vmem:[#allocation45_spill] sm:$0xff] %v6137_v50 }
 0x420   :  { %v6077_v41 = vpack.c.bf16 %v1670_v51, %v1670_v51  ;;  %v6140_v51 = vld [vmem:[#allocation15 + $0xac] ss:$16 sps:$4 sm:$0xff]  }
 0x421   :  { %7911 = vst [vmem:[#allocation46_spill] sm:$0xff] %v6140_v51 }
 0x422   :  { %1705 = vmatmul.mubr.bf16.vlgmr.msra.gmra.mrb[36].mxu0 %v6077_v41  ;;  %1746 = vmatmul.mubr.bf16.vlgmr.msra.gmra.mrb[36].mxu1 %v6077_v41 }
 0x423   :  { %1786 = vmatpush1.bf16.msra.mxu0 %v6081_v33  ;;  %1827 = vmatpush1.bf16.msra.mxu1 %v6084_v52 }
 0x424   :  { %1787 = vmatprep.subr.bf16.mxu0 %v6087_v32  ;;  %1828 = vmatprep.subr.bf16.mxu1 %v6090_v53 }
 0x425   :  { %1817 = vmatprep.mubr.bf16.mxu0 %v7765_v59  ;;  %1858 = vmatprep.mubr.bf16.mxu1 %v7765_v59 }
 0x427   :  { %1788 = vmatpush1.bf16.msra.mxu0 %v6095_v22  ;;  %1829 = vmatpush1.bf16.msra.mxu1 %v6098_v25 }
 0x428   :  { %1789 = vmatprep.subr.bf16.mxu0 %v6101_v14  ;;  %1830 = vmatprep.subr.bf16.mxu1 %v6104_v21 }
 0x42b   :  { %1790 = vmatpush1.bf16.msra.mxu0 %v6107_v31  ;;  %1831 = vmatpush1.bf16.msra.mxu1 %v6110_v48 }
 0x42c   :  { %1791 = vmatprep.subr.bf16.mxu0 %v6113_v0  ;;  %1832 = vmatprep.subr.bf16.mxu1 %v6116_v39 }
 0x42f   :  { %1792 = vmatpush1.bf16.msra.mxu0 %v6119_v42  ;;  %1833 = vmatpush1.bf16.msra.mxu1 %v6122_v43 }
 0x430   :  { %1793 = vmatprep.subr.bf16.mxu0 %v6125_v47  ;;  %1834 = vmatprep.subr.bf16.mxu1 %v6128_v38  ;;  %v6143_v47 = vld [vmem:[#allocation15 + $0xa0] ss:$16 sps:$4 sm:$0xff]   ;;  %v6146_v38 = vld [vmem:[#allocation15 + $0xa8] ss:$16 sps:$4 sm:$0xff]  }
 0x431   :  { %7912 = vst [vmem:[#allocation47_spill] sm:$0xff] %v6143_v47  ;;  %7913 = vst [vmem:[#allocation48_spill] sm:$0xff] %v6146_v38 }
 0x433   :  { %1794 = vmatpush1.bf16.msra.mxu0 %v6131_v29  ;;  %1835 = vmatpush1.bf16.msra.mxu1 %v6134_v4  ;;  %v6149_v29 = vld [vmem:[#allocation15 + $0xc4] ss:$16 sps:$4 sm:$0xff]   ;;  %v6152_v4 = vld [vmem:[#allocation15 + $0xcc] ss:$16 sps:$4 sm:$0xff]  }
 0x434   :  { %1795 = vmatprep.subr.bf16.mxu0 %v6137_v50  ;;  %1836 = vmatprep.subr.bf16.mxu1 %v6140_v51  ;;  %7914 = vst [vmem:[#allocation49_spill] sm:$0xff] %v6149_v29  ;;  %7915 = vst [vmem:[#allocation50_spill] sm:$0xff] %v6152_v4  ;;  %v6155_v50 = vld [vmem:[#allocation15 + $0xc0] ss:$16 sps:$4 sm:$0xff]   ;;  %v6158_v51 = vld [vmem:[#allocation15 + $0xc8] ss:$16 sps:$4 sm:$0xff]  }
 0x435   :  { %7916 = vst [vmem:[#allocation51_spill] sm:$0xff] %v6155_v50  ;;  %7917 = vst [vmem:[#allocation52_spill] sm:$0xff] %v6158_v51 }
 0x437   :  { %1796 = vmatpush1.bf16.msra.mxu0 %v6143_v47  ;;  %1837 = vmatpush1.bf16.msra.mxu1 %v6146_v38  ;;  %v6161_v47 = vld [vmem:[#allocation15 + $0xe4] ss:$16 sps:$4 sm:$0xff]   ;;  %v6164_v38 = vld [vmem:[#allocation15 + $0xec] ss:$16 sps:$4 sm:$0xff]  }
 0x438   :  { %1797 = vmatprep.subr.bf16.mxu0 %v6149_v29  ;;  %1838 = vmatprep.subr.bf16.mxu1 %v6152_v4  ;;  %7918 = vst [vmem:[#allocation53_spill] sm:$0xff] %v6161_v47  ;;  %7919 = vst [vmem:[#allocation54_spill] sm:$0xff] %v6164_v38  ;;  %v6167_v29 = vld [vmem:[#allocation15 + $0xe0] ss:$16 sps:$4 sm:$0xff]   ;;  %v6170_v4 = vld [vmem:[#allocation15 + $0xe8] ss:$16 sps:$4 sm:$0xff]  }
 0x439   :  { %7920 = vst [vmem:[#allocation55_spill] sm:$0xff] %v6167_v29  ;;  %7921 = vst [vmem:[#allocation56_spill] sm:$0xff] %v6170_v4 }
 0x43b   :  { %1798 = vmatpush1.bf16.msra.mxu0 %v6155_v50  ;;  %1839 = vmatpush1.bf16.msra.mxu1 %v6158_v51  ;;  %v6173_v50 = vld [vmem:[#allocation12 + $0x4] ss:$16 sps:$4 sm:$0xff]   ;;  %v6176_v51 = vld [vmem:[#allocation12 + $0xc] ss:$16 sps:$4 sm:$0xff]  }
 0x43c   :  { %1799 = vmatprep.subr.bf16.mxu0 %v6161_v47  ;;  %1840 = vmatprep.subr.bf16.mxu1 %v6164_v38  ;;  %7922 = vst [vmem:[#allocation57_spill] sm:$0xff] %v6173_v50  ;;  %7923 = vst [vmem:[#allocation58_spill] sm:$0xff] %v6176_v51 }
 0x43f   :  { %1800 = vmatpush1.bf16.msra.mxu0 %v6167_v29  ;;  %1841 = vmatpush1.bf16.msra.mxu1 %v6170_v4 }
 0x440   :  { %1874 = vmatprep.subr.bf16.mxu0 %v6173_v50  ;;  %1915 = vmatprep.subr.bf16.mxu1 %v6176_v51 }
 0x4f5   :  { %v1706_v47 = vpop.f32.mrb[36].mxu0  ;;  %v1747_v43 = vpop.f32.mrb[36].mxu1 }
 0x4f6   :  { %v1707_v38 = vadd.f32 %v1706_v47, %v6061_v23  ;;  %v1748_v42 = vadd.f32 %v1747_v43, %v6063_v18  ;;  %v1708_v39 = vpop.f32.mrb[37].mxu0  ;;  %v1749_v29 = vpop.f32.mrb[37].mxu1 }
 0x4f7   :  { %v1709_v0 = vadd.f32 %v1708_v39, %v6065_v19  ;;  %v1750_v4 = vadd.f32 %v1749_v29, %v6067_v20  ;;  %v1710_v48 = vpop.f32.mrb[38].mxu0  ;;  %v1751_v31 = vpop.f32.mrb[38].mxu1 }
 0x4f8   :  { %v1754_v50 = vadd.f32 %v1707_v38, %v5958_v40  ;;  %v1711_v21 = vpop.f32.mrb[39].mxu0  ;;  %v1752_v14 = vpop.f32.mrb[39].mxu1  ;;  %v1756_v43 = vadd.f32 %v1748_v42, %v5977_v9 }
 0x4f9   :  { %v1755_v51 = vadd.f32 %v1709_v0, %v5962_v46  ;;  %v1757_v23 = vadd.f32 %v1750_v4, %v5972_v5 }
 0x4fa   :  { %v4198_v25 = vmul.f32 -1.442695, %v1754_v50 }
 0x4fb   :  { %v4199_v22 = vmul.f32 -1.442695, %v1755_v51  ;;  %v4200_v18 = vmul.f32 -1.442695, %v1757_v23  ;;  %v6195_v51 = vld [vmem:[#allocation12] ss:$16 sps:$4 sm:$0xff]  }
 0x4fc   :  { %4589 = vpow2.f32 %v4198_v25  ;;  %v6198_v23 = vld [vmem:[#allocation12 + $0x8] ss:$16 sps:$4 sm:$0xff]  }
 0x4fd   :  { %4591 = vpow2.f32 %v4199_v22 }
 0x4fe   :  { %4593 = vpow2.f32 %v4200_v18  ;;  %v6204_v18 = vld [vmem:[#allocation12 + $0x2c] ss:$16 sps:$4 sm:$0xff]  }
 0x4ff   :  { %4595 = vtanh.f32 %v1756_v43  ;;  %v6209_v43 = vld [vmem:[#allocation12 + $0x20] ss:$16 sps:$4 sm:$0xff]  }
 0x506   :  { %v4590_v19 = vpop.eup %4589 }
 0x507   :  { %v4592_v39 = vpop.eup %4591  ;;  %v1761_v20 = vadd.f32 1.0, %v4590_v19  ;;  %v6212_v19 = vld [vmem:[#allocation12 + $0x28] ss:$16 sps:$4 sm:$0xff]  }
 0x508   :  { %v1767_v31 = vadd.f32 1.0, %v4592_v39  ;;  %v4594_v14 = vpop.eup %4593  ;;  %v6215_v39 = vld [vmem:[#allocation12 + $0x44] ss:$16 sps:$4 sm:$0xff]  }
 0x509   :  { %4597 = vrcp.f32 %v1761_v20  ;;  %v4596_v21 = vpop.eup %4595  ;;  %v1774_v25 = vadd.f32 1.0, %v4594_v14  ;;  %v6218_v20 = vld [vmem:[#allocation12 + $0x4c] ss:$16 sps:$4 sm:$0xff]   ;;  %v6224_v14 = vld [vmem:[#allocation12 + $0x48] ss:$16 sps:$4 sm:$0xff]  }
 0x50a   :  { %4599 = vrcp.f32 %v1767_v31  ;;  %v6221_v31 = vld [vmem:[#allocation12 + $0x40] ss:$16 sps:$4 sm:$0xff]  }
 0x50b   :  { %4601 = vrcp.f32 %v1774_v25  ;;  %v6239_v25 = vld [vmem:[#allocation12 + $0x84] ss:$16 sps:$4 sm:$0xff]  }
 0x50c   :  { %7925 = vst [vmem:[#allocation60_spill] sm:$0xff] %v6239_v25 }
 0x513   :  { %v4598_v48 = vpop.eup %4597 }
 0x514   :  { %v4600_v0 = vpop.eup %4599  ;;  %v1778_v47 = vmul.f32 %v4598_v48, %v4596_v21  ;;  %v6227_v21 = vld [vmem:[#allocation12 + $0x64] ss:$16 sps:$4 sm:$0xff]   ;;  %v6230_v48 = vld [vmem:[#allocation12 + $0x6c] ss:$16 sps:$4 sm:$0xff]  }
 0x515   :  { %v1777_v22 = vmul.f32 %v4600_v0, %v5980_v56  ;;  %v4602_v42 = vpop.eup %4601  ;;  %v6201_v56 = vld [vmem:[#allocation12 + $0x24] ss:$16 sps:$4 sm:$0xff]   ;;  %v6233_v0 = vld [vmem:[#allocation12 + $0x60] ss:$16 sps:$4 sm:$0xff]  }
 0x517   :  { %v6188_v38 = vadd.f32 %v1778_v47, %v1777_v22  ;;  %v6236_v47 = vld [vmem:[#allocation12 + $0x68] ss:$16 sps:$4 sm:$0xff]   ;;  %v6242_v22 = vld [vmem:[#allocation12 + $0x8c] ss:$16 sps:$4 sm:$0xff]  }
 0x518   :  { %7926 = vst [vmem:[#allocation61_spill] sm:$0xff] %v6242_v22 }
 0x519   :  { %4603 = vtanh.f32 %v6188_v38 }
 0x523   :  { %v4604_v29 = vpop.eup %4603 }
 0x524   :  { %v6191_v4 = vmul.f32 %v4604_v29, %v4602_v42  ;;  %v6245_v42 = vld [vmem:[#allocation12 + $0x80] ss:$16 sps:$4 sm:$0xff]   ;;  %v6248_v29 = vld [vmem:[#allocation12 + $0x88] ss:$16 sps:$4 sm:$0xff]  }
 0x525   :  { %7927 = vst [vmem:[#allocation62_spill] sm:$0xff] %v6245_v42  ;;  %7928 = vst [vmem:[#allocation63_spill] sm:$0xff] %v6248_v29 }
 0x526   :  { %7924 = vst [vmem:[#allocation59_spill] sm:$0xff] %v6191_v4  ;;  %v1784_v50 = vpack.c.bf16 %v6191_v4, %v6191_v4  ;;  %v6254_v4 = vld [vmem:[#allocation12 + $0xac] ss:$16 sps:$4 sm:$0xff]  }
 0x527   :  { %7930 = vst [vmem:[#allocation65_spill] sm:$0xff] %v6254_v4 }
 0x528   :  { %1818 = vmatmul.mubr.bf16.vlgmr.msra.gmra.mrb[40].mxu0 %v1784_v50  ;;  %1859 = vmatmul.mubr.bf16.vlgmr.msra.gmra.mrb[40].mxu1 %v1784_v50  ;;  %v6251_v50 = vld [vmem:[#allocation12 + $0xa4] ss:$16 sps:$4 sm:$0xff]  }
 0x529   :  { %1875 = vmatpush1.bf16.msra.mxu0 %v6195_v51  ;;  %1916 = vmatpush1.bf16.msra.mxu1 %v6198_v23  ;;  %7929 = vst [vmem:[#allocation64_spill] sm:$0xff] %v6251_v50 }
 0x52a   :  { %1876 = vmatprep.subr.bf16.mxu0 %v6201_v56  ;;  %1917 = vmatprep.subr.bf16.mxu1 %v6204_v18 }
 0x52b   :  { %1906 = vmatprep.mubr.bf16.mxu0 %v7765_v59  ;;  %1947 = vmatprep.mubr.bf16.mxu1 %v7765_v59 }
 0x52d   :  { %1877 = vmatpush1.bf16.msra.mxu0 %v6209_v43  ;;  %1918 = vmatpush1.bf16.msra.mxu1 %v6212_v19 }
 0x52e   :  { %1878 = vmatprep.subr.bf16.mxu0 %v6215_v39  ;;  %1919 = vmatprep.subr.bf16.mxu1 %v6218_v20 }
 0x531   :  { %1879 = vmatpush1.bf16.msra.mxu0 %v6221_v31  ;;  %1920 = vmatpush1.bf16.msra.mxu1 %v6224_v14 }
 0x532   :  { %1880 = vmatprep.subr.bf16.mxu0 %v6227_v21  ;;  %1921 = vmatprep.subr.bf16.mxu1 %v6230_v48 }
 0x535   :  { %1881 = vmatpush1.bf16.msra.mxu0 %v6233_v0  ;;  %1922 = vmatpush1.bf16.msra.mxu1 %v6236_v47 }
 0x536   :  { %1882 = vmatprep.subr.bf16.mxu0 %v6239_v25  ;;  %1923 = vmatprep.subr.bf16.mxu1 %v6242_v22  ;;  %v6257_v25 = vld [vmem:[#allocation12 + $0xa0] ss:$16 sps:$4 sm:$0xff]   ;;  %v6260_v22 = vld [vmem:[#allocation12 + $0xa8] ss:$16 sps:$4 sm:$0xff]  }
 0x537   :  { %7931 = vst [vmem:[#allocation66_spill] sm:$0xff] %v6257_v25  ;;  %7932 = vst [vmem:[#allocation67_spill] sm:$0xff] %v6260_v22 }
 0x539   :  { %1883 = vmatpush1.bf16.msra.mxu0 %v6245_v42  ;;  %1924 = vmatpush1.bf16.msra.mxu1 %v6248_v29  ;;  %v6263_v42 = vld [vmem:[#allocation12 + $0xc4] ss:$16 sps:$4 sm:$0xff]   ;;  %v6266_v29 = vld [vmem:[#allocation12 + $0xcc] ss:$16 sps:$4 sm:$0xff]  }
 0x53a   :  { %1884 = vmatprep.subr.bf16.mxu0 %v6251_v50  ;;  %1925 = vmatprep.subr.bf16.mxu1 %v6254_v4  ;;  %7933 = vst [vmem:[#allocation68_spill] sm:$0xff] %v6263_v42  ;;  %7934 = vst [vmem:[#allocation69_spill] sm:$0xff] %v6266_v29  ;;  %v6269_v50 = vld [vmem:[#allocation12 + $0xc0] ss:$16 sps:$4 sm:$0xff]   ;;  %v6272_v4 = vld [vmem:[#allocation12 + $0xc8] ss:$16 sps:$4 sm:$0xff]  }
 0x53b   :  { %7935 = vst [vmem:[#allocation70_spill] sm:$0xff] %v6269_v50  ;;  %7936 = vst [vmem:[#allocation71_spill] sm:$0xff] %v6272_v4 }
 0x53d   :  { %1885 = vmatpush1.bf16.msra.mxu0 %v6257_v25  ;;  %1926 = vmatpush1.bf16.msra.mxu1 %v6260_v22  ;;  %v6275_v25 = vld [vmem:[#allocation12 + $0xe4] ss:$16 sps:$4 sm:$0xff]   ;;  %v6278_v22 = vld [vmem:[#allocation12 + $0xec] ss:$16 sps:$4 sm:$0xff]  }
 0x53e   :  { %1886 = vmatprep.subr.bf16.mxu0 %v6263_v42  ;;  %1927 = vmatprep.subr.bf16.mxu1 %v6266_v29  ;;  %7937 = vst [vmem:[#allocation72_spill] sm:$0xff] %v6275_v25  ;;  %7938 = vst [vmem:[#allocation73_spill] sm:$0xff] %v6278_v22  ;;  %v6281_v42 = vld [vmem:[#allocation12 + $0xe0] ss:$16 sps:$4 sm:$0xff]   ;;  %v6284_v29 = vld [vmem:[#allocation12 + $0xe8] ss:$16 sps:$4 sm:$0xff]  }
 0x53f   :  { %7939 = vst [vmem:[#allocation74_spill] sm:$0xff] %v6281_v42  ;;  %7940 = vst [vmem:[#allocation75_spill] sm:$0xff] %v6284_v29 }
 0x541   :  { %1887 = vmatpush1.bf16.msra.mxu0 %v6269_v50  ;;  %1928 = vmatpush1.bf16.msra.mxu1 %v6272_v4 }
 0x542   :  { %1888 = vmatprep.subr.bf16.mxu0 %v6275_v25  ;;  %1929 = vmatprep.subr.bf16.mxu1 %v6278_v22 }
 0x545   :  { %1889 = vmatpush1.bf16.msra.mxu0 %v6281_v42  ;;  %1930 = vmatpush1.bf16.msra.mxu1 %v6284_v29 }
 0x546   :  { %1985 = vmatprep.subr.bf16.mxu0 %v7858_v54  ;;  %2026 = vmatprep.subr.bf16.mxu1 %v7859_v57  ;;  %v7941_v54 = vld [vmem:[#allocation29_spill] sm:$0xff]  ;;  %v7942_v57 = vld [vmem:[#allocation30_spill] sm:$0xff] }
 0x548   :  { %1907 = vmatmul.mubr.bf16.vlgmr.msra.gmra.mrb[44].mxu0 %v6077_v41  ;;  %1948 = vmatmul.mubr.bf16.vlgmr.msra.gmra.mrb[44].mxu1 %v6077_v41 }
 0x549   :  { %1986 = vmatpush1.bf16.msra.mxu0 %v7860_v58  ;;  %2027 = vmatpush1.bf16.msra.mxu1 %v7861_v60 }
 0x54a   :  { %1987 = vmatprep.subr.bf16.mxu0 %v7862_v61  ;;  %2028 = vmatprep.subr.bf16.mxu1 %v7863_v62 }
 0x54b   :  { %2017 = vmatprep.mubr.bf16.mxu0 %v7765_v59  ;;  %2058 = vmatprep.mubr.bf16.mxu1 %v7765_v59 }
 0x54d   :  { %1988 = vmatpush1.bf16.msra.mxu0 %v7864_v63  ;;  %2029 = vmatpush1.bf16.msra.mxu1 %v7865_v1 }
 0x54e   :  { %1989 = vmatprep.subr.bf16.mxu0 %v7866_v2  ;;  %2030 = vmatprep.subr.bf16.mxu1 %v7867_v6 }
 0x551   :  { %1990 = vmatpush1.bf16.msra.mxu0 %v7868_v24  ;;  %2031 = vmatpush1.bf16.msra.mxu1 %v7869_v8 }
 0x552   :  { %1991 = vmatprep.subr.bf16.mxu0 %v7870_v10  ;;  %2032 = vmatprep.subr.bf16.mxu1 %v7871_v11  ;;  %v7943_v10 = vld [vmem:[#allocation92_spill] sm:$0xff] }
 0x555   :  { %1992 = vmatpush1.bf16.msra.mxu0 %v7872_v12  ;;  %2033 = vmatpush1.bf16.msra.mxu1 %v7873_v13  ;;  %v7944_v12 = vld [vmem:[#allocation93_spill] sm:$0xff] }
 0x556   :  { %1993 = vmatprep.subr.bf16.mxu0 %v7874_v15  ;;  %2034 = vmatprep.subr.bf16.mxu1 %v7875_v16 }
 0x559   :  { %1994 = vmatpush1.bf16.msra.mxu0 %v7876_v28  ;;  %2035 = vmatpush1.bf16.msra.mxu1 %v7877_v37  ;;  %v7945_v28 = vld [vmem:[#allocation94_spill] sm:$0xff] }
 0x55a   :  { %1995 = vmatprep.subr.bf16.mxu0 %v7878_v30  ;;  %2036 = vmatprep.subr.bf16.mxu1 %v7879_v3  ;;  %v7946_v30 = vld [vmem:[#allocation95_spill] sm:$0xff] }
 0x55d   :  { %1996 = vmatpush1.bf16.msra.mxu0 %v7880_v27  ;;  %2037 = vmatpush1.bf16.msra.mxu1 %v7881_v34 }
 0x55e   :  { %1997 = vmatprep.subr.bf16.mxu0 %v7882_v7  ;;  %2038 = vmatprep.subr.bf16.mxu1 %v7883_v35 }
 0x561   :  { %1998 = vmatpush1.bf16.msra.mxu0 %v7884_v45  ;;  %2039 = vmatpush1.bf16.msra.mxu1 %v7885_v55 }
 0x562   :  { %1999 = vmatprep.subr.bf16.mxu0 %v7886_v36  ;;  %2040 = vmatprep.subr.bf16.mxu1 %v7887_v44 }
 0x565   :  { %2000 = vmatpush1.bf16.msra.mxu0 %v7888_v17  ;;  %2041 = vmatpush1.bf16.msra.mxu1 %v7889_v26 }
 0x566   :  { %2098 = vmatprep.subr.bf16.mxu0 %v7941_v54  ;;  %2139 = vmatprep.subr.bf16.mxu1 %v7942_v57 }
 0x5fb   :  { %v6325_v58 = vpop.f32.mrb[40].mxu0  ;;  %v6327_v60 = vpop.f32.mrb[40].mxu1 }
 0x5fc   :  { %v6329_v61 = vpop.f32.mrb[41].mxu0  ;;  %v6331_v62 = vpop.f32.mrb[41].mxu1 }
 0x5fd   :  { %v1823_v63 = vpop.f32.mrb[42].mxu0  ;;  %v1864_v1 = vpop.f32.mrb[42].mxu1 }
 0x5fe   :  { %v1824_v2 = vpop.f32.mrb[43].mxu0  ;;  %v1865_v6 = vpop.f32.mrb[43].mxu1 }
 0x61b   :  { %v1908_v24 = vpop.f32.mrb[44].mxu0  ;;  %v1949_v8 = vpop.f32.mrb[44].mxu1 }
 0x61c   :  { %v1956_v11 = vadd.f32 %v1908_v24, %v7943_v10  ;;  %v1958_v13 = vadd.f32 %v1949_v8, %v7944_v12  ;;  %v1910_v15 = vpop.f32.mrb[45].mxu0  ;;  %v1951_v16 = vpop.f32.mrb[45].mxu1 }
 0x61d   :  { %v1957_v37 = vadd.f32 %v1910_v15, %v7945_v28  ;;  %v1959_v3 = vadd.f32 %v1951_v16, %v7946_v30  ;;  %v1912_v27 = vpop.f32.mrb[46].mxu0  ;;  %v1953_v34 = vpop.f32.mrb[46].mxu1  ;;  %v7948_v28 = vld [vmem:[#allocation32_spill] sm:$0xff]  ;;  %v7950_v30 = vld [vmem:[#allocation34_spill] sm:$0xff] }
 0x61e   :  { %v4201_v7 = vmul.f32 -1.442695, %v1956_v11  ;;  %v1913_v35 = vpop.f32.mrb[47].mxu0  ;;  %v1954_v45 = vpop.f32.mrb[47].mxu1  ;;  %v7952_v27 = vld [vmem:[#allocation36_spill] sm:$0xff]  ;;  %v7953_v34 = vld [vmem:[#allocation37_spill] sm:$0xff] }
 0x61f   :  { %v4202_v55 = vmul.f32 -1.442695, %v1957_v37  ;;  %v4203_v36 = vmul.f32 -1.442695, %v1959_v3  ;;  %v7949_v37 = vld [vmem:[#allocation33_spill] sm:$0xff]  ;;  %v7951_v3 = vld [vmem:[#allocation35_spill] sm:$0xff] }
 0x620   :  { %4605 = vpow2.f32 %v4201_v7  ;;  %v7954_v7 = vld [vmem:[#allocation38_spill] sm:$0xff]  ;;  %v7955_v35 = vld [vmem:[#allocation39_spill] sm:$0xff]  ;;  %v7956_v45 = vld [vmem:[#allocation40_spill] sm:$0xff] }
 0x621   :  { %4607 = vpow2.f32 %v4202_v55  ;;  %v7957_v55 = vld [vmem:[#allocation41_spill] sm:$0xff] }
 0x622   :  { %4609 = vpow2.f32 %v4203_v36  ;;  %v7958_v36 = vld [vmem:[#allocation42_spill] sm:$0xff] }
 0x623   :  { %4611 = vtanh.f32 %v1958_v13 }
 0x62a   :  { %v4606_v44 = vpop.eup %4605 }
 0x62b   :  { %v4608_v17 = vpop.eup %4607  ;;  %v1963_v26 = vadd.f32 1.0, %v4606_v44  ;;  %v7959_v44 = vld [vmem:[#allocation43_spill] sm:$0xff] }
 0x62c   :  { %v1969_v41 = vadd.f32 1.0, %v4608_v17  ;;  %v4610_v63 = vpop.eup %4609  ;;  %v7960_v17 = vld [vmem:[#allocation44_spill] sm:$0xff] }
 0x62d   :  { %4613 = vrcp.f32 %v1963_v26  ;;  %v4612_v1 = vpop.eup %4611  ;;  %v1976_v8 = vadd.f32 1.0, %v4610_v63  ;;  %v7961_v26 = vld [vmem:[#allocation45_spill] sm:$0xff]  ;;  %v7963_v63 = vld [vmem:[#allocation47_spill] sm:$0xff] }
 0x62e   :  { %4615 = vrcp.f32 %v1969_v41  ;;  %v7962_v41 = vld [vmem:[#allocation46_spill] sm:$0xff] }
 0x62f   :  { %4617 = vrcp.f32 %v1976_v8  ;;  %v7968_v8 = vld [vmem:[#allocation52_spill] sm:$0xff] }
 0x637   :  { %v4614_v2 = vpop.eup %4613 }
 0x638   :  { %v4616_v6 = vpop.eup %4615  ;;  %v1980_v24 = vmul.f32 %v4614_v2, %v4612_v1  ;;  %v7964_v1 = vld [vmem:[#allocation48_spill] sm:$0xff]  ;;  %v7965_v2 = vld [vmem:[#allocation49_spill] sm:$0xff] }
 0x639   :  { %v1979_v10 = vmul.f32 %v4616_v6, %v6074_v49  ;;  %v4618_v12 = vpop.eup %4617  ;;  %v7947_v49 = vld [vmem:[#allocation31_spill] sm:$0xff]  ;;  %v7966_v6 = vld [vmem:[#allocation50_spill] sm:$0xff] }
 0x63b   :  { %v6338_v11 = vadd.f32 %v1980_v24, %v1979_v10  ;;  %v7967_v24 = vld [vmem:[#allocation51_spill] sm:$0xff]  ;;  %v7969_v10 = vld [vmem:[#allocation53_spill] sm:$0xff] }
 0x63d   :  { %4619 = vtanh.f32 %v6338_v11 }
 0x647   :  { %v4620_v15 = vpop.eup %4619 }
 0x648   :  { %v1983_v16 = vmul.f32 %v4620_v15, %v4618_v12  ;;  %v7970_v12 = vld [vmem:[#allocation54_spill] sm:$0xff]  ;;  %v7971_v15 = vld [vmem:[#allocation55_spill] sm:$0xff] }
 0x64a   :  { %v6341_v13 = vpack.c.bf16 %v1983_v16, %v1983_v16  ;;  %v7972_v16 = vld [vmem:[#allocation56_spill] sm:$0xff] }
 0x64c   :  { %2018 = vmatmul.mubr.bf16.vlgmr.msra.gmra.mrb[48].mxu0 %v6341_v13  ;;  %2059 = vmatmul.mubr.bf16.vlgmr.msra.gmra.mrb[48].mxu1 %v6341_v13 }
 0x64d   :  { %2099 = vmatpush1.bf16.msra.mxu0 %v6081_v33  ;;  %2140 = vmatpush1.bf16.msra.mxu1 %v6084_v52 }
 0x64e   :  { %2100 = vmatprep.subr.bf16.mxu0 %v6087_v32  ;;  %2141 = vmatprep.subr.bf16.mxu1 %v6090_v53 }
 0x64f   :  { %2130 = vmatprep.mubr.bf16.mxu0 %v7765_v59  ;;  %2171 = vmatprep.mubr.bf16.mxu1 %v7765_v59 }
 0x651   :  { %2101 = vmatpush1.bf16.msra.mxu0 %v7947_v49  ;;  %2142 = vmatpush1.bf16.msra.mxu1 %v7948_v28 }
 0x652   :  { %2102 = vmatprep.subr.bf16.mxu0 %v7949_v37  ;;  %2143 = vmatprep.subr.bf16.mxu1 %v7950_v30 }
 0x655   :  { %2103 = vmatpush1.bf16.msra.mxu0 %v7951_v3  ;;  %2144 = vmatpush1.bf16.msra.mxu1 %v7952_v27 }
 0x656   :  { %2104 = vmatprep.subr.bf16.mxu0 %v7953_v34  ;;  %2145 = vmatprep.subr.bf16.mxu1 %v7954_v7 }
 0x659   :  { %2105 = vmatpush1.bf16.msra.mxu0 %v7955_v35  ;;  %2146 = vmatpush1.bf16.msra.mxu1 %v7956_v45 }
 0x65a   :  { %2106 = vmatprep.subr.bf16.mxu0 %v7957_v55  ;;  %2147 = vmatprep.subr.bf16.mxu1 %v7958_v36 }
 0x65d   :  { %2107 = vmatpush1.bf16.msra.mxu0 %v7959_v44  ;;  %2148 = vmatpush1.bf16.msra.mxu1 %v7960_v17 }
 0x65e   :  { %2108 = vmatprep.subr.bf16.mxu0 %v7961_v26  ;;  %2149 = vmatprep.subr.bf16.mxu1 %v7962_v41  ;;  %v7973_v41 = vld [vmem:[#allocation57_spill] sm:$0xff] }
 0x661   :  { %2109 = vmatpush1.bf16.msra.mxu0 %v7963_v63  ;;  %2150 = vmatpush1.bf16.msra.mxu1 %v7964_v1  ;;  %v7974_v63 = vld [vmem:[#allocation58_spill] sm:$0xff] }
 0x662   :  { %2110 = vmatprep.subr.bf16.mxu0 %v7965_v2  ;;  %2151 = vmatprep.subr.bf16.mxu1 %v7966_v6 }
 0x665   :  { %2111 = vmatpush1.bf16.msra.mxu0 %v7967_v24  ;;  %2152 = vmatpush1.bf16.msra.mxu1 %v7968_v8 }
 0x666   :  { %2112 = vmatprep.subr.bf16.mxu0 %v7969_v10  ;;  %2153 = vmatprep.subr.bf16.mxu1 %v7970_v12 }
 0x669   :  { %2113 = vmatpush1.bf16.msra.mxu0 %v7971_v15  ;;  %2154 = vmatpush1.bf16.msra.mxu1 %v7972_v16 }
 0x66a   :  { %2187 = vmatprep.subr.bf16.mxu0 %v7973_v41  ;;  %2228 = vmatprep.subr.bf16.mxu1 %v7974_v63 }
 0x71f   :  { %v2019_v1 = vpop.f32.mrb[48].mxu0  ;;  %v2060_v2 = vpop.f32.mrb[48].mxu1 }
 0x720   :  { %v2020_v6 = vadd.f32 %v2019_v1, %v6325_v58  ;;  %v2061_v24 = vadd.f32 %v2060_v2, %v6327_v60  ;;  %v2021_v26 = vpop.f32.mrb[49].mxu0  ;;  %v2062_v8 = vpop.f32.mrb[49].mxu1 }
 0x721   :  { %v2022_v10 = vadd.f32 %v2021_v26, %v6329_v61  ;;  %v2063_v12 = vadd.f32 %v2062_v8, %v6331_v62  ;;  %v2023_v17 = vpop.f32.mrb[50].mxu0  ;;  %v2064_v15 = vpop.f32.mrb[50].mxu1 }
 0x722   :  { %v2067_v16 = vadd.f32 %v2020_v6, %v5958_v40  ;;  %v2024_v44 = vpop.f32.mrb[51].mxu0  ;;  %v2065_v41 = vpop.f32.mrb[51].mxu1  ;;  %v2069_v1 = vadd.f32 %v2061_v24, %v5977_v9 }
 0x723   :  { %v2068_v63 = vadd.f32 %v2022_v10, %v5962_v46  ;;  %v2070_v58 = vadd.f32 %v2063_v12, %v5972_v5 }
 0x724   :  { %v4204_v36 = vmul.f32 -1.442695, %v2067_v16  ;;  %v7977_v16 = vld [vmem:[#allocation61_spill] sm:$0xff] }
 0x725   :  { %v4205_v55 = vmul.f32 -1.442695, %v2068_v63  ;;  %v4206_v60 = vmul.f32 -1.442695, %v2070_v58  ;;  %v7978_v58 = vld [vmem:[#allocation62_spill] sm:$0xff] }
 0x726   :  { %4621 = vpow2.f32 %v4204_v36 }
 0x727   :  { %4623 = vpow2.f32 %v4205_v55 }
 0x728   :  { %4625 = vpow2.f32 %v4206_v60  ;;  %v7979_v60 = vld [vmem:[#allocation63_spill] sm:$0xff] }
 0x729   :  { %4627 = vtanh.f32 %v2069_v1  ;;  %v7980_v1 = vld [vmem:[#allocation64_spill] sm:$0xff] }
 0x730   :  { %v4622_v61 = vpop.eup %4621 }
 0x731   :  { %v4624_v26 = vpop.eup %4623  ;;  %v2074_v62 = vadd.f32 1.0, %v4622_v61  ;;  %v7981_v61 = vld [vmem:[#allocation65_spill] sm:$0xff] }
 0x732   :  { %v2080_v17 = vadd.f32 1.0, %v4624_v26  ;;  %v4626_v44 = vpop.eup %4625  ;;  %v7982_v26 = vld [vmem:[#allocation66_spill] sm:$0xff] }
 0x733   :  { %4629 = vrcp.f32 %v2074_v62  ;;  %v4628_v41 = vpop.eup %4627  ;;  %v2087_v36 = vadd.f32 1.0, %v4626_v44  ;;  %v7983_v62 = vld [vmem:[#allocation67_spill] sm:$0xff]  ;;  %v7985_v44 = vld [vmem:[#allocation69_spill] sm:$0xff] }
 0x734   :  { %4631 = vrcp.f32 %v2080_v17  ;;  %v7984_v17 = vld [vmem:[#allocation68_spill] sm:$0xff] }
 0x735   :  { %4633 = vrcp.f32 %v2087_v36  ;;  %v6441_v36 = vld [vmem:[#allocation13 + $0x24] ss:$16 sps:$4 sm:$0xff]  }
 0x736   :  { %7990 = vst [vmem:[#allocation81_spill] sm:$0xff] %v6441_v36 }
 0x73d   :  { %v4630_v2 = vpop.eup %4629 }
 0x73e   :  { %v4632_v6 = vpop.eup %4631  ;;  %v2091_v63 = vmul.f32 %v4630_v2, %v4628_v41  ;;  %v6427_v41 = vld [vmem:[#allocation13 + $0x4] ss:$16 sps:$4 sm:$0xff]   ;;  %v6430_v2 = vld [vmem:[#allocation13 + $0xc] ss:$16 sps:$4 sm:$0xff]  }
 0x73f   :  { %v2090_v55 = vmul.f32 %v4632_v6, %v6188_v38  ;;  %v4634_v24 = vpop.eup %4633  ;;  %v7976_v38 = vld [vmem:[#allocation60_spill] sm:$0xff]  ;;  %7986 = vst [vmem:[#allocation77_spill] sm:$0xff] %v6427_v41  ;;  %7987 = vst [vmem:[#allocation78_spill] sm:$0xff] %v6430_v2  ;;  %v6435_v6 = vld [vmem:[#allocation13] ss:$16 sps:$4 sm:$0xff]  }
 0x740   :  { %7988 = vst [vmem:[#allocation79_spill] sm:$0xff] %v6435_v6 }
 0x741   :  { %v6388_v8 = vadd.f32 %v2091_v63, %v2090_v55  ;;  %v6438_v63 = vld [vmem:[#allocation13 + $0x8] ss:$16 sps:$4 sm:$0xff]   ;;  %v6444_v55 = vld [vmem:[#allocation13 + $0x2c] ss:$16 sps:$4 sm:$0xff]  }
 0x742   :  { %7989 = vst [vmem:[#allocation80_spill] sm:$0xff] %v6438_v63  ;;  %7991 = vst [vmem:[#allocation82_spill] sm:$0xff] %v6444_v55 }
 0x743   :  { %4635 = vtanh.f32 %v6388_v8 }
 0x74d   :  { %v4636_v10 = vpop.eup %4635 }
 0x74e   :  { %v6391_v12 = vmul.f32 %v4636_v10, %v4634_v24  ;;  %v6452_v24 = vld [vmem:[#allocation13 + $0x28] ss:$16 sps:$4 sm:$0xff]   ;;  %v6455_v10 = vld [vmem:[#allocation13 + $0x44] ss:$16 sps:$4 sm:$0xff]  }
 0x74f   :  { %7993 = vst [vmem:[#allocation84_spill] sm:$0xff] %v6452_v24  ;;  %7994 = vst [vmem:[#allocation85_spill] sm:$0xff] %v6455_v10 }
 0x750   :  { %7975 = vst [vmem:[#allocation76_spill] sm:$0xff] %v6391_v12  ;;  %v2097_v15 = vpack.c.bf16 %v6391_v12, %v6391_v12  ;;  %v6461_v12 = vld [vmem:[#allocation13 + $0x40] ss:$16 sps:$4 sm:$0xff]  }
 0x751   :  { %7996 = vst [vmem:[#allocation87_spill] sm:$0xff] %v6461_v12 }
 0x752   :  { %2131 = vmatmul.mubr.bf16.vlgmr.msra.gmra.mrb[52].mxu0 %v2097_v15  ;;  %2172 = vmatmul.mubr.bf16.vlgmr.msra.gmra.mrb[52].mxu1 %v2097_v15  ;;  %v6458_v15 = vld [vmem:[#allocation13 + $0x4c] ss:$16 sps:$4 sm:$0xff]  }
 0x753   :  { %2188 = vmatpush1.bf16.msra.mxu0 %v6195_v51  ;;  %2229 = vmatpush1.bf16.msra.mxu1 %v6198_v23  ;;  %7995 = vst [vmem:[#allocation86_spill] sm:$0xff] %v6458_v15 }
 0x754   :  { %2189 = vmatprep.subr.bf16.mxu0 %v6201_v56  ;;  %2230 = vmatprep.subr.bf16.mxu1 %v6204_v18 }
 0x755   :  { %2219 = vmatprep.mubr.bf16.mxu0 %v7765_v59  ;;  %2260 = vmatprep.mubr.bf16.mxu1 %v7765_v59 }
 0x757   :  { %2190 = vmatpush1.bf16.msra.mxu0 %v6209_v43  ;;  %2231 = vmatpush1.bf16.msra.mxu1 %v6212_v19 }
 0x758   :  { %2191 = vmatprep.subr.bf16.mxu0 %v6215_v39  ;;  %2232 = vmatprep.subr.bf16.mxu1 %v6218_v20 }
 0x75b   :  { %2192 = vmatpush1.bf16.msra.mxu0 %v6221_v31  ;;  %2233 = vmatpush1.bf16.msra.mxu1 %v6224_v14 }
 0x75c   :  { %2193 = vmatprep.subr.bf16.mxu0 %v6227_v21  ;;  %2234 = vmatprep.subr.bf16.mxu1 %v6230_v48 }
 0x75f   :  { %2194 = vmatpush1.bf16.msra.mxu0 %v6233_v0  ;;  %2235 = vmatpush1.bf16.msra.mxu1 %v6236_v47 }
 0x760   :  { %2195 = vmatprep.subr.bf16.mxu0 %v7976_v38  ;;  %2236 = vmatprep.subr.bf16.mxu1 %v7977_v16 }
 0x763   :  { %2196 = vmatpush1.bf16.msra.mxu0 %v7978_v58  ;;  %2237 = vmatpush1.bf16.msra.mxu1 %v7979_v60 }
 0x764   :  { %2197 = vmatprep.subr.bf16.mxu0 %v7980_v1  ;;  %2238 = vmatprep.subr.bf16.mxu1 %v7981_v61 }
 0x767   :  { %2198 = vmatpush1.bf16.msra.mxu0 %v7982_v26  ;;  %2239 = vmatpush1.bf16.msra.mxu1 %v7983_v62 }
 0x768   :  { %2199 = vmatprep.subr.bf16.mxu0 %v7984_v17  ;;  %2240 = vmatprep.subr.bf16.mxu1 %v7985_v44 }
 0x76b   :  { %2200 = vmatpush1.bf16.msra.mxu0 %v6269_v50  ;;  %2241 = vmatpush1.bf16.msra.mxu1 %v6272_v4  ;;  %v8021_v50 = vld [vmem:[#allocation99_spill] sm:$0xff] }
 0x76c   :  { %2201 = vmatprep.subr.bf16.mxu0 %v6275_v25  ;;  %2242 = vmatprep.subr.bf16.mxu1 %v6278_v22  ;;  %v8020_v25 = vld [vmem:[#allocation98_spill] sm:$0xff] }
 0x76f   :  { %2202 = vmatpush1.bf16.msra.mxu0 %v6281_v42  ;;  %2243 = vmatpush1.bf16.msra.mxu1 %v6284_v29  ;;  %v8018_v29 = vld [vmem:[#allocation96_spill] sm:$0xff]  ;;  %v8019_v42 = vld [vmem:[#allocation97_spill] sm:$0xff] }
 0x770   :  { %2298 = vmatprep.subr.bf16.mxu0 %v6427_v41  ;;  %2339 = vmatprep.subr.bf16.mxu1 %v6430_v2 }
 0x772   :  { %2220 = vmatmul.mubr.bf16.vlgmr.msra.gmra.mrb[56].mxu0 %v6341_v13  ;;  %2261 = vmatmul.mubr.bf16.vlgmr.msra.gmra.mrb[56].mxu1 %v6341_v13  ;;  %v6449_v13 = vld [vmem:[#allocation13 + $0x20] ss:$16 sps:$4 sm:$0xff]  }
 0x773   :  { %2299 = vmatpush1.bf16.msra.mxu0 %v6435_v6  ;;  %2340 = vmatpush1.bf16.msra.mxu1 %v6438_v63  ;;  %7992 = vst [vmem:[#allocation83_spill] sm:$0xff] %v6449_v13 }
 0x774   :  { %2300 = vmatprep.subr.bf16.mxu0 %v6441_v36  ;;  %2341 = vmatprep.subr.bf16.mxu1 %v6444_v55  ;;  %v6464_v55 = vld [vmem:[#allocation13 + $0x48] ss:$16 sps:$4 sm:$0xff]  }
 0x775   :  { %2330 = vmatprep.mubr.bf16.mxu0 %v7765_v59  ;;  %2371 = vmatprep.mubr.bf16.mxu1 %v7765_v59  ;;  %7997 = vst [vmem:[#allocation88_spill] sm:$0xff] %v6464_v55 }
 0x777   :  { %2301 = vmatpush1.bf16.msra.mxu0 %v6449_v13  ;;  %2342 = vmatpush1.bf16.msra.mxu1 %v6452_v24  ;;  %v6467_v13 = vld [vmem:[#allocation13 + $0x64] ss:$16 sps:$4 sm:$0xff]   ;;  %v6470_v24 = vld [vmem:[#allocation13 + $0x6c] ss:$16 sps:$4 sm:$0xff]  }
 0x778   :  { %2302 = vmatprep.subr.bf16.mxu0 %v6455_v10  ;;  %2343 = vmatprep.subr.bf16.mxu1 %v6458_v15  ;;  %7998 = vst [vmem:[#allocation89_spill] sm:$0xff] %v6467_v13  ;;  %7999 = vst [vmem:[#allocation90_spill] sm:$0xff] %v6470_v24  ;;  %v6473_v10 = vld [vmem:[#allocation13 + $0x60] ss:$16 sps:$4 sm:$0xff]   ;;  %v6476_v15 = vld [vmem:[#allocation13 + $0x68] ss:$16 sps:$4 sm:$0xff]  }
 0x779   :  { %8000 = vst [vmem:[#allocation91_spill] sm:$0xff] %v6473_v10  ;;  %8001 = vst [vmem:[#allocation29_spill] sm:$0xff] %v6476_v15 }
 0x77b   :  { %2303 = vmatpush1.bf16.msra.mxu0 %v6461_v12  ;;  %2344 = vmatpush1.bf16.msra.mxu1 %v6464_v55  ;;  %v6479_v12 = vld [vmem:[#allocation13 + $0x84] ss:$16 sps:$4 sm:$0xff]   ;;  %v6482_v55 = vld [vmem:[#allocation13 + $0x8c] ss:$16 sps:$4 sm:$0xff]  }
 0x77c   :  { %2304 = vmatprep.subr.bf16.mxu0 %v6467_v13  ;;  %2345 = vmatprep.subr.bf16.mxu1 %v6470_v24  ;;  %8002 = vst [vmem:[#allocation30_spill] sm:$0xff] %v6479_v12  ;;  %8003 = vst [vmem:[#allocation92_spill] sm:$0xff] %v6482_v55  ;;  %v6485_v13 = vld [vmem:[#allocation13 + $0x80] ss:$16 sps:$4 sm:$0xff]   ;;  %v6488_v24 = vld [vmem:[#allocation13 + $0x88] ss:$16 sps:$4 sm:$0xff]  }
 0x77d   :  { %8004 = vst [vmem:[#allocation93_spill] sm:$0xff] %v6485_v13  ;;  %8005 = vst [vmem:[#allocation94_spill] sm:$0xff] %v6488_v24 }
 0x77f   :  { %2305 = vmatpush1.bf16.msra.mxu0 %v6473_v10  ;;  %2346 = vmatpush1.bf16.msra.mxu1 %v6476_v15  ;;  %v6491_v10 = vld [vmem:[#allocation13 + $0xa4] ss:$16 sps:$4 sm:$0xff]   ;;  %v6494_v15 = vld [vmem:[#allocation13 + $0xac] ss:$16 sps:$4 sm:$0xff]  }
 0x780   :  { %2306 = vmatprep.subr.bf16.mxu0 %v6479_v12  ;;  %2347 = vmatprep.subr.bf16.mxu1 %v6482_v55  ;;  %8006 = vst [vmem:[#allocation95_spill] sm:$0xff] %v6491_v10  ;;  %8007 = vst [vmem:[#allocation31_spill] sm:$0xff] %v6494_v15  ;;  %v6497_v12 = vld [vmem:[#allocation13 + $0xa0] ss:$16 sps:$4 sm:$0xff]   ;;  %v6500_v55 = vld [vmem:[#allocation13 + $0xa8] ss:$16 sps:$4 sm:$0xff]  }
 0x781   :  { %8008 = vst [vmem:[#allocation32_spill] sm:$0xff] %v6497_v12  ;;  %8009 = vst [vmem:[#allocation33_spill] sm:$0xff] %v6500_v55 }
 0x783   :  { %2307 = vmatpush1.bf16.msra.mxu0 %v6485_v13  ;;  %2348 = vmatpush1.bf16.msra.mxu1 %v6488_v24  ;;  %v6503_v13 = vld [vmem:[#allocation13 + $0xc4] ss:$16 sps:$4 sm:$0xff]   ;;  %v6506_v24 = vld [vmem:[#allocation13 + $0xcc] ss:$16 sps:$4 sm:$0xff]  }
 0x784   :  { %2308 = vmatprep.subr.bf16.mxu0 %v6491_v10  ;;  %2349 = vmatprep.subr.bf16.mxu1 %v6494_v15  ;;  %8010 = vst [vmem:[#allocation34_spill] sm:$0xff] %v6503_v13  ;;  %8011 = vst [vmem:[#allocation35_spill] sm:$0xff] %v6506_v24  ;;  %v6509_v10 = vld [vmem:[#allocation13 + $0xc0] ss:$16 sps:$4 sm:$0xff]   ;;  %v6512_v15 = vld [vmem:[#allocation13 + $0xc8] ss:$16 sps:$4 sm:$0xff]  }
 0x785   :  { %8012 = vst [vmem:[#allocation36_spill] sm:$0xff] %v6509_v10  ;;  %8013 = vst [vmem:[#allocation37_spill] sm:$0xff] %v6512_v15 }
 0x787   :  { %2309 = vmatpush1.bf16.msra.mxu0 %v6497_v12  ;;  %2350 = vmatpush1.bf16.msra.mxu1 %v6500_v55  ;;  %v6515_v12 = vld [vmem:[#allocation13 + $0xe4] ss:$16 sps:$4 sm:$0xff]   ;;  %v6518_v55 = vld [vmem:[#allocation13 + $0xec] ss:$16 sps:$4 sm:$0xff]  }
 0x788   :  { %2310 = vmatprep.subr.bf16.mxu0 %v6503_v13  ;;  %2351 = vmatprep.subr.bf16.mxu1 %v6506_v24  ;;  %8014 = vst [vmem:[#allocation38_spill] sm:$0xff] %v6515_v12  ;;  %8015 = vst [vmem:[#allocation39_spill] sm:$0xff] %v6518_v55  ;;  %v6521_v13 = vld [vmem:[#allocation13 + $0xe0] ss:$16 sps:$4 sm:$0xff]   ;;  %v6524_v24 = vld [vmem:[#allocation13 + $0xe8] ss:$16 sps:$4 sm:$0xff]  }
 0x789   :  { %8016 = vst [vmem:[#allocation40_spill] sm:$0xff] %v6521_v13  ;;  %8017 = vst [vmem:[#allocation60_spill] sm:$0xff] %v6524_v24 }
 0x78b   :  { %2311 = vmatpush1.bf16.msra.mxu0 %v6509_v10  ;;  %2352 = vmatpush1.bf16.msra.mxu1 %v6512_v15 }
 0x78c   :  { %2312 = vmatprep.subr.bf16.mxu0 %v6515_v12  ;;  %2353 = vmatprep.subr.bf16.mxu1 %v6518_v55 }
 0x78f   :  { %2313 = vmatpush1.bf16.msra.mxu0 %v6521_v13  ;;  %2354 = vmatpush1.bf16.msra.mxu1 %v6524_v24 }
 0x790   :  { %2411 = vmatprep.subr.bf16.mxu0 %v7941_v54  ;;  %2452 = vmatprep.subr.bf16.mxu1 %v7942_v57 }
 0x825   :  { %v6529_v15 = vpop.f32.mrb[52].mxu0  ;;  %v6531_v10 = vpop.f32.mrb[52].mxu1 }
 0x826   :  { %v6533_v12 = vpop.f32.mrb[53].mxu0  ;;  %v6535_v36 = vpop.f32.mrb[53].mxu1 }
 0x827   :  { %v2136_v55 = vpop.f32.mrb[54].mxu0  ;;  %v2177_v63 = vpop.f32.mrb[54].mxu1 }
 0x828   :  { %v2137_v6 = vpop.f32.mrb[55].mxu0  ;;  %v2178_v13 = vpop.f32.mrb[55].mxu1 }
 0x845   :  { %v2221_v2 = vpop.f32.mrb[56].mxu0  ;;  %v2262_v41 = vpop.f32.mrb[56].mxu1 }
 0x846   :  { %v2269_v24 = vadd.f32 %v2221_v2, %v8018_v29  ;;  %v2271_v54 = vadd.f32 %v2262_v41, %v8019_v42  ;;  %v2223_v22 = vpop.f32.mrb[57].mxu0  ;;  %v2264_v57 = vpop.f32.mrb[57].mxu1 }
 0x847   :  { %v2270_v4 = vadd.f32 %v2223_v22, %v8020_v25  ;;  %v2272_v44 = vadd.f32 %v2264_v57, %v8021_v50  ;;  %v2225_v17 = vpop.f32.mrb[58].mxu0  ;;  %v2266_v62 = vpop.f32.mrb[58].mxu1  ;;  %v8039_v57 = vld [vmem:[#allocation58_spill] sm:$0xff] }
 0x848   :  { %v4207_v26 = vmul.f32 -1.442695, %v2269_v24  ;;  %v2226_v61 = vpop.f32.mrb[59].mxu0  ;;  %v2267_v55 = vpop.f32.mrb[59].mxu1 }
 0x849   :  { %v4208_v63 = vmul.f32 -1.442695, %v2270_v4  ;;  %v4209_v6 = vmul.f32 -1.442695, %v2272_v44 }
 0x84a   :  { %4637 = vpow2.f32 %v4207_v26 }
 0x84b   :  { %4639 = vpow2.f32 %v4208_v63 }
 0x84c   :  { %4641 = vpow2.f32 %v4209_v6 }
 0x84d   :  { %4643 = vtanh.f32 %v2271_v54  ;;  %v8038_v54 = vld [vmem:[#allocation57_spill] sm:$0xff] }
 0x854   :  { %v4638_v13 = vpop.eup %4637 }
 0x855   :  { %v4640_v1 = vpop.eup %4639  ;;  %v2276_v29 = vadd.f32 1.0, %v4638_v13 }
 0x856   :  { %v2282_v42 = vadd.f32 1.0, %v4640_v1  ;;  %v4642_v25 = vpop.eup %4641  ;;  %v8037_v1 = vld [vmem:[#allocation56_spill] sm:$0xff] }
 0x857   :  { %4645 = vrcp.f32 %v2276_v29  ;;  %v4644_v22 = vpop.eup %4643  ;;  %v2289_v41 = vadd.f32 1.0, %v4642_v25 }
 0x858   :  { %4647 = vrcp.f32 %v2282_v42 }
 0x859   :  { %4649 = vrcp.f32 %v2289_v41 }
 0x861   :  { %v4646_v50 = vpop.eup %4645 }
 0x862   :  { %v4648_v17 = vpop.eup %4647  ;;  %v2293_v62 = vmul.f32 %v4646_v50, %v4644_v22 }
 0x863   :  { %v2292_v61 = vmul.f32 %v4648_v17, %v6338_v11  ;;  %v4650_v26 = vpop.eup %4649  ;;  %v8026_v11 = vld [vmem:[#allocation45_spill] sm:$0xff] }
 0x865   :  { %v6542_v4 = vadd.f32 %v2293_v62, %v2292_v61 }
 0x867   :  { %4651 = vtanh.f32 %v6542_v4 }
 0x871   :  { %v4652_v44 = vpop.eup %4651 }
 0x872   :  { %v2296_v2 = vmul.f32 %v4652_v44, %v4650_v26 }
 0x874   :  { %v6545_v24 = vpack.c.bf16 %v2296_v2, %v2296_v2 }
 0x876   :  { %2331 = vmatmul.mubr.bf16.vlgmr.msra.gmra.mrb[60].mxu0 %v6545_v24  ;;  %2372 = vmatmul.mubr.bf16.vlgmr.msra.gmra.mrb[60].mxu1 %v6545_v24 }
 0x877   :  { %2412 = vmatpush1.bf16.msra.mxu0 %v6081_v33  ;;  %2453 = vmatpush1.bf16.msra.mxu1 %v6084_v52  ;;  %v8022_v33 = vld [vmem:[#allocation41_spill] sm:$0xff]  ;;  %v8023_v52 = vld [vmem:[#allocation42_spill] sm:$0xff] }
 0x878   :  { %2413 = vmatprep.subr.bf16.mxu0 %v6087_v32  ;;  %2454 = vmatprep.subr.bf16.mxu1 %v6090_v53  ;;  %v8024_v32 = vld [vmem:[#allocation43_spill] sm:$0xff]  ;;  %v8025_v53 = vld [vmem:[#allocation44_spill] sm:$0xff] }
 0x879   :  { %2443 = vmatprep.mubr.bf16.mxu0 %v7765_v59  ;;  %2484 = vmatprep.mubr.bf16.mxu1 %v7765_v59 }
 0x87b   :  { %2414 = vmatpush1.bf16.msra.mxu0 %v7947_v49  ;;  %2455 = vmatpush1.bf16.msra.mxu1 %v7948_v28  ;;  %v8027_v49 = vld [vmem:[#allocation46_spill] sm:$0xff]  ;;  %v8028_v28 = vld [vmem:[#allocation47_spill] sm:$0xff] }
 0x87c   :  { %2415 = vmatprep.subr.bf16.mxu0 %v7949_v37  ;;  %2456 = vmatprep.subr.bf16.mxu1 %v7950_v30  ;;  %v8029_v37 = vld [vmem:[#allocation48_spill] sm:$0xff]  ;;  %v8030_v30 = vld [vmem:[#allocation49_spill] sm:$0xff] }
 0x87f   :  { %2416 = vmatpush1.bf16.msra.mxu0 %v7951_v3  ;;  %2457 = vmatpush1.bf16.msra.mxu1 %v7952_v27  ;;  %v8031_v3 = vld [vmem:[#allocation50_spill] sm:$0xff]  ;;  %v8032_v27 = vld [vmem:[#allocation51_spill] sm:$0xff] }
 0x880   :  { %2417 = vmatprep.subr.bf16.mxu0 %v7953_v34  ;;  %2458 = vmatprep.subr.bf16.mxu1 %v7954_v7  ;;  %v8033_v34 = vld [vmem:[#allocation52_spill] sm:$0xff]  ;;  %v8034_v7 = vld [vmem:[#allocation53_spill] sm:$0xff] }
 0x883   :  { %2418 = vmatpush1.bf16.msra.mxu0 %v7955_v35  ;;  %2459 = vmatpush1.bf16.msra.mxu1 %v7956_v45  ;;  %v8035_v35 = vld [vmem:[#allocation54_spill] sm:$0xff]  ;;  %v8036_v45 = vld [vmem:[#allocation55_spill] sm:$0xff] }
 0x884   :  { %2419 = vmatprep.subr.bf16.mxu0 %v8022_v33  ;;  %2460 = vmatprep.subr.bf16.mxu1 %v8023_v52 }
 0x887   :  { %2420 = vmatpush1.bf16.msra.mxu0 %v8024_v32  ;;  %2461 = vmatpush1.bf16.msra.mxu1 %v8025_v53 }
 0x888   :  { %2421 = vmatprep.subr.bf16.mxu0 %v8026_v11  ;;  %2462 = vmatprep.subr.bf16.mxu1 %v8027_v49 }
 0x88b   :  { %2422 = vmatpush1.bf16.msra.mxu0 %v8028_v28  ;;  %2463 = vmatpush1.bf16.msra.mxu1 %v8029_v37 }
 0x88c   :  { %2423 = vmatprep.subr.bf16.mxu0 %v8030_v30  ;;  %2464 = vmatprep.subr.bf16.mxu1 %v8031_v3 }
 0x88f   :  { %2424 = vmatpush1.bf16.msra.mxu0 %v8032_v27  ;;  %2465 = vmatpush1.bf16.msra.mxu1 %v8033_v34 }
 0x890   :  { %2425 = vmatprep.subr.bf16.mxu0 %v8034_v7  ;;  %2466 = vmatprep.subr.bf16.mxu1 %v8035_v35 }
 0x893   :  { %2426 = vmatpush1.bf16.msra.mxu0 %v8036_v45  ;;  %2467 = vmatpush1.bf16.msra.mxu1 %v8037_v1  ;;  %v8060_v1 = vld [vmem:[#allocation84_spill] sm:$0xff] }
 0x894   :  { %2500 = vmatprep.subr.bf16.mxu0 %v8038_v54  ;;  %2541 = vmatprep.subr.bf16.mxu1 %v8039_v57  ;;  %v8061_v54 = vld [vmem:[#allocation85_spill] sm:$0xff]  ;;  %v8062_v57 = vld [vmem:[#allocation86_spill] sm:$0xff] }
 0x949   :  { %v2332_v55 = vpop.f32.mrb[60].mxu0  ;;  %v2373_v63 = vpop.f32.mrb[60].mxu1 }
 0x94a   :  { %v2333_v6 = vadd.f32 %v2332_v55, %v6529_v15  ;;  %v2374_v13 = vadd.f32 %v2373_v63, %v6531_v10  ;;  %v2334_v29 = vpop.f32.mrb[61].mxu0  ;;  %v2375_v42 = vpop.f32.mrb[61].mxu1  ;;  %v8064_v55 = vld [vmem:[#allocation88_spill] sm:$0xff]  ;;  %v8065_v63 = vld [vmem:[#allocation89_spill] sm:$0xff] }
 0x94b   :  { %v2335_v25 = vadd.f32 %v2334_v29, %v6533_v12  ;;  %v2376_v22 = vadd.f32 %v2375_v42, %v6535_v36  ;;  %v2336_v50 = vpop.f32.mrb[62].mxu0  ;;  %v2377_v17 = vpop.f32.mrb[62].mxu1  ;;  %v8068_v29 = vld [vmem:[#allocation29_spill] sm:$0xff]  ;;  %v8069_v42 = vld [vmem:[#allocation30_spill] sm:$0xff] }
 0x94c   :  { %v2380_v62 = vadd.f32 %v2333_v6, %v5958_v40  ;;  %v2337_v41 = vpop.f32.mrb[63].mxu0  ;;  %v2378_v61 = vpop.f32.mrb[63].mxu1  ;;  %v2382_v33 = vadd.f32 %v2374_v13, %v5977_v9  ;;  %v8066_v6 = vld [vmem:[#allocation90_spill] sm:$0xff]  ;;  %v8067_v13 = vld [vmem:[#allocation91_spill] sm:$0xff] }
 0x94d   :  { %v2381_v26 = vadd.f32 %v2335_v25, %v5962_v46  ;;  %v2383_v10 = vadd.f32 %v2376_v22, %v5972_v5  ;;  %v8070_v25 = vld [vmem:[#allocation92_spill] sm:$0xff]  ;;  %v8071_v22 = vld [vmem:[#allocation93_spill] sm:$0xff]  ;;  %v8072_v50 = vld [vmem:[#allocation94_spill] sm:$0xff] }
 0x94e   :  { %v4210_v44 = vmul.f32 -1.442695, %v2380_v62  ;;  %v8073_v17 = vld [vmem:[#allocation95_spill] sm:$0xff]  ;;  %v8075_v41 = vld [vmem:[#allocation32_spill] sm:$0xff]  ;;  %v8076_v61 = vld [vmem:[#allocation33_spill] sm:$0xff] }
 0x94f   :  { %v4211_v2 = vmul.f32 -1.442695, %v2381_v26  ;;  %v4212_v15 = vmul.f32 -1.442695, %v2383_v10  ;;  %v8074_v62 = vld [vmem:[#allocation31_spill] sm:$0xff]  ;;  %v8077_v26 = vld [vmem:[#allocation34_spill] sm:$0xff] }
 0x950   :  { %4653 = vpow2.f32 %v4210_v44  ;;  %v8078_v44 = vld [vmem:[#allocation35_spill] sm:$0xff]  ;;  %v8080_v10 = vld [vmem:[#allocation37_spill] sm:$0xff] }
 0x951   :  { %4655 = vpow2.f32 %v4211_v2  ;;  %v8079_v2 = vld [vmem:[#allocation36_spill] sm:$0xff] }
 0x952   :  { %4657 = vpow2.f32 %v4212_v15  ;;  %v8081_v15 = vld [vmem:[#allocation38_spill] sm:$0xff] }
 0x953   :  { %4659 = vtanh.f32 %v2382_v33  ;;  %v8082_v33 = vld [vmem:[#allocation39_spill] sm:$0xff] }
 0x95a   :  { %v4654_v12 = vpop.eup %4653 }
 0x95b   :  { %v4656_v52 = vpop.eup %4655  ;;  %v2387_v36 = vadd.f32 1.0, %v4654_v12  ;;  %v8083_v12 = vld [vmem:[#allocation40_spill] sm:$0xff] }
 0x95c   :  { %v2393_v32 = vadd.f32 1.0, %v4656_v52  ;;  %v4658_v53 = vpop.eup %4657  ;;  %v8084_v52 = vld [vmem:[#allocation60_spill] sm:$0xff] }
 0x95d   :  { %4661 = vrcp.f32 %v2387_v36  ;;  %v4660_v11 = vpop.eup %4659  ;;  %v2400_v30 = vadd.f32 1.0, %v4658_v53  ;;  %v6667_v36 = vld [vmem:[#allocation15 + $0x4] ss:$16 sps:$4 sm:$0xff]  }
 0x95e   :  { %4663 = vrcp.f32 %v2393_v32  ;;  %8085 = vst [vmem:[#allocation62_spill] sm:$0xff] %v6667_v36  ;;  %v6670_v32 = vld [vmem:[#allocation15 + $0xc] ss:$16 sps:$4 sm:$0xff]  }
 0x95f   :  { %4665 = vrcp.f32 %v2400_v30  ;;  %8086 = vst [vmem:[#allocation63_spill] sm:$0xff] %v6670_v32 }
 0x967   :  { %v4662_v49 = vpop.eup %4661 }
 0x968   :  { %v4664_v28 = vpop.eup %4663  ;;  %v2404_v37 = vmul.f32 %v4662_v49, %v4660_v11 }
 0x969   :  { %v2403_v3 = vmul.f32 %v4664_v28, %v6388_v8  ;;  %v4666_v34 = vpop.eup %4665  ;;  %v8055_v8 = vld [vmem:[#allocation79_spill] sm:$0xff] }
 0x96b   :  { %v6592_v27 = vadd.f32 %v2404_v37, %v2403_v3 }
 0x96d   :  { %4667 = vtanh.f32 %v6592_v27 }
 0x977   :  { %v4668_v7 = vpop.eup %4667 }
 0x978   :  { %v6595_v35 = vmul.f32 %v4668_v7, %v4666_v34 }
 0x97a   :  { %8040 = vst [vmem:[#allocation61_spill] sm:$0xff] %v6595_v35  ;;  %v2410_v45 = vpack.c.bf16 %v6595_v35, %v6595_v35 }
 0x97c   :  { %2444 = vmatmul.mubr.bf16.vlgmr.msra.gmra.mrb[64].mxu0 %v2410_v45  ;;  %2485 = vmatmul.mubr.bf16.vlgmr.msra.gmra.mrb[64].mxu1 %v2410_v45 }
 0x97d   :  { %2501 = vmatpush1.bf16.msra.mxu0 %v6195_v51  ;;  %2542 = vmatpush1.bf16.msra.mxu1 %v6198_v23  ;;  %v8041_v51 = vld [vmem:[#allocation64_spill] sm:$0xff]  ;;  %v8042_v23 = vld [vmem:[#allocation65_spill] sm:$0xff] }
 0x97e   :  { %2502 = vmatprep.subr.bf16.mxu0 %v6201_v56  ;;  %2543 = vmatprep.subr.bf16.mxu1 %v6204_v18  ;;  %v8043_v56 = vld [vmem:[#allocation66_spill] sm:$0xff]  ;;  %v8044_v18 = vld [vmem:[#allocation67_spill] sm:$0xff] }
 0x97f   :  { %2532 = vmatprep.mubr.bf16.mxu0 %v7765_v59  ;;  %2573 = vmatprep.mubr.bf16.mxu1 %v7765_v59 }
 0x981   :  { %2503 = vmatpush1.bf16.msra.mxu0 %v6209_v43  ;;  %2544 = vmatpush1.bf16.msra.mxu1 %v6212_v19  ;;  %v8045_v43 = vld [vmem:[#allocation68_spill] sm:$0xff]  ;;  %v8046_v19 = vld [vmem:[#allocation69_spill] sm:$0xff] }
 0x982   :  { %2504 = vmatprep.subr.bf16.mxu0 %v6215_v39  ;;  %2545 = vmatprep.subr.bf16.mxu1 %v6218_v20  ;;  %v8047_v39 = vld [vmem:[#allocation70_spill] sm:$0xff]  ;;  %v8048_v20 = vld [vmem:[#allocation71_spill] sm:$0xff] }
 0x985   :  { %2505 = vmatpush1.bf16.msra.mxu0 %v6221_v31  ;;  %2546 = vmatpush1.bf16.msra.mxu1 %v6224_v14  ;;  %v8049_v31 = vld [vmem:[#allocation72_spill] sm:$0xff]  ;;  %v8050_v14 = vld [vmem:[#allocation73_spill] sm:$0xff] }
 0x986   :  { %2506 = vmatprep.subr.bf16.mxu0 %v6227_v21  ;;  %2547 = vmatprep.subr.bf16.mxu1 %v6230_v48  ;;  %v8051_v21 = vld [vmem:[#allocation74_spill] sm:$0xff]  ;;  %v8052_v48 = vld [vmem:[#allocation75_spill] sm:$0xff] }
 0x989   :  { %2507 = vmatpush1.bf16.msra.mxu0 %v6233_v0  ;;  %2548 = vmatpush1.bf16.msra.mxu1 %v6236_v47  ;;  %v8053_v0 = vld [vmem:[#allocation77_spill] sm:$0xff]  ;;  %v8054_v47 = vld [vmem:[#allocation78_spill] sm:$0xff] }
 0x98a   :  { %2508 = vmatprep.subr.bf16.mxu0 %v7976_v38  ;;  %2549 = vmatprep.subr.bf16.mxu1 %v7977_v16  ;;  %v8056_v38 = vld [vmem:[#allocation80_spill] sm:$0xff]  ;;  %v8057_v16 = vld [vmem:[#allocation81_spill] sm:$0xff] }
 0x98d   :  { %2509 = vmatpush1.bf16.msra.mxu0 %v7978_v58  ;;  %2550 = vmatpush1.bf16.msra.mxu1 %v7979_v60  ;;  %v8058_v58 = vld [vmem:[#allocation82_spill] sm:$0xff]  ;;  %v8059_v60 = vld [vmem:[#allocation83_spill] sm:$0xff] }
 0x98e   :  { %2510 = vmatprep.subr.bf16.mxu0 %v8041_v51  ;;  %2551 = vmatprep.subr.bf16.mxu1 %v8042_v23  ;;  %v8087_v51 = vld [vmem:[#allocation100_spill] sm:$0xff] }
 0x991   :  { %2511 = vmatpush1.bf16.msra.mxu0 %v8043_v56  ;;  %2552 = vmatpush1.bf16.msra.mxu1 %v8044_v18  ;;  %v8088_v56 = vld [vmem:[#allocation101_spill] sm:$0xff] }
 0x992   :  { %2512 = vmatprep.subr.bf16.mxu0 %v8045_v43  ;;  %2553 = vmatprep.subr.bf16.mxu1 %v8046_v19 }
 0x995   :  { %2513 = vmatpush1.bf16.msra.mxu0 %v8047_v39  ;;  %2554 = vmatpush1.bf16.msra.mxu1 %v8048_v20  ;;  %v8089_v39 = vld [vmem:[#allocation102_spill] sm:$0xff] }
 0x996   :  { %2514 = vmatprep.subr.bf16.mxu0 %v8049_v31  ;;  %2555 = vmatprep.subr.bf16.mxu1 %v8050_v14  ;;  %v8090_v31 = vld [vmem:[#allocation103_spill] sm:$0xff] }
 0x999   :  { %2515 = vmatpush1.bf16.msra.mxu0 %v8051_v21  ;;  %2556 = vmatpush1.bf16.msra.mxu1 %v8052_v48 }
 0x99a   :  { %2611 = vmatprep.subr.bf16.mxu0 %v8053_v0  ;;  %2652 = vmatprep.subr.bf16.mxu1 %v8054_v47 }
 0x99c   :  { %2533 = vmatmul.mubr.bf16.vlgmr.msra.gmra.mrb[68].mxu0 %v6545_v24  ;;  %2574 = vmatmul.mubr.bf16.vlgmr.msra.gmra.mrb[68].mxu1 %v6545_v24  ;;  %v8063_v24 = vld [vmem:[#allocation87_spill] sm:$0xff] }
 0x99d   :  { %2612 = vmatpush1.bf16.msra.mxu0 %v8055_v8  ;;  %2653 = vmatpush1.bf16.msra.mxu1 %v8056_v38 }
 0x99e   :  { %2613 = vmatprep.subr.bf16.mxu0 %v8057_v16  ;;  %2654 = vmatprep.subr.bf16.mxu1 %v8058_v58 }
 0x99f   :  { %2643 = vmatprep.mubr.bf16.mxu0 %v7765_v59  ;;  %2684 = vmatprep.mubr.bf16.mxu1 %v7765_v59 }
 0x9a1   :  { %2614 = vmatpush1.bf16.msra.mxu0 %v8059_v60  ;;  %2655 = vmatpush1.bf16.msra.mxu1 %v8060_v1 }
 0x9a2   :  { %2615 = vmatprep.subr.bf16.mxu0 %v8061_v54  ;;  %2656 = vmatprep.subr.bf16.mxu1 %v8062_v57 }
 0x9a5   :  { %2616 = vmatpush1.bf16.msra.mxu0 %v8063_v24  ;;  %2657 = vmatpush1.bf16.msra.mxu1 %v8064_v55 }
 0x9a6   :  { %2617 = vmatprep.subr.bf16.mxu0 %v8065_v63  ;;  %2658 = vmatprep.subr.bf16.mxu1 %v8066_v6 }
 0x9a9   :  { %2618 = vmatpush1.bf16.msra.mxu0 %v8067_v13  ;;  %2659 = vmatpush1.bf16.msra.mxu1 %v8068_v29 }
 0x9aa   :  { %2619 = vmatprep.subr.bf16.mxu0 %v8069_v42  ;;  %2660 = vmatprep.subr.bf16.mxu1 %v8070_v25 }
 0x9ad   :  { %2620 = vmatpush1.bf16.msra.mxu0 %v8071_v22  ;;  %2661 = vmatpush1.bf16.msra.mxu1 %v8072_v50 }
 0x9ae   :  { %2621 = vmatprep.subr.bf16.mxu0 %v8073_v17  ;;  %2662 = vmatprep.subr.bf16.mxu1 %v8074_v62 }
 0x9b1   :  { %2622 = vmatpush1.bf16.msra.mxu0 %v8075_v41  ;;  %2663 = vmatpush1.bf16.msra.mxu1 %v8076_v61 }
 0x9b2   :  { %2623 = vmatprep.subr.bf16.mxu0 %v8077_v26  ;;  %2664 = vmatprep.subr.bf16.mxu1 %v8078_v44 }
 0x9b5   :  { %2624 = vmatpush1.bf16.msra.mxu0 %v8079_v2  ;;  %2665 = vmatpush1.bf16.msra.mxu1 %v8080_v10 }
 0x9b6   :  { %2625 = vmatprep.subr.bf16.mxu0 %v8081_v15  ;;  %2666 = vmatprep.subr.bf16.mxu1 %v8082_v33 }
 0x9b9   :  { %2626 = vmatpush1.bf16.msra.mxu0 %v8083_v12  ;;  %2667 = vmatpush1.bf16.msra.mxu1 %v8084_v52 }
 0x9ba   :  { %2724 = vmatprep.subr.bf16.mxu0 %v6667_v36  ;;  %2765 = vmatprep.subr.bf16.mxu1 %v6670_v32 }
 0xa4f   :  { %v6673_v53 = vpop.f32.mrb[64].mxu0  ;;  %v6675_v11 = vpop.f32.mrb[64].mxu1 }
 0xa50   :  { %v6677_v49 = vpop.f32.mrb[65].mxu0  ;;  %v6679_v28 = vpop.f32.mrb[65].mxu1 }
 0xa51   :  { %v2449_v37 = vpop.f32.mrb[66].mxu0  ;;  %v2490_v30 = vpop.f32.mrb[66].mxu1 }
 0xa52   :  { %v2450_v3 = vpop.f32.mrb[67].mxu0  ;;  %v2491_v34 = vpop.f32.mrb[67].mxu1 }
 0xa6f   :  { %v2534_v7 = vpop.f32.mrb[68].mxu0  ;;  %v2575_v45 = vpop.f32.mrb[68].mxu1 }
 0xa70   :  { %v2582_v23 = vadd.f32 %v2534_v7, %v8087_v51  ;;  %v2584_v18 = vadd.f32 %v2575_v45, %v8088_v56  ;;  %v2536_v43 = vpop.f32.mrb[69].mxu0  ;;  %v2577_v19 = vpop.f32.mrb[69].mxu1 }
 0xa71   :  { %v2583_v20 = vadd.f32 %v2536_v43, %v8089_v39  ;;  %v2585_v14 = vadd.f32 %v2577_v19, %v8090_v31  ;;  %v2538_v21 = vpop.f32.mrb[70].mxu0  ;;  %v2579_v48 = vpop.f32.mrb[70].mxu1 }
 0xa72   :  { %v4213_v35 = vmul.f32 -1.442695, %v2582_v23  ;;  %v2539_v32 = vpop.f32.mrb[71].mxu0  ;;  %v2580_v37 = vpop.f32.mrb[71].mxu1  ;;  %v6696_v21 = vld [vmem:[#allocation15 + $0x8] ss:$16 sps:$4 sm:$0xff]  }
 0xa73   :  { %v4214_v30 = vmul.f32 -1.442695, %v2583_v20  ;;  %v4215_v3 = vmul.f32 -1.442695, %v2585_v14  ;;  %v6702_v48 = vld [vmem:[#allocation15 + $0x2c] ss:$16 sps:$4 sm:$0xff]  }
 0xa74   :  { %4669 = vpow2.f32 %v4213_v35  ;;  %v6707_v37 = vld [vmem:[#allocation15 + $0x20] ss:$16 sps:$4 sm:$0xff]  }
 0xa75   :  { %4671 = vpow2.f32 %v4214_v30  ;;  %8091 = vst [vmem:[#allocation96_spill] sm:$0xff] %v6707_v37  ;;  %v6710_v30 = vld [vmem:[#allocation15 + $0x28] ss:$16 sps:$4 sm:$0xff]  }
 0xa76   :  { %4673 = vpow2.f32 %v4215_v3  ;;  %8092 = vst [vmem:[#allocation97_spill] sm:$0xff] %v6710_v30  ;;  %v6713_v3 = vld [vmem:[#allocation15 + $0x44] ss:$16 sps:$4 sm:$0xff]  }
 0xa77   :  { %4675 = vtanh.f32 %v2584_v18  ;;  %8093 = vst [vmem:[#allocation98_spill] sm:$0xff] %v6713_v3 }
 0xa7e   :  { %v4670_v34 = vpop.eup %4669 }
 0xa7f   :  { %v4672_v36 = vpop.eup %4671  ;;  %v2589_v7 = vadd.f32 1.0, %v4670_v34  ;;  %v6716_v34 = vld [vmem:[#allocation15 + $0x4c] ss:$16 sps:$4 sm:$0xff]  }
 0xa80   :  { %v2595_v45 = vadd.f32 1.0, %v4672_v36  ;;  %v4674_v51 = vpop.eup %4673  ;;  %v6693_v36 = vld [vmem:[#allocation15] ss:$16 sps:$4 sm:$0xff]   ;;  %8094 = vst [vmem:[#allocation99_spill] sm:$0xff] %v6716_v34 }
 0xa81   :  { %4677 = vrcp.f32 %v2589_v7  ;;  %v4676_v56 = vpop.eup %4675  ;;  %v2602_v23 = vadd.f32 1.0, %v4674_v51  ;;  %v6719_v7 = vld [vmem:[#allocation15 + $0x40] ss:$16 sps:$4 sm:$0xff]   ;;  %v6725_v51 = vld [vmem:[#allocation15 + $0x64] ss:$16 sps:$4 sm:$0xff]  }
 0xa82   :  { %4679 = vrcp.f32 %v2595_v45  ;;  %8095 = vst [vmem:[#allocation41_spill] sm:$0xff] %v6719_v7  ;;  %v6722_v45 = vld [vmem:[#allocation15 + $0x48] ss:$16 sps:$4 sm:$0xff]   ;;  %8097 = vst [vmem:[#allocation43_spill] sm:$0xff] %v6725_v51 }
 0xa83   :  { %4681 = vrcp.f32 %v2602_v23  ;;  %8096 = vst [vmem:[#allocation42_spill] sm:$0xff] %v6722_v45  ;;  %v6740_v23 = vld [vmem:[#allocation15 + $0x8c] ss:$16 sps:$4 sm:$0xff]  }
 0xa84   :  { %8102 = vst [vmem:[#allocation48_spill] sm:$0xff] %v6740_v23 }
 0xa8b   :  { %v4678_v43 = vpop.eup %4677 }
 0xa8c   :  { %v4680_v19 = vpop.eup %4679  ;;  %v2606_v39 = vmul.f32 %v4678_v43, %v4676_v56  ;;  %v6728_v56 = vld [vmem:[#allocation15 + $0x6c] ss:$16 sps:$4 sm:$0xff]   ;;  %v6731_v43 = vld [vmem:[#allocation15 + $0x60] ss:$16 sps:$4 sm:$0xff]  }
 0xa8d   :  { %v2605_v32 = vmul.f32 %v4680_v19, %v6542_v4  ;;  %v4682_v35 = vpop.eup %4681  ;;  %v6699_v4 = vld [vmem:[#allocation15 + $0x24] ss:$16 sps:$4 sm:$0xff]   ;;  %8098 = vst [vmem:[#allocation44_spill] sm:$0xff] %v6728_v56  ;;  %8099 = vst [vmem:[#allocation45_spill] sm:$0xff] %v6731_v43  ;;  %v6734_v19 = vld [vmem:[#allocation15 + $0x68] ss:$16 sps:$4 sm:$0xff]  }
 0xa8e   :  { %8100 = vst [vmem:[#allocation46_spill] sm:$0xff] %v6734_v19 }
 0xa8f   :  { %v6686_v20 = vadd.f32 %v2606_v39, %v2605_v32  ;;  %v6737_v39 = vld [vmem:[#allocation15 + $0x84] ss:$16 sps:$4 sm:$0xff]   ;;  %v6743_v32 = vld [vmem:[#allocation15 + $0x80] ss:$16 sps:$4 sm:$0xff]  }
 0xa90   :  { %8101 = vst [vmem:[#allocation47_spill] sm:$0xff] %v6737_v39  ;;  %8103 = vst [vmem:[#allocation49_spill] sm:$0xff] %v6743_v32 }
 0xa91   :  { %4683 = vtanh.f32 %v6686_v20 }
 0xa9b   :  { %v4684_v31 = vpop.eup %4683 }
 0xa9c   :  { %v2609_v14 = vmul.f32 %v4684_v31, %v4682_v35  ;;  %v6746_v35 = vld [vmem:[#allocation15 + $0x88] ss:$16 sps:$4 sm:$0xff]   ;;  %v6749_v31 = vld [vmem:[#allocation15 + $0xa4] ss:$16 sps:$4 sm:$0xff]  }
 0xa9d   :  { %8104 = vst [vmem:[#allocation50_spill] sm:$0xff] %v6746_v35  ;;  %8105 = vst [vmem:[#allocation51_spill] sm:$0xff] %v6749_v31 }
 0xa9e   :  { %v6689_v18 = vpack.c.bf16 %v2609_v14, %v2609_v14  ;;  %v6752_v14 = vld [vmem:[#allocation15 + $0xac] ss:$16 sps:$4 sm:$0xff]  }
 0xa9f   :  { %8106 = vst [vmem:[#allocation52_spill] sm:$0xff] %v6752_v14 }
 0xaa0   :  { %2644 = vmatmul.mubr.bf16.vlgmr.msra.gmra.mrb[72].mxu0 %v6689_v18  ;;  %2685 = vmatmul.mubr.bf16.vlgmr.msra.gmra.mrb[72].mxu1 %v6689_v18 }
 0xaa1   :  { %2725 = vmatpush1.bf16.msra.mxu0 %v6693_v36  ;;  %2766 = vmatpush1.bf16.msra.mxu1 %v6696_v21 }
 0xaa2   :  { %2726 = vmatprep.subr.bf16.mxu0 %v6699_v4  ;;  %2767 = vmatprep.subr.bf16.mxu1 %v6702_v48 }
 0xaa3   :  { %2756 = vmatprep.mubr.bf16.mxu0 %v7765_v59  ;;  %2797 = vmatprep.mubr.bf16.mxu1 %v7765_v59 }
 0xaa5   :  { %2727 = vmatpush1.bf16.msra.mxu0 %v6707_v37  ;;  %2768 = vmatpush1.bf16.msra.mxu1 %v6710_v30 }
 0xaa6   :  { %2728 = vmatprep.subr.bf16.mxu0 %v6713_v3  ;;  %2769 = vmatprep.subr.bf16.mxu1 %v6716_v34 }
 0xaa9   :  { %2729 = vmatpush1.bf16.msra.mxu0 %v6719_v7  ;;  %2770 = vmatpush1.bf16.msra.mxu1 %v6722_v45 }
 0xaaa   :  { %2730 = vmatprep.subr.bf16.mxu0 %v6725_v51  ;;  %2771 = vmatprep.subr.bf16.mxu1 %v6728_v56 }
 0xaad   :  { %2731 = vmatpush1.bf16.msra.mxu0 %v6731_v43  ;;  %2772 = vmatpush1.bf16.msra.mxu1 %v6734_v19 }
 0xaae   :  { %2732 = vmatprep.subr.bf16.mxu0 %v6737_v39  ;;  %2773 = vmatprep.subr.bf16.mxu1 %v6740_v23  ;;  %v6755_v39 = vld [vmem:[#allocation15 + $0xa0] ss:$16 sps:$4 sm:$0xff]   ;;  %v6758_v23 = vld [vmem:[#allocation15 + $0xa8] ss:$16 sps:$4 sm:$0xff]  }
 0xaaf   :  { %8107 = vst [vmem:[#allocation53_spill] sm:$0xff] %v6755_v39  ;;  %8108 = vst [vmem:[#allocation54_spill] sm:$0xff] %v6758_v23 }
 0xab1   :  { %2733 = vmatpush1.bf16.msra.mxu0 %v6743_v32  ;;  %2774 = vmatpush1.bf16.msra.mxu1 %v6746_v35  ;;  %v6761_v32 = vld [vmem:[#allocation15 + $0xc4] ss:$16 sps:$4 sm:$0xff]   ;;  %v6764_v35 = vld [vmem:[#allocation15 + $0xcc] ss:$16 sps:$4 sm:$0xff]  }
 0xab2   :  { %2734 = vmatprep.subr.bf16.mxu0 %v6749_v31  ;;  %2775 = vmatprep.subr.bf16.mxu1 %v6752_v14  ;;  %8109 = vst [vmem:[#allocation55_spill] sm:$0xff] %v6761_v32  ;;  %8110 = vst [vmem:[#allocation56_spill] sm:$0xff] %v6764_v35  ;;  %v6767_v31 = vld [vmem:[#allocation15 + $0xc0] ss:$16 sps:$4 sm:$0xff]   ;;  %v6770_v14 = vld [vmem:[#allocation15 + $0xc8] ss:$16 sps:$4 sm:$0xff]  }
 0xab3   :  { %8111 = vst [vmem:[#allocation57_spill] sm:$0xff] %v6767_v31  ;;  %8112 = vst [vmem:[#allocation58_spill] sm:$0xff] %v6770_v14 }
 0xab5   :  { %2735 = vmatpush1.bf16.msra.mxu0 %v6755_v39  ;;  %2776 = vmatpush1.bf16.msra.mxu1 %v6758_v23  ;;  %v6773_v39 = vld [vmem:[#allocation15 + $0xe4] ss:$16 sps:$4 sm:$0xff]   ;;  %v6776_v23 = vld [vmem:[#allocation15 + $0xec] ss:$16 sps:$4 sm:$0xff]  }
 0xab6   :  { %2736 = vmatprep.subr.bf16.mxu0 %v6761_v32  ;;  %2777 = vmatprep.subr.bf16.mxu1 %v6764_v35  ;;  %8113 = vst [vmem:[#allocation64_spill] sm:$0xff] %v6773_v39  ;;  %8114 = vst [vmem:[#allocation65_spill] sm:$0xff] %v6776_v23  ;;  %v6779_v32 = vld [vmem:[#allocation15 + $0xe0] ss:$16 sps:$4 sm:$0xff]   ;;  %v6782_v35 = vld [vmem:[#allocation15 + $0xe8] ss:$16 sps:$4 sm:$0xff]  }
 0xab7   :  { %8115 = vst [vmem:[#allocation66_spill] sm:$0xff] %v6779_v32  ;;  %8116 = vst [vmem:[#allocation67_spill] sm:$0xff] %v6782_v35 }
 0xab9   :  { %2737 = vmatpush1.bf16.msra.mxu0 %v6767_v31  ;;  %2778 = vmatpush1.bf16.msra.mxu1 %v6770_v14  ;;  %v6785_v31 = vld [vmem:[#allocation12 + $0x4] ss:$16 sps:$4 sm:$0xff]   ;;  %v6788_v14 = vld [vmem:[#allocation12 + $0xc] ss:$16 sps:$4 sm:$0xff]  }
 0xaba   :  { %2738 = vmatprep.subr.bf16.mxu0 %v6773_v39  ;;  %2779 = vmatprep.subr.bf16.mxu1 %v6776_v23  ;;  %8117 = vst [vmem:[#allocation68_spill] sm:$0xff] %v6785_v31  ;;  %8118 = vst [vmem:[#allocation69_spill] sm:$0xff] %v6788_v14 }
 0xabd   :  { %2739 = vmatpush1.bf16.msra.mxu0 %v6779_v32  ;;  %2780 = vmatpush1.bf16.msra.mxu1 %v6782_v35 }
 0xabe   :  { %2813 = vmatprep.subr.bf16.mxu0 %v6785_v31  ;;  %2854 = vmatprep.subr.bf16.mxu1 %v6788_v14 }
 0xb73   :  { %v2645_v39 = vpop.f32.mrb[72].mxu0  ;;  %v2686_v19 = vpop.f32.mrb[72].mxu1 }
 0xb74   :  { %v2646_v23 = vadd.f32 %v2645_v39, %v6673_v53  ;;  %v2687_v43 = vadd.f32 %v2686_v19, %v6675_v11  ;;  %v2647_v56 = vpop.f32.mrb[73].mxu0  ;;  %v2688_v32 = vpop.f32.mrb[73].mxu1 }
 0xb75   :  { %v2648_v51 = vadd.f32 %v2647_v56, %v6677_v49  ;;  %v2689_v35 = vadd.f32 %v2688_v32, %v6679_v28  ;;  %v2649_v45 = vpop.f32.mrb[74].mxu0  ;;  %v2690_v7 = vpop.f32.mrb[74].mxu1 }
 0xb76   :  { %v2693_v31 = vadd.f32 %v2646_v23, %v5958_v40  ;;  %v2650_v34 = vpop.f32.mrb[75].mxu0  ;;  %v2691_v3 = vpop.f32.mrb[75].mxu1  ;;  %v2695_v19 = vadd.f32 %v2687_v43, %v5977_v9 }
 0xb77   :  { %v2694_v14 = vadd.f32 %v2648_v51, %v5962_v46  ;;  %v2696_v53 = vadd.f32 %v2689_v35, %v5972_v5 }
 0xb78   :  { %v4216_v30 = vmul.f32 -1.442695, %v2693_v31 }
 0xb79   :  { %v4217_v37 = vmul.f32 -1.442695, %v2694_v14  ;;  %v4218_v11 = vmul.f32 -1.442695, %v2696_v53  ;;  %v6807_v14 = vld [vmem:[#allocation12] ss:$16 sps:$4 sm:$0xff]  }
 0xb7a   :  { %4685 = vpow2.f32 %v4216_v30  ;;  %v6810_v53 = vld [vmem:[#allocation12 + $0x8] ss:$16 sps:$4 sm:$0xff]  }
 0xb7b   :  { %4687 = vpow2.f32 %v4217_v37 }
 0xb7c   :  { %4689 = vpow2.f32 %v4218_v11  ;;  %v6816_v11 = vld [vmem:[#allocation12 + $0x2c] ss:$16 sps:$4 sm:$0xff]  }
 0xb7d   :  { %4691 = vtanh.f32 %v2695_v19  ;;  %v6821_v19 = vld [vmem:[#allocation12 + $0x20] ss:$16 sps:$4 sm:$0xff]  }
 0xb84   :  { %v4686_v49 = vpop.eup %4685 }
 0xb85   :  { %v4688_v56 = vpop.eup %4687  ;;  %v2700_v28 = vadd.f32 1.0, %v4686_v49  ;;  %v6824_v49 = vld [vmem:[#allocation12 + $0x28] ss:$16 sps:$4 sm:$0xff]  }
 0xb86   :  { %v2706_v7 = vadd.f32 1.0, %v4688_v56  ;;  %v4690_v3 = vpop.eup %4689  ;;  %v6827_v56 = vld [vmem:[#allocation12 + $0x44] ss:$16 sps:$4 sm:$0xff]  }
 0xb87   :  { %4693 = vrcp.f32 %v2700_v28  ;;  %v4692_v34 = vpop.eup %4691  ;;  %v2713_v30 = vadd.f32 1.0, %v4690_v3  ;;  %v6830_v28 = vld [vmem:[#allocation12 + $0x4c] ss:$16 sps:$4 sm:$0xff]   ;;  %v6836_v3 = vld [vmem:[#allocation12 + $0x48] ss:$16 sps:$4 sm:$0xff]  }
 0xb88   :  { %4695 = vrcp.f32 %v2706_v7  ;;  %v6833_v7 = vld [vmem:[#allocation12 + $0x40] ss:$16 sps:$4 sm:$0xff]  }
 0xb89   :  { %4697 = vrcp.f32 %v2713_v30  ;;  %v6851_v30 = vld [vmem:[#allocation12 + $0x84] ss:$16 sps:$4 sm:$0xff]  }
 0xb8a   :  { %8120 = vst [vmem:[#allocation71_spill] sm:$0xff] %v6851_v30 }
 0xb91   :  { %v4694_v45 = vpop.eup %4693 }
 0xb92   :  { %v4696_v51 = vpop.eup %4695  ;;  %v2717_v39 = vmul.f32 %v4694_v45, %v4692_v34  ;;  %v6839_v34 = vld [vmem:[#allocation12 + $0x64] ss:$16 sps:$4 sm:$0xff]   ;;  %v6842_v45 = vld [vmem:[#allocation12 + $0x6c] ss:$16 sps:$4 sm:$0xff]  }
 0xb93   :  { %v2716_v37 = vmul.f32 %v4696_v51, %v6592_v27  ;;  %v4698_v43 = vpop.eup %4697  ;;  %v6813_v27 = vld [vmem:[#allocation12 + $0x24] ss:$16 sps:$4 sm:$0xff]   ;;  %v6845_v51 = vld [vmem:[#allocation12 + $0x60] ss:$16 sps:$4 sm:$0xff]  }
 0xb95   :  { %v6800_v23 = vadd.f32 %v2717_v39, %v2716_v37  ;;  %v6848_v39 = vld [vmem:[#allocation12 + $0x68] ss:$16 sps:$4 sm:$0xff]   ;;  %v6854_v37 = vld [vmem:[#allocation12 + $0x8c] ss:$16 sps:$4 sm:$0xff]  }
 0xb96   :  { %8121 = vst [vmem:[#allocation72_spill] sm:$0xff] %v6854_v37 }
 0xb97   :  { %4699 = vtanh.f32 %v6800_v23 }
 0xba1   :  { %v4700_v32 = vpop.eup %4699 }
 0xba2   :  { %v6803_v35 = vmul.f32 %v4700_v32, %v4698_v43  ;;  %v6857_v43 = vld [vmem:[#allocation12 + $0x80] ss:$16 sps:$4 sm:$0xff]   ;;  %v6860_v32 = vld [vmem:[#allocation12 + $0x88] ss:$16 sps:$4 sm:$0xff]  }
 0xba3   :  { %8122 = vst [vmem:[#allocation73_spill] sm:$0xff] %v6857_v43  ;;  %8123 = vst [vmem:[#allocation74_spill] sm:$0xff] %v6860_v32 }
 0xba4   :  { %8119 = vst [vmem:[#allocation70_spill] sm:$0xff] %v6803_v35  ;;  %v2723_v31 = vpack.c.bf16 %v6803_v35, %v6803_v35  ;;  %v6866_v35 = vld [vmem:[#allocation12 + $0xac] ss:$16 sps:$4 sm:$0xff]  }
 0xba5   :  { %8125 = vst [vmem:[#allocation77_spill] sm:$0xff] %v6866_v35 }
 0xba6   :  { %2757 = vmatmul.mubr.bf16.vlgmr.msra.gmra.mrb[76].mxu0 %v2723_v31  ;;  %2798 = vmatmul.mubr.bf16.vlgmr.msra.gmra.mrb[76].mxu1 %v2723_v31  ;;  %v6863_v31 = vld [vmem:[#allocation12 + $0xa4] ss:$16 sps:$4 sm:$0xff]  }
 0xba7   :  { %2814 = vmatpush1.bf16.msra.mxu0 %v6807_v14  ;;  %2855 = vmatpush1.bf16.msra.mxu1 %v6810_v53  ;;  %8124 = vst [vmem:[#allocation75_spill] sm:$0xff] %v6863_v31 }
 0xba8   :  { %2815 = vmatprep.subr.bf16.mxu0 %v6813_v27  ;;  %2856 = vmatprep.subr.bf16.mxu1 %v6816_v11 }
 0xba9   :  { %2845 = vmatprep.mubr.bf16.mxu0 %v7765_v59  ;;  %2886 = vmatprep.mubr.bf16.mxu1 %v7765_v59 }
 0xbab   :  { %2816 = vmatpush1.bf16.msra.mxu0 %v6821_v19  ;;  %2857 = vmatpush1.bf16.msra.mxu1 %v6824_v49 }
 0xbac   :  { %2817 = vmatprep.subr.bf16.mxu0 %v6827_v56  ;;  %2858 = vmatprep.subr.bf16.mxu1 %v6830_v28 }
 0xbaf   :  { %2818 = vmatpush1.bf16.msra.mxu0 %v6833_v7  ;;  %2859 = vmatpush1.bf16.msra.mxu1 %v6836_v3 }
 0xbb0   :  { %2819 = vmatprep.subr.bf16.mxu0 %v6839_v34  ;;  %2860 = vmatprep.subr.bf16.mxu1 %v6842_v45 }
 0xbb3   :  { %2820 = vmatpush1.bf16.msra.mxu0 %v6845_v51  ;;  %2861 = vmatpush1.bf16.msra.mxu1 %v6848_v39 }
 0xbb4   :  { %2821 = vmatprep.subr.bf16.mxu0 %v6851_v30  ;;  %2862 = vmatprep.subr.bf16.mxu1 %v6854_v37  ;;  %v6869_v30 = vld [vmem:[#allocation12 + $0xa0] ss:$16 sps:$4 sm:$0xff]   ;;  %v6872_v37 = vld [vmem:[#allocation12 + $0xa8] ss:$16 sps:$4 sm:$0xff]  }
 0xbb5   :  { %8126 = vst [vmem:[#allocation78_spill] sm:$0xff] %v6869_v30  ;;  %8127 = vst [vmem:[#allocation79_spill] sm:$0xff] %v6872_v37 }
 0xbb7   :  { %2822 = vmatpush1.bf16.msra.mxu0 %v6857_v43  ;;  %2863 = vmatpush1.bf16.msra.mxu1 %v6860_v32  ;;  %v6875_v43 = vld [vmem:[#allocation12 + $0xc4] ss:$16 sps:$4 sm:$0xff]   ;;  %v6878_v32 = vld [vmem:[#allocation12 + $0xcc] ss:$16 sps:$4 sm:$0xff]  }
 0xbb8   :  { %2823 = vmatprep.subr.bf16.mxu0 %v6863_v31  ;;  %2864 = vmatprep.subr.bf16.mxu1 %v6866_v35  ;;  %8128 = vst [vmem:[#allocation80_spill] sm:$0xff] %v6875_v43  ;;  %8129 = vst [vmem:[#allocation81_spill] sm:$0xff] %v6878_v32  ;;  %v6881_v31 = vld [vmem:[#allocation12 + $0xc0] ss:$16 sps:$4 sm:$0xff]   ;;  %v6884_v35 = vld [vmem:[#allocation12 + $0xc8] ss:$16 sps:$4 sm:$0xff]  }
 0xbb9   :  { %8130 = vst [vmem:[#allocation82_spill] sm:$0xff] %v6881_v31  ;;  %8131 = vst [vmem:[#allocation83_spill] sm:$0xff] %v6884_v35 }
 0xbbb   :  { %2824 = vmatpush1.bf16.msra.mxu0 %v6869_v30  ;;  %2865 = vmatpush1.bf16.msra.mxu1 %v6872_v37  ;;  %v6887_v30 = vld [vmem:[#allocation12 + $0xe4] ss:$16 sps:$4 sm:$0xff]   ;;  %v6890_v37 = vld [vmem:[#allocation12 + $0xec] ss:$16 sps:$4 sm:$0xff]  }
 0xbbc   :  { %2825 = vmatprep.subr.bf16.mxu0 %v6875_v43  ;;  %2866 = vmatprep.subr.bf16.mxu1 %v6878_v32  ;;  %8132 = vst [vmem:[#allocation84_spill] sm:$0xff] %v6887_v30  ;;  %8133 = vst [vmem:[#allocation85_spill] sm:$0xff] %v6890_v37  ;;  %v6893_v43 = vld [vmem:[#allocation12 + $0xe0] ss:$16 sps:$4 sm:$0xff]   ;;  %v6896_v32 = vld [vmem:[#allocation12 + $0xe8] ss:$16 sps:$4 sm:$0xff]  }
 0xbbd   :  { %8134 = vst [vmem:[#allocation86_spill] sm:$0xff] %v6893_v43  ;;  %8135 = vst [vmem:[#allocation87_spill] sm:$0xff] %v6896_v32 }
 0xbbf   :  { %2826 = vmatpush1.bf16.msra.mxu0 %v6881_v31  ;;  %2867 = vmatpush1.bf16.msra.mxu1 %v6884_v35 }
 0xbc0   :  { %2827 = vmatprep.subr.bf16.mxu0 %v6887_v30  ;;  %2868 = vmatprep.subr.bf16.mxu1 %v6890_v37 }
 0xbc3   :  { %2828 = vmatpush1.bf16.msra.mxu0 %v6893_v43  ;;  %2869 = vmatpush1.bf16.msra.mxu1 %v6896_v32 }
 0xbc4   :  { %2924 = vmatprep.subr.bf16.mxu0 %v8053_v0  ;;  %2965 = vmatprep.subr.bf16.mxu1 %v8054_v47  ;;  %v8136_v0 = vld [vmem:[#allocation62_spill] sm:$0xff]  ;;  %v8137_v47 = vld [vmem:[#allocation63_spill] sm:$0xff] }
 0xbc6   :  { %2846 = vmatmul.mubr.bf16.vlgmr.msra.gmra.mrb[80].mxu0 %v6689_v18  ;;  %2887 = vmatmul.mubr.bf16.vlgmr.msra.gmra.mrb[80].mxu1 %v6689_v18 }
 0xbc7   :  { %2925 = vmatpush1.bf16.msra.mxu0 %v8055_v8  ;;  %2966 = vmatpush1.bf16.msra.mxu1 %v8056_v38 }
 0xbc8   :  { %2926 = vmatprep.subr.bf16.mxu0 %v8057_v16  ;;  %2967 = vmatprep.subr.bf16.mxu1 %v8058_v58 }
 0xbc9   :  { %2956 = vmatprep.mubr.bf16.mxu0 %v7765_v59  ;;  %2997 = vmatprep.mubr.bf16.mxu1 %v7765_v59 }
 0xbcb   :  { %2927 = vmatpush1.bf16.msra.mxu0 %v8059_v60  ;;  %2968 = vmatpush1.bf16.msra.mxu1 %v8060_v1 }
 0xbcc   :  { %2928 = vmatprep.subr.bf16.mxu0 %v8061_v54  ;;  %2969 = vmatprep.subr.bf16.mxu1 %v8062_v57 }
 0xbcf   :  { %2929 = vmatpush1.bf16.msra.mxu0 %v8063_v24  ;;  %2970 = vmatpush1.bf16.msra.mxu1 %v8064_v55 }
 0xbd0   :  { %2930 = vmatprep.subr.bf16.mxu0 %v8065_v63  ;;  %2971 = vmatprep.subr.bf16.mxu1 %v8066_v6  ;;  %v8138_v63 = vld [vmem:[#allocation104_spill] sm:$0xff] }
 0xbd3   :  { %2931 = vmatpush1.bf16.msra.mxu0 %v8067_v13  ;;  %2972 = vmatpush1.bf16.msra.mxu1 %v8068_v29  ;;  %v8139_v13 = vld [vmem:[#allocation105_spill] sm:$0xff] }
 0xbd4   :  { %2932 = vmatprep.subr.bf16.mxu0 %v8069_v42  ;;  %2973 = vmatprep.subr.bf16.mxu1 %v8070_v25 }
 0xbd7   :  { %2933 = vmatpush1.bf16.msra.mxu0 %v8071_v22  ;;  %2974 = vmatpush1.bf16.msra.mxu1 %v8072_v50  ;;  %v8140_v22 = vld [vmem:[#allocation106_spill] sm:$0xff] }
 0xbd8   :  { %2934 = vmatprep.subr.bf16.mxu0 %v8073_v17  ;;  %2975 = vmatprep.subr.bf16.mxu1 %v8074_v62  ;;  %v8141_v17 = vld [vmem:[#allocation107_spill] sm:$0xff] }
 0xbdb   :  { %2935 = vmatpush1.bf16.msra.mxu0 %v8075_v41  ;;  %2976 = vmatpush1.bf16.msra.mxu1 %v8076_v61 }
 0xbdc   :  { %2936 = vmatprep.subr.bf16.mxu0 %v8077_v26  ;;  %2977 = vmatprep.subr.bf16.mxu1 %v8078_v44 }
 0xbdf   :  { %2937 = vmatpush1.bf16.msra.mxu0 %v8079_v2  ;;  %2978 = vmatpush1.bf16.msra.mxu1 %v8080_v10 }
 0xbe0   :  { %2938 = vmatprep.subr.bf16.mxu0 %v8081_v15  ;;  %2979 = vmatprep.subr.bf16.mxu1 %v8082_v33 }
 0xbe3   :  { %2939 = vmatpush1.bf16.msra.mxu0 %v8083_v12  ;;  %2980 = vmatpush1.bf16.msra.mxu1 %v8084_v52 }
 0xbe4   :  { %3037 = vmatprep.subr.bf16.mxu0 %v8136_v0  ;;  %3078 = vmatprep.subr.bf16.mxu1 %v8137_v47 }
 0xc79   :  { %v6937_v8 = vpop.f32.mrb[76].mxu0  ;;  %v6939_v38 = vpop.f32.mrb[76].mxu1 }
 0xc7a   :  { %v6941_v16 = vpop.f32.mrb[77].mxu0  ;;  %v6943_v58 = vpop.f32.mrb[77].mxu1 }
 0xc7b   :  { %v2762_v60 = vpop.f32.mrb[78].mxu0  ;;  %v2803_v1 = vpop.f32.mrb[78].mxu1 }
 0xc7c   :  { %v2763_v54 = vpop.f32.mrb[79].mxu0  ;;  %v2804_v57 = vpop.f32.mrb[79].mxu1 }
 0xc99   :  { %v2847_v24 = vpop.f32.mrb[80].mxu0  ;;  %v2888_v55 = vpop.f32.mrb[80].mxu1 }
 0xc9a   :  { %v2895_v6 = vadd.f32 %v2847_v24, %v8138_v63  ;;  %v2897_v29 = vadd.f32 %v2888_v55, %v8139_v13  ;;  %v2849_v42 = vpop.f32.mrb[81].mxu0  ;;  %v2890_v25 = vpop.f32.mrb[81].mxu1 }
 0xc9b   :  { %v2896_v50 = vadd.f32 %v2849_v42, %v8140_v22  ;;  %v2898_v62 = vadd.f32 %v2890_v25, %v8141_v17  ;;  %v2851_v41 = vpop.f32.mrb[82].mxu0  ;;  %v2892_v61 = vpop.f32.mrb[82].mxu1  ;;  %v8143_v22 = vld [vmem:[#allocation97_spill] sm:$0xff]  ;;  %v8145_v17 = vld [vmem:[#allocation99_spill] sm:$0xff] }
 0xc9c   :  { %v4219_v26 = vmul.f32 -1.442695, %v2895_v6  ;;  %v2852_v44 = vpop.f32.mrb[83].mxu0  ;;  %v2893_v2 = vpop.f32.mrb[83].mxu1  ;;  %v8147_v41 = vld [vmem:[#allocation42_spill] sm:$0xff]  ;;  %v8148_v61 = vld [vmem:[#allocation43_spill] sm:$0xff] }
 0xc9d   :  { %v4220_v10 = vmul.f32 -1.442695, %v2896_v50  ;;  %v4221_v15 = vmul.f32 -1.442695, %v2898_v62  ;;  %v8144_v50 = vld [vmem:[#allocation98_spill] sm:$0xff]  ;;  %v8146_v62 = vld [vmem:[#allocation41_spill] sm:$0xff] }
 0xc9e   :  { %4701 = vpow2.f32 %v4219_v26  ;;  %v8149_v26 = vld [vmem:[#allocation44_spill] sm:$0xff]  ;;  %v8150_v44 = vld [vmem:[#allocation45_spill] sm:$0xff]  ;;  %v8151_v2 = vld [vmem:[#allocation46_spill] sm:$0xff] }
 0xc9f   :  { %4703 = vpow2.f32 %v4220_v10  ;;  %v8152_v10 = vld [vmem:[#allocation47_spill] sm:$0xff] }
 0xca0   :  { %4705 = vpow2.f32 %v4221_v15  ;;  %v8153_v15 = vld [vmem:[#allocation48_spill] sm:$0xff] }
 0xca1   :  { %4707 = vtanh.f32 %v2897_v29 }
 0xca8   :  { %v4702_v33 = vpop.eup %4701 }
 0xca9   :  { %v4704_v12 = vpop.eup %4703  ;;  %v2902_v52 = vadd.f32 1.0, %v4702_v33  ;;  %v8154_v33 = vld [vmem:[#allocation49_spill] sm:$0xff] }
 0xcaa   :  { %v2908_v18 = vadd.f32 1.0, %v4704_v12  ;;  %v4706_v60 = vpop.eup %4705  ;;  %v8155_v12 = vld [vmem:[#allocation50_spill] sm:$0xff] }
 0xcab   :  { %4709 = vrcp.f32 %v2902_v52  ;;  %v4708_v1 = vpop.eup %4707  ;;  %v2915_v55 = vadd.f32 1.0, %v4706_v60  ;;  %v8156_v52 = vld [vmem:[#allocation51_spill] sm:$0xff]  ;;  %v8158_v60 = vld [vmem:[#allocation53_spill] sm:$0xff] }
 0xcac   :  { %4711 = vrcp.f32 %v2908_v18  ;;  %v8157_v18 = vld [vmem:[#allocation52_spill] sm:$0xff] }
 0xcad   :  { %4713 = vrcp.f32 %v2915_v55  ;;  %v8163_v55 = vld [vmem:[#allocation58_spill] sm:$0xff] }
 0xcb5   :  { %v4710_v54 = vpop.eup %4709 }
 0xcb6   :  { %v4712_v57 = vpop.eup %4711  ;;  %v2919_v24 = vmul.f32 %v4710_v54, %v4708_v1  ;;  %v8159_v1 = vld [vmem:[#allocation54_spill] sm:$0xff]  ;;  %v8160_v54 = vld [vmem:[#allocation55_spill] sm:$0xff] }
 0xcb7   :  { %v2918_v63 = vmul.f32 %v4712_v57, %v6686_v20  ;;  %v4714_v13 = vpop.eup %4713  ;;  %v8142_v20 = vld [vmem:[#allocation96_spill] sm:$0xff] }
 0xcb8   :  { %v8161_v57 = vld [vmem:[#allocation56_spill] sm:$0xff] }
 0xcb9   :  { %v6950_v6 = vadd.f32 %v2919_v24, %v2918_v63  ;;  %v8162_v24 = vld [vmem:[#allocation57_spill] sm:$0xff]  ;;  %v8164_v63 = vld [vmem:[#allocation64_spill] sm:$0xff] }
 0xcbb   :  { %4715 = vtanh.f32 %v6950_v6 }
 0xcc5   :  { %v4716_v42 = vpop.eup %4715 }
 0xcc6   :  { %v2922_v25 = vmul.f32 %v4716_v42, %v4714_v13  ;;  %v8165_v13 = vld [vmem:[#allocation65_spill] sm:$0xff]  ;;  %v8166_v42 = vld [vmem:[#allocation66_spill] sm:$0xff] }
 0xcc8   :  { %v6953_v29 = vpack.c.bf16 %v2922_v25, %v2922_v25  ;;  %v8167_v25 = vld [vmem:[#allocation67_spill] sm:$0xff] }
 0xcca   :  { %2957 = vmatmul.mubr.bf16.vlgmr.msra.gmra.mrb[84].mxu0 %v6953_v29  ;;  %2998 = vmatmul.mubr.bf16.vlgmr.msra.gmra.mrb[84].mxu1 %v6953_v29 }
 0xccb   :  { %3038 = vmatpush1.bf16.msra.mxu0 %v6693_v36  ;;  %3079 = vmatpush1.bf16.msra.mxu1 %v6696_v21 }
 0xccc   :  { %3039 = vmatprep.subr.bf16.mxu0 %v6699_v4  ;;  %3080 = vmatprep.subr.bf16.mxu1 %v6702_v48 }
 0xccd   :  { %3069 = vmatprep.mubr.bf16.mxu0 %v7765_v59  ;;  %3110 = vmatprep.mubr.bf16.mxu1 %v7765_v59 }
 0xccf   :  { %3040 = vmatpush1.bf16.msra.mxu0 %v8142_v20  ;;  %3081 = vmatpush1.bf16.msra.mxu1 %v8143_v22 }
 0xcd0   :  { %3041 = vmatprep.subr.bf16.mxu0 %v8144_v50  ;;  %3082 = vmatprep.subr.bf16.mxu1 %v8145_v17 }
 0xcd3   :  { %3042 = vmatpush1.bf16.msra.mxu0 %v8146_v62  ;;  %3083 = vmatpush1.bf16.msra.mxu1 %v8147_v41 }
 0xcd4   :  { %3043 = vmatprep.subr.bf16.mxu0 %v8148_v61  ;;  %3084 = vmatprep.subr.bf16.mxu1 %v8149_v26 }
 0xcd7   :  { %3044 = vmatpush1.bf16.msra.mxu0 %v8150_v44  ;;  %3085 = vmatpush1.bf16.msra.mxu1 %v8151_v2 }
 0xcd8   :  { %3045 = vmatprep.subr.bf16.mxu0 %v8152_v10  ;;  %3086 = vmatprep.subr.bf16.mxu1 %v8153_v15 }
 0xcdb   :  { %3046 = vmatpush1.bf16.msra.mxu0 %v8154_v33  ;;  %3087 = vmatpush1.bf16.msra.mxu1 %v8155_v12 }
 0xcdc   :  { %3047 = vmatprep.subr.bf16.mxu0 %v8156_v52  ;;  %3088 = vmatprep.subr.bf16.mxu1 %v8157_v18  ;;  %v8168_v18 = vld [vmem:[#allocation68_spill] sm:$0xff] }
 0xcdf   :  { %3048 = vmatpush1.bf16.msra.mxu0 %v8158_v60  ;;  %3089 = vmatpush1.bf16.msra.mxu1 %v8159_v1  ;;  %v8169_v60 = vld [vmem:[#allocation69_spill] sm:$0xff] }
 0xce0   :  { %3049 = vmatprep.subr.bf16.mxu0 %v8160_v54  ;;  %3090 = vmatprep.subr.bf16.mxu1 %v8161_v57 }
 0xce3   :  { %3050 = vmatpush1.bf16.msra.mxu0 %v8162_v24  ;;  %3091 = vmatpush1.bf16.msra.mxu1 %v8163_v55 }
 0xce4   :  { %3051 = vmatprep.subr.bf16.mxu0 %v8164_v63  ;;  %3092 = vmatprep.subr.bf16.mxu1 %v8165_v13 }
 0xce7   :  { %3052 = vmatpush1.bf16.msra.mxu0 %v8166_v42  ;;  %3093 = vmatpush1.bf16.msra.mxu1 %v8167_v25 }
 0xce8   :  { %3126 = vmatprep.subr.bf16.mxu0 %v8168_v18  ;;  %3167 = vmatprep.subr.bf16.mxu1 %v8169_v60 }
 0xd9d   :  { %v2958_v1 = vpop.f32.mrb[84].mxu0  ;;  %v2999_v54 = vpop.f32.mrb[84].mxu1 }
 0xd9e   :  { %v2959_v57 = vadd.f32 %v2958_v1, %v6937_v8  ;;  %v3000_v24 = vadd.f32 %v2999_v54, %v6939_v38  ;;  %v2960_v52 = vpop.f32.mrb[85].mxu0  ;;  %v3001_v55 = vpop.f32.mrb[85].mxu1 }
 0xd9f   :  { %v2961_v63 = vadd.f32 %v2960_v52, %v6941_v16  ;;  %v3002_v13 = vadd.f32 %v3001_v55, %v6943_v58  ;;  %v2962_v12 = vpop.f32.mrb[86].mxu0  ;;  %v3003_v42 = vpop.f32.mrb[86].mxu1 }
 0xda0   :  { %v3006_v25 = vadd.f32 %v2959_v57, %v5958_v40  ;;  %v2963_v33 = vpop.f32.mrb[87].mxu0  ;;  %v3004_v18 = vpop.f32.mrb[87].mxu1  ;;  %v3008_v1 = vadd.f32 %v3000_v24, %v5977_v9 }
 0xda1   :  { %v3007_v60 = vadd.f32 %v2961_v63, %v5962_v46  ;;  %v3009_v8 = vadd.f32 %v3002_v13, %v5972_v5 }
 0xda2   :  { %v4222_v15 = vmul.f32 -1.442695, %v3006_v25  ;;  %v8172_v25 = vld [vmem:[#allocation72_spill] sm:$0xff] }
 0xda3   :  { %v4223_v10 = vmul.f32 -1.442695, %v3007_v60  ;;  %v4224_v38 = vmul.f32 -1.442695, %v3009_v8  ;;  %v8173_v8 = vld [vmem:[#allocation73_spill] sm:$0xff] }
 0xda4   :  { %4717 = vpow2.f32 %v4222_v15 }
 0xda5   :  { %4719 = vpow2.f32 %v4223_v10 }
 0xda6   :  { %4721 = vpow2.f32 %v4224_v38  ;;  %v8174_v38 = vld [vmem:[#allocation74_spill] sm:$0xff] }
 0xda7   :  { %4723 = vtanh.f32 %v3008_v1  ;;  %v8175_v1 = vld [vmem:[#allocation75_spill] sm:$0xff] }
 0xdae   :  { %v4718_v16 = vpop.eup %4717 }
 0xdaf   :  { %v4720_v52 = vpop.eup %4719  ;;  %v3013_v58 = vadd.f32 1.0, %v4718_v16  ;;  %v8176_v16 = vld [vmem:[#allocation77_spill] sm:$0xff] }
 0xdb0   :  { %v3019_v12 = vadd.f32 1.0, %v4720_v52  ;;  %v4722_v33 = vpop.eup %4721  ;;  %v8177_v52 = vld [vmem:[#allocation78_spill] sm:$0xff] }
 0xdb1   :  { %4725 = vrcp.f32 %v3013_v58  ;;  %v4724_v18 = vpop.eup %4723  ;;  %v3026_v15 = vadd.f32 1.0, %v4722_v33  ;;  %v8178_v58 = vld [vmem:[#allocation79_spill] sm:$0xff]  ;;  %v8180_v33 = vld [vmem:[#allocation81_spill] sm:$0xff] }
 0xdb2   :  { %4727 = vrcp.f32 %v3019_v12  ;;  %v8179_v12 = vld [vmem:[#allocation80_spill] sm:$0xff] }
 0xdb3   :  { %4729 = vrcp.f32 %v3026_v15  ;;  %v7053_v15 = vld [vmem:[#allocation13 + $0x24] ss:$16 sps:$4 sm:$0xff]  }
 0xdb4   :  { %8185 = vst [vmem:[#allocation30_spill] sm:$0xff] %v7053_v15 }
 0xdbb   :  { %v4726_v54 = vpop.eup %4725 }
 0xdbc   :  { %v4728_v57 = vpop.eup %4727  ;;  %v3030_v60 = vmul.f32 %v4726_v54, %v4724_v18  ;;  %v7039_v18 = vld [vmem:[#allocation13 + $0x4] ss:$16 sps:$4 sm:$0xff]   ;;  %v7042_v54 = vld [vmem:[#allocation13 + $0xc] ss:$16 sps:$4 sm:$0xff]  }
 0xdbd   :  { %v3029_v10 = vmul.f32 %v4728_v57, %v6800_v23  ;;  %v4730_v24 = vpop.eup %4729  ;;  %v8171_v23 = vld [vmem:[#allocation71_spill] sm:$0xff]  ;;  %8181 = vst [vmem:[#allocation89_spill] sm:$0xff] %v7039_v18  ;;  %8182 = vst [vmem:[#allocation90_spill] sm:$0xff] %v7042_v54 }
 0xdbe   :  { %v7047_v57 = vld [vmem:[#allocation13] ss:$16 sps:$4 sm:$0xff]  }
 0xdbf   :  { %v7000_v55 = vadd.f32 %v3030_v60, %v3029_v10  ;;  %8183 = vst [vmem:[#allocation91_spill] sm:$0xff] %v7047_v57  ;;  %v7050_v60 = vld [vmem:[#allocation13 + $0x8] ss:$16 sps:$4 sm:$0xff]   ;;  %v7056_v10 = vld [vmem:[#allocation13 + $0x2c] ss:$16 sps:$4 sm:$0xff]  }
 0xdc0   :  { %8184 = vst [vmem:[#allocation29_spill] sm:$0xff] %v7050_v60  ;;  %8186 = vst [vmem:[#allocation92_spill] sm:$0xff] %v7056_v10 }
 0xdc1   :  { %4731 = vtanh.f32 %v7000_v55 }
 0xdcb   :  { %v4732_v63 = vpop.eup %4731 }
 0xdcc   :  { %v7003_v13 = vmul.f32 %v4732_v63, %v4730_v24  ;;  %v7064_v24 = vld [vmem:[#allocation13 + $0x28] ss:$16 sps:$4 sm:$0xff]   ;;  %v7067_v63 = vld [vmem:[#allocation13 + $0x44] ss:$16 sps:$4 sm:$0xff]  }
 0xdcd   :  { %8188 = vst [vmem:[#allocation94_spill] sm:$0xff] %v7064_v24  ;;  %8189 = vst [vmem:[#allocation95_spill] sm:$0xff] %v7067_v63 }
 0xdce   :  { %8170 = vst [vmem:[#allocation88_spill] sm:$0xff] %v7003_v13  ;;  %v3036_v42 = vpack.c.bf16 %v7003_v13, %v7003_v13  ;;  %v7073_v13 = vld [vmem:[#allocation13 + $0x40] ss:$16 sps:$4 sm:$0xff]  }
 0xdcf   :  { %8191 = vst [vmem:[#allocation32_spill] sm:$0xff] %v7073_v13 }
 0xdd0   :  { %3070 = vmatmul.mubr.bf16.vlgmr.msra.gmra.mrb[88].mxu0 %v3036_v42  ;;  %3111 = vmatmul.mubr.bf16.vlgmr.msra.gmra.mrb[88].mxu1 %v3036_v42  ;;  %v7070_v42 = vld [vmem:[#allocation13 + $0x4c] ss:$16 sps:$4 sm:$0xff]  }
 0xdd1   :  { %3127 = vmatpush1.bf16.msra.mxu0 %v6807_v14  ;;  %3168 = vmatpush1.bf16.msra.mxu1 %v6810_v53  ;;  %8190 = vst [vmem:[#allocation31_spill] sm:$0xff] %v7070_v42 }
 0xdd2   :  { %3128 = vmatprep.subr.bf16.mxu0 %v6813_v27  ;;  %3169 = vmatprep.subr.bf16.mxu1 %v6816_v11 }
 0xdd3   :  { %3158 = vmatprep.mubr.bf16.mxu0 %v7765_v59  ;;  %3199 = vmatprep.mubr.bf16.mxu1 %v7765_v59 }
 0xdd5   :  { %3129 = vmatpush1.bf16.msra.mxu0 %v6821_v19  ;;  %3170 = vmatpush1.bf16.msra.mxu1 %v6824_v49 }
 0xdd6   :  { %3130 = vmatprep.subr.bf16.mxu0 %v6827_v56  ;;  %3171 = vmatprep.subr.bf16.mxu1 %v6830_v28 }
 0xdd9   :  { %3131 = vmatpush1.bf16.msra.mxu0 %v6833_v7  ;;  %3172 = vmatpush1.bf16.msra.mxu1 %v6836_v3 }
 0xdda   :  { %3132 = vmatprep.subr.bf16.mxu0 %v6839_v34  ;;  %3173 = vmatprep.subr.bf16.mxu1 %v6842_v45 }
 0xddd   :  { %3133 = vmatpush1.bf16.msra.mxu0 %v6845_v51  ;;  %3174 = vmatpush1.bf16.msra.mxu1 %v6848_v39 }
 0xdde   :  { %3134 = vmatprep.subr.bf16.mxu0 %v8171_v23  ;;  %3175 = vmatprep.subr.bf16.mxu1 %v8172_v25 }
 0xde1   :  { %3135 = vmatpush1.bf16.msra.mxu0 %v8173_v8  ;;  %3176 = vmatpush1.bf16.msra.mxu1 %v8174_v38 }
 0xde2   :  { %3136 = vmatprep.subr.bf16.mxu0 %v8175_v1  ;;  %3177 = vmatprep.subr.bf16.mxu1 %v8176_v16 }
 0xde5   :  { %3137 = vmatpush1.bf16.msra.mxu0 %v8177_v52  ;;  %3178 = vmatpush1.bf16.msra.mxu1 %v8178_v58 }
 0xde6   :  { %3138 = vmatprep.subr.bf16.mxu0 %v8179_v12  ;;  %3179 = vmatprep.subr.bf16.mxu1 %v8180_v33 }
 0xde9   :  { %3139 = vmatpush1.bf16.msra.mxu0 %v6881_v31  ;;  %3180 = vmatpush1.bf16.msra.mxu1 %v6884_v35  ;;  %v8216_v31 = vld [vmem:[#allocation111_spill] sm:$0xff] }
 0xdea   :  { %3140 = vmatprep.subr.bf16.mxu0 %v6887_v30  ;;  %3181 = vmatprep.subr.bf16.mxu1 %v6890_v37  ;;  %v8215_v30 = vld [vmem:[#allocation110_spill] sm:$0xff] }
 0xded   :  { %3141 = vmatpush1.bf16.msra.mxu0 %v6893_v43  ;;  %3182 = vmatpush1.bf16.msra.mxu1 %v6896_v32  ;;  %v8213_v32 = vld [vmem:[#allocation108_spill] sm:$0xff]  ;;  %v8214_v43 = vld [vmem:[#allocation109_spill] sm:$0xff] }
 0xdee   :  { %3237 = vmatprep.subr.bf16.mxu0 %v7039_v18  ;;  %3278 = vmatprep.subr.bf16.mxu1 %v7042_v54 }
 0xdf0   :  { %3159 = vmatmul.mubr.bf16.vlgmr.msra.gmra.mrb[92].mxu0 %v6953_v29  ;;  %3200 = vmatmul.mubr.bf16.vlgmr.msra.gmra.mrb[92].mxu1 %v6953_v29  ;;  %v7061_v29 = vld [vmem:[#allocation13 + $0x20] ss:$16 sps:$4 sm:$0xff]  }
 0xdf1   :  { %3238 = vmatpush1.bf16.msra.mxu0 %v7047_v57  ;;  %3279 = vmatpush1.bf16.msra.mxu1 %v7050_v60  ;;  %8187 = vst [vmem:[#allocation93_spill] sm:$0xff] %v7061_v29 }
 0xdf2   :  { %3239 = vmatprep.subr.bf16.mxu0 %v7053_v15  ;;  %3280 = vmatprep.subr.bf16.mxu1 %v7056_v10  ;;  %v7076_v10 = vld [vmem:[#allocation13 + $0x48] ss:$16 sps:$4 sm:$0xff]  }
 0xdf3   :  { %3269 = vmatprep.mubr.bf16.mxu0 %v7765_v59  ;;  %3310 = vmatprep.mubr.bf16.mxu1 %v7765_v59  ;;  %8192 = vst [vmem:[#allocation33_spill] sm:$0xff] %v7076_v10 }
 0xdf5   :  { %3240 = vmatpush1.bf16.msra.mxu0 %v7061_v29  ;;  %3281 = vmatpush1.bf16.msra.mxu1 %v7064_v24  ;;  %v7079_v29 = vld [vmem:[#allocation13 + $0x64] ss:$16 sps:$4 sm:$0xff]   ;;  %v7082_v24 = vld [vmem:[#allocation13 + $0x6c] ss:$16 sps:$4 sm:$0xff]  }
 0xdf6   :  { %3241 = vmatprep.subr.bf16.mxu0 %v7067_v63  ;;  %3282 = vmatprep.subr.bf16.mxu1 %v7070_v42  ;;  %8193 = vst [vmem:[#allocation34_spill] sm:$0xff] %v7079_v29  ;;  %8194 = vst [vmem:[#allocation35_spill] sm:$0xff] %v7082_v24  ;;  %v7085_v63 = vld [vmem:[#allocation13 + $0x60] ss:$16 sps:$4 sm:$0xff]   ;;  %v7088_v42 = vld [vmem:[#allocation13 + $0x68] ss:$16 sps:$4 sm:$0xff]  }
 0xdf7   :  { %8195 = vst [vmem:[#allocation36_spill] sm:$0xff] %v7085_v63  ;;  %8196 = vst [vmem:[#allocation37_spill] sm:$0xff] %v7088_v42 }
 0xdf9   :  { %3242 = vmatpush1.bf16.msra.mxu0 %v7073_v13  ;;  %3283 = vmatpush1.bf16.msra.mxu1 %v7076_v10  ;;  %v7091_v13 = vld [vmem:[#allocation13 + $0x84] ss:$16 sps:$4 sm:$0xff]   ;;  %v7094_v10 = vld [vmem:[#allocation13 + $0x8c] ss:$16 sps:$4 sm:$0xff]  }
 0xdfa   :  { %3243 = vmatprep.subr.bf16.mxu0 %v7079_v29  ;;  %3284 = vmatprep.subr.bf16.mxu1 %v7082_v24  ;;  %8197 = vst [vmem:[#allocation38_spill] sm:$0xff] %v7091_v13  ;;  %8198 = vst [vmem:[#allocation39_spill] sm:$0xff] %v7094_v10  ;;  %v7097_v29 = vld [vmem:[#allocation13 + $0x80] ss:$16 sps:$4 sm:$0xff]   ;;  %v7100_v24 = vld [vmem:[#allocation13 + $0x88] ss:$16 sps:$4 sm:$0xff]  }
 0xdfb   :  { %8199 = vst [vmem:[#allocation40_spill] sm:$0xff] %v7097_v29  ;;  %8200 = vst [vmem:[#allocation60_spill] sm:$0xff] %v7100_v24 }
 0xdfd   :  { %3244 = vmatpush1.bf16.msra.mxu0 %v7085_v63  ;;  %3285 = vmatpush1.bf16.msra.mxu1 %v7088_v42  ;;  %v7103_v63 = vld [vmem:[#allocation13 + $0xa4] ss:$16 sps:$4 sm:$0xff]   ;;  %v7106_v42 = vld [vmem:[#allocation13 + $0xac] ss:$16 sps:$4 sm:$0xff]  }
 0xdfe   :  { %3245 = vmatprep.subr.bf16.mxu0 %v7091_v13  ;;  %3286 = vmatprep.subr.bf16.mxu1 %v7094_v10  ;;  %8201 = vst [vmem:[#allocation100_spill] sm:$0xff] %v7103_v63  ;;  %8202 = vst [vmem:[#allocation101_spill] sm:$0xff] %v7106_v42  ;;  %v7109_v13 = vld [vmem:[#allocation13 + $0xa0] ss:$16 sps:$4 sm:$0xff]   ;;  %v7112_v10 = vld [vmem:[#allocation13 + $0xa8] ss:$16 sps:$4 sm:$0xff]  }
 0xdff   :  { %8203 = vst [vmem:[#allocation102_spill] sm:$0xff] %v7109_v13  ;;  %8204 = vst [vmem:[#allocation103_spill] sm:$0xff] %v7112_v10 }
 0xe01   :  { %3246 = vmatpush1.bf16.msra.mxu0 %v7097_v29  ;;  %3287 = vmatpush1.bf16.msra.mxu1 %v7100_v24  ;;  %v7115_v29 = vld [vmem:[#allocation13 + $0xc4] ss:$16 sps:$4 sm:$0xff]   ;;  %v7118_v24 = vld [vmem:[#allocation13 + $0xcc] ss:$16 sps:$4 sm:$0xff]  }
 0xe02   :  { %3247 = vmatprep.subr.bf16.mxu0 %v7103_v63  ;;  %3288 = vmatprep.subr.bf16.mxu1 %v7106_v42  ;;  %8205 = vst [vmem:[#allocation62_spill] sm:$0xff] %v7115_v29  ;;  %8206 = vst [vmem:[#allocation63_spill] sm:$0xff] %v7118_v24  ;;  %v7121_v63 = vld [vmem:[#allocation13 + $0xc0] ss:$16 sps:$4 sm:$0xff]   ;;  %v7124_v42 = vld [vmem:[#allocation13 + $0xc8] ss:$16 sps:$4 sm:$0xff]  }
 0xe03   :  { %8207 = vst [vmem:[#allocation104_spill] sm:$0xff] %v7121_v63  ;;  %8208 = vst [vmem:[#allocation105_spill] sm:$0xff] %v7124_v42 }
 0xe05   :  { %3248 = vmatpush1.bf16.msra.mxu0 %v7109_v13  ;;  %3289 = vmatpush1.bf16.msra.mxu1 %v7112_v10  ;;  %v7127_v13 = vld [vmem:[#allocation13 + $0xe4] ss:$16 sps:$4 sm:$0xff]   ;;  %v7130_v10 = vld [vmem:[#allocation13 + $0xec] ss:$16 sps:$4 sm:$0xff]  }
 0xe06   :  { %3249 = vmatprep.subr.bf16.mxu0 %v7115_v29  ;;  %3290 = vmatprep.subr.bf16.mxu1 %v7118_v24  ;;  %8209 = vst [vmem:[#allocation106_spill] sm:$0xff] %v7127_v13  ;;  %8210 = vst [vmem:[#allocation107_spill] sm:$0xff] %v7130_v10  ;;  %v7133_v29 = vld [vmem:[#allocation13 + $0xe0] ss:$16 sps:$4 sm:$0xff]   ;;  %v7136_v24 = vld [vmem:[#allocation13 + $0xe8] ss:$16 sps:$4 sm:$0xff]  }
 0xe07   :  { %8211 = vst [vmem:[#allocation96_spill] sm:$0xff] %v7133_v29  ;;  %8212 = vst [vmem:[#allocation97_spill] sm:$0xff] %v7136_v24 }
 0xe09   :  { %3250 = vmatpush1.bf16.msra.mxu0 %v7121_v63  ;;  %3291 = vmatpush1.bf16.msra.mxu1 %v7124_v42 }
 0xe0a   :  { %3251 = vmatprep.subr.bf16.mxu0 %v7127_v13  ;;  %3292 = vmatprep.subr.bf16.mxu1 %v7130_v10 }
 0xe0d   :  { %3252 = vmatpush1.bf16.msra.mxu0 %v7133_v29  ;;  %3293 = vmatpush1.bf16.msra.mxu1 %v7136_v24 }
 0xe0e   :  { %3350 = vmatprep.subr.bf16.mxu0 %v8136_v0  ;;  %3391 = vmatprep.subr.bf16.mxu1 %v8137_v47 }
 0xea3   :  { %v7141_v42 = vpop.f32.mrb[88].mxu0  ;;  %v7143_v63 = vpop.f32.mrb[88].mxu1 }
 0xea4   :  { %v7145_v13 = vpop.f32.mrb[89].mxu0  ;;  %v7147_v15 = vpop.f32.mrb[89].mxu1 }
 0xea5   :  { %v3075_v10 = vpop.f32.mrb[90].mxu0  ;;  %v3116_v60 = vpop.f32.mrb[90].mxu1 }
 0xea6   :  { %v3076_v57 = vpop.f32.mrb[91].mxu0  ;;  %v3117_v29 = vpop.f32.mrb[91].mxu1 }
 0xec3   :  { %v3160_v54 = vpop.f32.mrb[92].mxu0  ;;  %v3201_v18 = vpop.f32.mrb[92].mxu1 }
 0xec4   :  { %v3208_v24 = vadd.f32 %v3160_v54, %v8213_v32  ;;  %v3210_v0 = vadd.f32 %v3201_v18, %v8214_v43  ;;  %v3162_v37 = vpop.f32.mrb[93].mxu0  ;;  %v3203_v47 = vpop.f32.mrb[93].mxu1 }
 0xec5   :  { %v3209_v35 = vadd.f32 %v3162_v37, %v8215_v30  ;;  %v3211_v33 = vadd.f32 %v3203_v47, %v8216_v31  ;;  %v3164_v12 = vpop.f32.mrb[94].mxu0  ;;  %v3205_v58 = vpop.f32.mrb[94].mxu1  ;;  %v8234_v47 = vld [vmem:[#allocation69_spill] sm:$0xff] }
 0xec6   :  { %v4225_v52 = vmul.f32 -1.442695, %v3208_v24  ;;  %v3165_v16 = vpop.f32.mrb[95].mxu0  ;;  %v3206_v10 = vpop.f32.mrb[95].mxu1 }
 0xec7   :  { %v4226_v60 = vmul.f32 -1.442695, %v3209_v35  ;;  %v4227_v57 = vmul.f32 -1.442695, %v3211_v33 }
 0xec8   :  { %4733 = vpow2.f32 %v4225_v52 }
 0xec9   :  { %4735 = vpow2.f32 %v4226_v60 }
 0xeca   :  { %4737 = vpow2.f32 %v4227_v57 }
 0xecb   :  { %4739 = vtanh.f32 %v3210_v0  ;;  %v8233_v0 = vld [vmem:[#allocation68_spill] sm:$0xff] }
 0xed2   :  { %v4734_v29 = vpop.eup %4733 }
 0xed3   :  { %v4736_v1 = vpop.eup %4735  ;;  %v3215_v32 = vadd.f32 1.0, %v4734_v29 }
 0xed4   :  { %v3221_v43 = vadd.f32 1.0, %v4736_v1  ;;  %v4738_v30 = vpop.eup %4737  ;;  %v8232_v1 = vld [vmem:[#allocation67_spill] sm:$0xff] }
 0xed5   :  { %4741 = vrcp.f32 %v3215_v32  ;;  %v4740_v37 = vpop.eup %4739  ;;  %v3228_v18 = vadd.f32 1.0, %v4738_v30 }
 0xed6   :  { %4743 = vrcp.f32 %v3221_v43 }
 0xed7   :  { %4745 = vrcp.f32 %v3228_v18 }
 0xedf   :  { %v4742_v31 = vpop.eup %4741 }
 0xee0   :  { %v4744_v12 = vpop.eup %4743  ;;  %v3232_v58 = vmul.f32 %v4742_v31, %v4740_v37 }
 0xee1   :  { %v3231_v16 = vmul.f32 %v4744_v12, %v6950_v6  ;;  %v4746_v52 = vpop.eup %4745  ;;  %v8221_v6 = vld [vmem:[#allocation51_spill] sm:$0xff] }
 0xee3   :  { %v7154_v35 = vadd.f32 %v3232_v58, %v3231_v16 }
 0xee5   :  { %4747 = vtanh.f32 %v7154_v35 }
 0xeef   :  { %v4748_v33 = vpop.eup %4747 }
 0xef0   :  { %v3235_v54 = vmul.f32 %v4748_v33, %v4746_v52 }
 0xef2   :  { %v7157_v24 = vpack.c.bf16 %v3235_v54, %v3235_v54 }
 0xef4   :  { %3270 = vmatmul.mubr.bf16.vlgmr.msra.gmra.mrb[96].mxu0 %v7157_v24  ;;  %3311 = vmatmul.mubr.bf16.vlgmr.msra.gmra.mrb[96].mxu1 %v7157_v24 }
 0xef5   :  { %3351 = vmatpush1.bf16.msra.mxu0 %v6693_v36  ;;  %3392 = vmatpush1.bf16.msra.mxu1 %v6696_v21  ;;  %v8217_v36 = vld [vmem:[#allocation47_spill] sm:$0xff]  ;;  %v8218_v21 = vld [vmem:[#allocation48_spill] sm:$0xff] }
 0xef6   :  { %3352 = vmatprep.subr.bf16.mxu0 %v6699_v4  ;;  %3393 = vmatprep.subr.bf16.mxu1 %v6702_v48  ;;  %v8219_v4 = vld [vmem:[#allocation49_spill] sm:$0xff]  ;;  %v8220_v48 = vld [vmem:[#allocation50_spill] sm:$0xff] }
 0xef7   :  { %3382 = vmatprep.mubr.bf16.mxu0 %v7765_v59  ;;  %3423 = vmatprep.mubr.bf16.mxu1 %v7765_v59 }
 0xef9   :  { %3353 = vmatpush1.bf16.msra.mxu0 %v8142_v20  ;;  %3394 = vmatpush1.bf16.msra.mxu1 %v8143_v22  ;;  %v8222_v20 = vld [vmem:[#allocation52_spill] sm:$0xff]  ;;  %v8223_v22 = vld [vmem:[#allocation53_spill] sm:$0xff] }
 0xefa   :  { %3354 = vmatprep.subr.bf16.mxu0 %v8144_v50  ;;  %3395 = vmatprep.subr.bf16.mxu1 %v8145_v17  ;;  %v8224_v50 = vld [vmem:[#allocation54_spill] sm:$0xff]  ;;  %v8225_v17 = vld [vmem:[#allocation55_spill] sm:$0xff] }
 0xefd   :  { %3355 = vmatpush1.bf16.msra.mxu0 %v8146_v62  ;;  %3396 = vmatpush1.bf16.msra.mxu1 %v8147_v41  ;;  %v8226_v62 = vld [vmem:[#allocation56_spill] sm:$0xff]  ;;  %v8227_v41 = vld [vmem:[#allocation57_spill] sm:$0xff] }
 0xefe   :  { %3356 = vmatprep.subr.bf16.mxu0 %v8148_v61  ;;  %3397 = vmatprep.subr.bf16.mxu1 %v8149_v26  ;;  %v8228_v61 = vld [vmem:[#allocation58_spill] sm:$0xff]  ;;  %v8229_v26 = vld [vmem:[#allocation64_spill] sm:$0xff] }
 0xf01   :  { %3357 = vmatpush1.bf16.msra.mxu0 %v8150_v44  ;;  %3398 = vmatpush1.bf16.msra.mxu1 %v8151_v2  ;;  %v8230_v44 = vld [vmem:[#allocation65_spill] sm:$0xff]  ;;  %v8231_v2 = vld [vmem:[#allocation66_spill] sm:$0xff] }
 0xf02   :  { %3358 = vmatprep.subr.bf16.mxu0 %v8217_v36  ;;  %3399 = vmatprep.subr.bf16.mxu1 %v8218_v21 }
 0xf05   :  { %3359 = vmatpush1.bf16.msra.mxu0 %v8219_v4  ;;  %3400 = vmatpush1.bf16.msra.mxu1 %v8220_v48 }
 0xf06   :  { %3360 = vmatprep.subr.bf16.mxu0 %v8221_v6  ;;  %3401 = vmatprep.subr.bf16.mxu1 %v8222_v20 }
 0xf09   :  { %3361 = vmatpush1.bf16.msra.mxu0 %v8223_v22  ;;  %3402 = vmatpush1.bf16.msra.mxu1 %v8224_v50 }
 0xf0a   :  { %3362 = vmatprep.subr.bf16.mxu0 %v8225_v17  ;;  %3403 = vmatprep.subr.bf16.mxu1 %v8226_v62 }
 0xf0d   :  { %3363 = vmatpush1.bf16.msra.mxu0 %v8227_v41  ;;  %3404 = vmatpush1.bf16.msra.mxu1 %v8228_v61 }
 0xf0e   :  { %3364 = vmatprep.subr.bf16.mxu0 %v8229_v26  ;;  %3405 = vmatprep.subr.bf16.mxu1 %v8230_v44 }
 0xf11   :  { %3365 = vmatpush1.bf16.msra.mxu0 %v8231_v2  ;;  %3406 = vmatpush1.bf16.msra.mxu1 %v8232_v1  ;;  %v8254_v1 = vld [vmem:[#allocation94_spill] sm:$0xff] }
 0xf12   :  { %3439 = vmatprep.subr.bf16.mxu0 %v8233_v0  ;;  %3480 = vmatprep.subr.bf16.mxu1 %v8234_v47  ;;  %v8255_v0 = vld [vmem:[#allocation95_spill] sm:$0xff] }
 0xf13   :  { %v8256_v47 = vld [vmem:[#allocation31_spill] sm:$0xff] }
 0xfc7   :  { %v3271_v10 = vpop.f32.mrb[96].mxu0  ;;  %v3312_v60 = vpop.f32.mrb[96].mxu1 }
 0xfc8   :  { %v3272_v57 = vadd.f32 %v3271_v10, %v7141_v42  ;;  %v3313_v29 = vadd.f32 %v3312_v60, %v7143_v63  ;;  %v3273_v32 = vpop.f32.mrb[97].mxu0  ;;  %v3314_v43 = vpop.f32.mrb[97].mxu1  ;;  %v8258_v10 = vld [vmem:[#allocation33_spill] sm:$0xff]  ;;  %v8259_v60 = vld [vmem:[#allocation34_spill] sm:$0xff] }
 0xfc9   :  { %v3274_v30 = vadd.f32 %v3273_v32, %v7145_v13  ;;  %v3315_v37 = vadd.f32 %v3314_v43, %v7147_v15  ;;  %v3275_v31 = vpop.f32.mrb[98].mxu0  ;;  %v3316_v12 = vpop.f32.mrb[98].mxu1  ;;  %v8262_v32 = vld [vmem:[#allocation37_spill] sm:$0xff]  ;;  %v8263_v43 = vld [vmem:[#allocation38_spill] sm:$0xff] }
 0xfca   :  { %v3319_v58 = vadd.f32 %v3272_v57, %v5958_v40  ;;  %v3276_v18 = vpop.f32.mrb[99].mxu0  ;;  %v3317_v16 = vpop.f32.mrb[99].mxu1  ;;  %v3321_v36 = vadd.f32 %v3313_v29, %v5977_v9  ;;  %v8260_v57 = vld [vmem:[#allocation35_spill] sm:$0xff]  ;;  %v8261_v29 = vld [vmem:[#allocation36_spill] sm:$0xff] }
 0xfcb   :  { %v3320_v52 = vadd.f32 %v3274_v30, %v5962_v46  ;;  %v3322_v63 = vadd.f32 %v3315_v37, %v5972_v5  ;;  %v8264_v30 = vld [vmem:[#allocation39_spill] sm:$0xff]  ;;  %v8265_v37 = vld [vmem:[#allocation40_spill] sm:$0xff]  ;;  %v8269_v18 = vld [vmem:[#allocation102_spill] sm:$0xff] }
 0xfcc   :  { %v4228_v33 = vmul.f32 -1.442695, %v3319_v58  ;;  %v8266_v31 = vld [vmem:[#allocation60_spill] sm:$0xff]  ;;  %v8268_v58 = vld [vmem:[#allocation101_spill] sm:$0xff]  ;;  %v8270_v16 = vld [vmem:[#allocation103_spill] sm:$0xff] }
 0xfcd   :  { %v4229_v54 = vmul.f32 -1.442695, %v3320_v52  ;;  %v4230_v42 = vmul.f32 -1.442695, %v3322_v63  ;;  %v8267_v12 = vld [vmem:[#allocation100_spill] sm:$0xff]  ;;  %v8271_v52 = vld [vmem:[#allocation62_spill] sm:$0xff] }
 0xfce   :  { %4749 = vpow2.f32 %v4228_v33  ;;  %v8272_v33 = vld [vmem:[#allocation63_spill] sm:$0xff]  ;;  %v8274_v63 = vld [vmem:[#allocation105_spill] sm:$0xff] }
 0xfcf   :  { %4751 = vpow2.f32 %v4229_v54  ;;  %v8273_v54 = vld [vmem:[#allocation104_spill] sm:$0xff] }
 0xfd0   :  { %4753 = vpow2.f32 %v4230_v42  ;;  %v8275_v42 = vld [vmem:[#allocation106_spill] sm:$0xff] }
 0xfd1   :  { %4755 = vtanh.f32 %v3321_v36  ;;  %v8276_v36 = vld [vmem:[#allocation107_spill] sm:$0xff] }
 0xfd8   :  { %v4750_v13 = vpop.eup %4749 }
 0xfd9   :  { %v4752_v21 = vpop.eup %4751  ;;  %v3326_v15 = vadd.f32 1.0, %v4750_v13  ;;  %v8277_v13 = vld [vmem:[#allocation96_spill] sm:$0xff] }
 0xfda   :  { %v3332_v4 = vadd.f32 1.0, %v4752_v21  ;;  %v4754_v48 = vpop.eup %4753  ;;  %v8278_v21 = vld [vmem:[#allocation97_spill] sm:$0xff] }
 0xfdb   :  { %4757 = vrcp.f32 %v3326_v15  ;;  %v4756_v6 = vpop.eup %4755  ;;  %v3339_v17 = vadd.f32 1.0, %v4754_v48  ;;  %v4511_v15 = vld [vmem:[#allocation16 + $0x4] ss:$12 sps:$4 sm:$0xff]  }
 0xfdc   :  { %4759 = vrcp.f32 %v3332_v4  ;;  %v4512_v4 = vld [vmem:[#allocation16 + $0x8] ss:$12 sps:$4 sm:$0xff]  }
 0xfdd   :  { %4761 = vrcp.f32 %v3339_v17 }
 0xfe5   :  { %v4758_v20 = vpop.eup %4757 }
 0xfe6   :  { %v4760_v22 = vpop.eup %4759  ;;  %v3343_v50 = vmul.f32 %v4758_v20, %v4756_v6 }
 0xfe7   :  { %v3342_v62 = vmul.f32 %v4760_v22, %v7000_v55  ;;  %v4762_v61 = vpop.eup %4761  ;;  %v8249_v55 = vld [vmem:[#allocation91_spill] sm:$0xff] }
 0xfe9   :  { %v7204_v41 = vadd.f32 %v3343_v50, %v3342_v62 }
 0xfeb   :  { %4763 = vtanh.f32 %v7204_v41 }
 0xff5   :  { %v4764_v26 = vpop.eup %4763 }
 0xff6   :  { %v7207_v44 = vmul.f32 %v4764_v26, %v4762_v61 }
 0xff8   :  { %v3349_v2 = vpack.c.bf16 %v7207_v44, %v7207_v44 }
 0xffa   :  { %3383 = vmatmul.mubr.bf16.vlgmr.msra.gmra.mrb[100].mxu0 %v3349_v2  ;;  %3424 = vmatmul.mubr.bf16.vlgmr.msra.gmra.mrb[100].mxu1 %v3349_v2 }
 0xffb   :  { %3440 = vmatpush1.bf16.msra.mxu0 %v6807_v14  ;;  %3481 = vmatpush1.bf16.msra.mxu1 %v6810_v53  ;;  %v8235_v14 = vld [vmem:[#allocation75_spill] sm:$0xff]  ;;  %v8236_v53 = vld [vmem:[#allocation77_spill] sm:$0xff] }
 0xffc   :  { %3441 = vmatprep.subr.bf16.mxu0 %v6813_v27  ;;  %3482 = vmatprep.subr.bf16.mxu1 %v6816_v11  ;;  %v8237_v27 = vld [vmem:[#allocation78_spill] sm:$0xff]  ;;  %v8238_v11 = vld [vmem:[#allocation79_spill] sm:$0xff] }
 0xffd   :  { %3471 = vmatprep.mubr.bf16.mxu0 %v7765_v59  ;;  %3512 = vmatprep.mubr.bf16.mxu1 %v7765_v59 }
 0xfff   :  { %3442 = vmatpush1.bf16.msra.mxu0 %v6821_v19  ;;  %3483 = vmatpush1.bf16.msra.mxu1 %v6824_v49  ;;  %v8239_v19 = vld [vmem:[#allocation80_spill] sm:$0xff]  ;;  %v8240_v49 = vld [vmem:[#allocation81_spill] sm:$0xff] }
0x1000   :  { %3443 = vmatprep.subr.bf16.mxu0 %v6827_v56  ;;  %3484 = vmatprep.subr.bf16.mxu1 %v6830_v28  ;;  %v8241_v56 = vld [vmem:[#allocation82_spill] sm:$0xff]  ;;  %v8242_v28 = vld [vmem:[#allocation83_spill] sm:$0xff] }
0x1003   :  { %3444 = vmatpush1.bf16.msra.mxu0 %v6833_v7  ;;  %3485 = vmatpush1.bf16.msra.mxu1 %v6836_v3  ;;  %v8243_v7 = vld [vmem:[#allocation84_spill] sm:$0xff]  ;;  %v8244_v3 = vld [vmem:[#allocation85_spill] sm:$0xff] }
0x1004   :  { %3445 = vmatprep.subr.bf16.mxu0 %v6839_v34  ;;  %3486 = vmatprep.subr.bf16.mxu1 %v6842_v45  ;;  %v8245_v34 = vld [vmem:[#allocation86_spill] sm:$0xff]  ;;  %v8246_v45 = vld [vmem:[#allocation87_spill] sm:$0xff] }
0x1007   :  { %3446 = vmatpush1.bf16.msra.mxu0 %v6845_v51  ;;  %3487 = vmatpush1.bf16.msra.mxu1 %v6848_v39  ;;  %v8247_v51 = vld [vmem:[#allocation89_spill] sm:$0xff]  ;;  %v8248_v39 = vld [vmem:[#allocation90_spill] sm:$0xff] }
0x1008   :  { %3447 = vmatprep.subr.bf16.mxu0 %v8171_v23  ;;  %3488 = vmatprep.subr.bf16.mxu1 %v8172_v25  ;;  %v8250_v23 = vld [vmem:[#allocation29_spill] sm:$0xff]  ;;  %v8251_v25 = vld [vmem:[#allocation30_spill] sm:$0xff] }
0x100b   :  { %3448 = vmatpush1.bf16.msra.mxu0 %v8173_v8  ;;  %3489 = vmatpush1.bf16.msra.mxu1 %v8174_v38  ;;  %v8252_v8 = vld [vmem:[#allocation92_spill] sm:$0xff]  ;;  %v8253_v38 = vld [vmem:[#allocation93_spill] sm:$0xff] }
0x100c   :  { %3449 = vmatprep.subr.bf16.mxu0 %v8235_v14  ;;  %3490 = vmatprep.subr.bf16.mxu1 %v8236_v53  ;;  %v8279_v14 = vld [vmem:[#allocation112_spill] sm:$0xff] }
0x100f   :  { %3450 = vmatpush1.bf16.msra.mxu0 %v8237_v27  ;;  %3491 = vmatpush1.bf16.msra.mxu1 %v8238_v11  ;;  %v8280_v27 = vld [vmem:[#allocation113_spill] sm:$0xff] }
0x1010   :  { %3451 = vmatprep.subr.bf16.mxu0 %v8239_v19  ;;  %3492 = vmatprep.subr.bf16.mxu1 %v8240_v49 }
0x1013   :  { %3452 = vmatpush1.bf16.msra.mxu0 %v8241_v56  ;;  %3493 = vmatpush1.bf16.msra.mxu1 %v8242_v28  ;;  %v8281_v56 = vld [vmem:[#allocation114_spill] sm:$0xff] }
0x1014   :  { %3453 = vmatprep.subr.bf16.mxu0 %v8243_v7  ;;  %3494 = vmatprep.subr.bf16.mxu1 %v8244_v3  ;;  %v8282_v7 = vld [vmem:[#allocation115_spill] sm:$0xff] }
0x1017   :  { %3454 = vmatpush1.bf16.msra.mxu0 %v8245_v34  ;;  %3495 = vmatpush1.bf16.msra.mxu1 %v8246_v45 }
0x1018   :  { %3550 = vmatprep.subr.bf16.mxu0 %v8247_v51  ;;  %3591 = vmatprep.subr.bf16.mxu1 %v8248_v39 }
0x101a   :  { %3472 = vmatmul.mubr.bf16.vlgmr.msra.gmra.mrb[104].mxu0 %v7157_v24  ;;  %3513 = vmatmul.mubr.bf16.vlgmr.msra.gmra.mrb[104].mxu1 %v7157_v24  ;;  %v8257_v24 = vld [vmem:[#allocation32_spill] sm:$0xff] }
0x101b   :  { %3551 = vmatpush1.bf16.msra.mxu0 %v8249_v55  ;;  %3592 = vmatpush1.bf16.msra.mxu1 %v8250_v23 }
0x101c   :  { %3552 = vmatprep.subr.bf16.mxu0 %v8251_v25  ;;  %3593 = vmatprep.subr.bf16.mxu1 %v8252_v8 }
0x101d   :  { %3582 = vmatprep.mubr.bf16.mxu0 %v7765_v59  ;;  %3623 = vmatprep.mubr.bf16.mxu1 %v7765_v59 }
0x101f   :  { %3553 = vmatpush1.bf16.msra.mxu0 %v8253_v38  ;;  %3594 = vmatpush1.bf16.msra.mxu1 %v8254_v1 }
0x1020   :  { %3554 = vmatprep.subr.bf16.mxu0 %v8255_v0  ;;  %3595 = vmatprep.subr.bf16.mxu1 %v8256_v47 }
0x1023   :  { %3555 = vmatpush1.bf16.msra.mxu0 %v8257_v24  ;;  %3596 = vmatpush1.bf16.msra.mxu1 %v8258_v10 }
0x1024   :  { %3556 = vmatprep.subr.bf16.mxu0 %v8259_v60  ;;  %3597 = vmatprep.subr.bf16.mxu1 %v8260_v57 }
0x1027   :  { %3557 = vmatpush1.bf16.msra.mxu0 %v8261_v29  ;;  %3598 = vmatpush1.bf16.msra.mxu1 %v8262_v32 }
0x1028   :  { %3558 = vmatprep.subr.bf16.mxu0 %v8263_v43  ;;  %3599 = vmatprep.subr.bf16.mxu1 %v8264_v30 }
0x102b   :  { %3559 = vmatpush1.bf16.msra.mxu0 %v8265_v37  ;;  %3600 = vmatpush1.bf16.msra.mxu1 %v8266_v31 }
0x102c   :  { %3560 = vmatprep.subr.bf16.mxu0 %v8267_v12  ;;  %3601 = vmatprep.subr.bf16.mxu1 %v8268_v58  ;;  %v4509_v12 = vld [vmem:[#allocation16] ss:$12 sps:$4 sm:$0xff]  }
0x102f   :  { %3561 = vmatpush1.bf16.msra.mxu0 %v8269_v18  ;;  %3602 = vmatpush1.bf16.msra.mxu1 %v8270_v16  ;;  %v4515_v18 = vld [vmem:[#allocation16 + $0x1c] ss:$12 sps:$4 sm:$0xff]   ;;  %v4516_v16 = vld [vmem:[#allocation16 + $0x20] ss:$12 sps:$4 sm:$0xff]  }
0x1030   :  { %3562 = vmatprep.subr.bf16.mxu0 %v8271_v52  ;;  %3603 = vmatprep.subr.bf16.mxu1 %v8272_v33  ;;  %v8283_v52 = vld [vmem:[#allocation116_spill] sm:$0xff]  ;;  %v8284_v33 = vld [vmem:[#allocation59_spill] sm:$0xff] }
0x1033   :  { %3563 = vmatpush1.bf16.msra.mxu0 %v8273_v54  ;;  %3604 = vmatpush1.bf16.msra.mxu1 %v8274_v63  ;;  %v3676_v54 = vpack.c.bf16 %v8284_v33, %v8283_v52  ;;  %v4519_v63 = vld [vmem:[#allocation16 + $0x34] ss:$12 sps:$4 sm:$0xff]  }
0x1034   :  { %3564 = vmatprep.subr.bf16.mxu0 %v8275_v42  ;;  %3605 = vmatprep.subr.bf16.mxu1 %v8276_v36  ;;  %v4520_v42 = vld [vmem:[#allocation16 + $0x38] ss:$12 sps:$4 sm:$0xff]   ;;  %v4517_v36 = vld [vmem:[#allocation16 + $0x30] ss:$12 sps:$4 sm:$0xff]  }
0x1037   :  { %3565 = vmatpush1.bf16.msra.mxu0 %v8277_v13  ;;  %3606 = vmatpush1.bf16.msra.mxu1 %v8278_v21  ;;  %v4523_v13 = vld [vmem:[#allocation16 + $0x4c] ss:$12 sps:$4 sm:$0xff]   ;;  %v4524_v21 = vld [vmem:[#allocation16 + $0x50] ss:$12 sps:$4 sm:$0xff]  }
0x1038   :  { %3840 = vmatprep.subr.bf16.mxu0 %v4511_v15  ;;  %4273 = vmatprep.subr.bf16.mxu1 %v4512_v4  ;;  %v4521_v15 = vld [vmem:[#allocation16 + $0x48] ss:$12 sps:$4 sm:$0xff]  }
0x10cd   :  { %v7279_v48 = vpop.f32.mrb[100].mxu0  ;;  %v7281_v6 = vpop.f32.mrb[100].mxu1 }
0x10ce   :  { %v7283_v20 = vpop.f32.mrb[101].mxu0  ;;  %v7285_v22 = vpop.f32.mrb[101].mxu1 }
0x10cf   :  { %v3388_v50 = vpop.f32.mrb[102].mxu0  ;;  %v3429_v17 = vpop.f32.mrb[102].mxu1 }
0x10d0   :  { %v3389_v62 = vpop.f32.mrb[103].mxu0  ;;  %v3430_v61 = vpop.f32.mrb[103].mxu1  ;;  %v4528_v50 = vld [vmem:[#allocation16 + $0x68] ss:$12 sps:$4 sm:$0xff]   ;;  %v4525_v17 = vld [vmem:[#allocation16 + $0x60] ss:$12 sps:$4 sm:$0xff]  }
0x10d1   :  { %v4531_v62 = vld [vmem:[#allocation16 + $0x7c] ss:$12 sps:$4 sm:$0xff]   ;;  %v4532_v61 = vld [vmem:[#allocation16 + $0x80] ss:$12 sps:$4 sm:$0xff]  }
0x10ed   :  { %v3473_v26 = vpop.f32.mrb[104].mxu0  ;;  %v3514_v2 = vpop.f32.mrb[104].mxu1 }
0x10ee   :  { %v3521_v53 = vadd.f32 %v3473_v26, %v8279_v14  ;;  %v3523_v11 = vadd.f32 %v3514_v2, %v8280_v27  ;;  %v3475_v19 = vpop.f32.mrb[105].mxu0  ;;  %v3516_v49 = vpop.f32.mrb[105].mxu1  ;;  %v4529_v26 = vld [vmem:[#allocation16 + $0x78] ss:$12 sps:$4 sm:$0xff]   ;;  %v4535_v2 = vld [vmem:[#allocation16 + $0x94] ss:$12 sps:$4 sm:$0xff]  }
0x10ef   :  { %v3522_v28 = vadd.f32 %v3475_v19, %v8281_v56  ;;  %v3524_v3 = vadd.f32 %v3516_v49, %v8282_v7  ;;  %v3477_v34 = vpop.f32.mrb[106].mxu0  ;;  %v3518_v45 = vpop.f32.mrb[106].mxu1  ;;  %v4536_v14 = vld [vmem:[#allocation16 + $0x98] ss:$12 sps:$4 sm:$0xff]   ;;  %v4537_v19 = vld [vmem:[#allocation16 + $0xa8] ss:$12 sps:$4 sm:$0xff]  }
0x10f0   :  { %v4231_v51 = vmul.f32 -1.442695, %v3521_v53  ;;  %v3478_v39 = vpop.f32.mrb[107].mxu0  ;;  %v3519_v55 = vpop.f32.mrb[107].mxu1  ;;  %v4533_v53 = vld [vmem:[#allocation16 + $0x90] ss:$12 sps:$4 sm:$0xff]  }
0x10f1   :  { %v4232_v23 = vmul.f32 -1.442695, %v3522_v28  ;;  %v4233_v25 = vmul.f32 -1.442695, %v3524_v3  ;;  %v4539_v27 = vld [vmem:[#allocation16 + $0xac] ss:$12 sps:$4 sm:$0xff]  }
0x10f2   :  { %4765 = vpow2.f32 %v4231_v51  ;;  %v8285_v49 = vld [vmem:[#allocation76_spill] sm:$0xff]  ;;  %v8286_v56 = vld [vmem:[#allocation61_spill] sm:$0xff]  ;;  %v8287_v7 = vld [vmem:[#allocation70_spill] sm:$0xff] }
0x10f3   :  { %4767 = vpow2.f32 %v4232_v23  ;;  %v3677_v28 = vpack.c.bf16 %v8286_v56, %v8285_v49  ;;  %v8288_v3 = vld [vmem:[#allocation88_spill] sm:$0xff] }
0x10f4   :  { %4769 = vpow2.f32 %v4233_v25  ;;  %v3678_v34 = vpack.c.bf16 %v8288_v3, %v8287_v7 }
0x10f5   :  { %4771 = vtanh.f32 %v3523_v11  ;;  %v4540_v11 = vld [vmem:[#allocation16 + $0xb0] ss:$12 sps:$4 sm:$0xff]  }
0x10fc   :  { %v4766_v8 = vpop.eup %4765 }
0x10fd   :  { %v4768_v38 = vpop.eup %4767  ;;  %v3528_v1 = vadd.f32 1.0, %v4766_v8 }
0x10fe   :  { %v3534_v0 = vadd.f32 1.0, %v4768_v38  ;;  %v4770_v47 = vpop.eup %4769 }
0x10ff   :  { %4773 = vrcp.f32 %v3528_v1  ;;  %v4772_v24 = vpop.eup %4771  ;;  %v3541_v29 = vadd.f32 1.0, %v4770_v47 }
0x1100   :  { %4775 = vrcp.f32 %v3534_v0 }
0x1101   :  { %4777 = vrcp.f32 %v3541_v29 }
0x1109   :  { %v4774_v10 = vpop.eup %4773 }
0x110a   :  { %v4776_v60 = vpop.eup %4775  ;;  %v3545_v57 = vmul.f32 %v4774_v10, %v4772_v24 }
0x110b   :  { %v3544_v32 = vmul.f32 %v4776_v60, %v7154_v35  ;;  %v4778_v30 = vpop.eup %4777  ;;  %v4513_v35 = vld [vmem:[#allocation16 + $0x18] ss:$12 sps:$4 sm:$0xff]  }
0x110d   :  { %v3546_v43 = vadd.f32 %v3545_v57, %v3544_v32 }
0x110f   :  { %4779 = vtanh.f32 %v3546_v43  ;;  %3665 = vst [vmem:[#allocation21] sm:$0xff] %v3546_v43 }
0x1119   :  { %v4780_v37 = vpop.eup %4779 }
0x111a   :  { %v3548_v31 = vmul.f32 %v4780_v37, %v4778_v30 }
0x111c   :  { %v3549_v58 = vpack.c.bf16 %v3548_v31, %v3548_v31  ;;  %3662 = vst [vmem:[#allocation19] sm:$0xff] %v3548_v31 }
0x111e   :  { %3583 = vmatmul.mubr.bf16.vlgmr.msra.gmra.mrb[108].mxu0 %v3549_v58  ;;  %3624 = vmatmul.mubr.bf16.vlgmr.msra.gmra.mrb[108].mxu1 %v3549_v58 }
0x111f   :  { %3841 = vmatpush1.bf16.msra.mxu0 %v4509_v12  ;;  %4274 = vmatpush3.bf16.msra.mxu1 %v4512_v4  ;;  %v4527_v4 = vld [vmem:[#allocation16 + $0x64] ss:$12 sps:$4 sm:$0xff]  }
0x1120   :  { %4289 = vmatprep.mubr.bf16.mxu1 %v3676_v54  ;;  %3842 = vmatprep.subr.bf16.mxu0 %v4515_v18 }
0x1121   :  { %4275 = vmatprep.subr.bf16.mxu1 %v4516_v16  ;;  %3872 = vmatprep.mubr.bf16.mxu0 %v7765_v59 }
0x1123   :  { %3843 = vmatpush1.bf16.msra.mxu0 %v4513_v35  ;;  %4276 = vmatpush3.bf16.msra.mxu1 %v4516_v16 }
0x1124   :  { %3844 = vmatprep.subr.bf16.mxu0 %v4519_v63  ;;  %4277 = vmatprep.subr.bf16.mxu1 %v4520_v42 }
0x1127   :  { %3845 = vmatpush1.bf16.msra.mxu0 %v4517_v36  ;;  %4278 = vmatpush3.bf16.msra.mxu1 %v4520_v42 }
0x1128   :  { %3846 = vmatprep.subr.bf16.mxu0 %v4523_v13  ;;  %4279 = vmatprep.subr.bf16.mxu1 %v4524_v21 }
0x112b   :  { %3847 = vmatpush1.bf16.msra.mxu0 %v4521_v15  ;;  %4280 = vmatpush3.bf16.msra.mxu1 %v4524_v21 }
0x112c   :  { %3848 = vmatprep.subr.bf16.mxu0 %v4527_v4  ;;  %4281 = vmatprep.subr.bf16.mxu1 %v4528_v50 }
0x112f   :  { %3849 = vmatpush1.bf16.msra.mxu0 %v4525_v17  ;;  %4282 = vmatpush3.bf16.msra.mxu1 %v4528_v50 }
0x1130   :  { %3850 = vmatprep.subr.bf16.mxu0 %v4531_v62  ;;  %4283 = vmatprep.subr.bf16.mxu1 %v4532_v61 }
0x1133   :  { %3851 = vmatpush1.bf16.msra.mxu0 %v4529_v26  ;;  %4284 = vmatpush3.bf16.msra.mxu1 %v4532_v61 }
0x1134   :  { %3852 = vmatprep.subr.bf16.mxu0 %v4535_v2  ;;  %4285 = vmatprep.subr.bf16.mxu1 %v4536_v14 }
0x1137   :  { %3853 = vmatpush1.bf16.msra.mxu0 %v4533_v53  ;;  %4286 = vmatpush3.bf16.msra.mxu1 %v4536_v14 }
0x1138   :  { %3854 = vmatprep.subr.bf16.mxu0 %v4539_v27  ;;  %4287 = vmatprep.subr.bf16.mxu1 %v4540_v11 }
0x113b   :  { %3855 = vmatpush1.bf16.msra.mxu0 %v4537_v19  ;;  %4288 = vmatpush3.bf16.msra.mxu1 %v4540_v11 }
0x113e   :  { %3873 = vmatmul.mubr.bf16.vlgmr.msra.gmra.mrb[112].mxu0 %v3676_v54  ;;  %4290 = vmatmul.mubr.bf16.vlgmr.msra.gmra.mrb[112].mxu1 %v3677_v28 }
0x113f   :  { %4293 = vmatprep.mubr.bf16.mxu1 %v3678_v34  ;;  %3882 = vmatprep.mubr.bf16.mxu0 %v7765_v59 }
0x1146   :  { %3883 = vmatmul.mubr.bf16.gmra.mrb[116].mxu0 %v3677_v28 }
0x1147   :  { %3892 = vmatprep.mubr.bf16.mxu0 %v7765_v59 }
0x114e   :  { %3893 = vmatmul.mubr.bf16.gmra.mrb[120].mxu0 %v3678_v34 }
0x114f   :  { %3902 = vmatprep.mubr.bf16.mxu0 %v7765_v59 }
0x11f1   :  { %v3584_v45 = vpop.f32.mrb[108].mxu0  ;;  %v3625_v51 = vpop.f32.mrb[108].mxu1 }
0x11f2   :  { %v3585_v39 = vadd.f32 %v3584_v45, %v7279_v48  ;;  %v3626_v55 = vadd.f32 %v3625_v51, %v7281_v6  ;;  %v3586_v23 = vpop.f32.mrb[109].mxu0  ;;  %v3627_v25 = vpop.f32.mrb[109].mxu1 }
0x11f3   :  { %v3587_v8 = vadd.f32 %v3586_v23, %v7283_v20  ;;  %v3628_v38 = vadd.f32 %v3627_v25, %v7285_v22  ;;  %v3588_v1 = vpop.f32.mrb[110].mxu0  ;;  %v3629_v0 = vpop.f32.mrb[110].mxu1 }
0x11f4   :  { %v3632_v47 = vadd.f32 %v3585_v39, %v5958_v40  ;;  %v3589_v24 = vpop.f32.mrb[111].mxu0  ;;  %v3630_v10 = vpop.f32.mrb[111].mxu1  ;;  %v3634_v29 = vadd.f32 %v3626_v55, %v5977_v9 }
0x11f5   :  { %v3633_v59 = vadd.f32 %v3587_v8, %v5962_v46  ;;  %v3635_v48 = vadd.f32 %v3628_v38, %v5972_v5 }
0x11f6   :  { %v4234_v60 = vmul.f32 -1.442695, %v3632_v47 }
0x11f7   :  { %v4235_v57 = vmul.f32 -1.442695, %v3633_v59  ;;  %v4236_v6 = vmul.f32 -1.442695, %v3635_v48 }
0x11f8   :  { %4781 = vpow2.f32 %v4234_v60 }
0x11f9   :  { %4783 = vpow2.f32 %v4235_v57 }
0x11fa   :  { %4785 = vpow2.f32 %v4236_v6 }
0x11fb   :  { %4787 = vtanh.f32 %v3634_v29 }
0x1202   :  { %v4782_v20 = vpop.eup %4781 }
0x1203   :  { %v4784_v32 = vpop.eup %4783  ;;  %v3639_v22 = vadd.f32 1.0, %v4782_v20 }
0x1204   :  { %v3645_v43 = vadd.f32 1.0, %v4784_v32  ;;  %v4786_v40 = vpop.eup %4785 }
0x1205   :  { %4789 = vrcp.f32 %v3639_v22  ;;  %v4788_v30 = vpop.eup %4787  ;;  %v3652_v12 = vadd.f32 1.0, %v4786_v40 }
0x1206   :  { %4791 = vrcp.f32 %v3645_v43 }
0x1207   :  { %4793 = vrcp.f32 %v3652_v12 }
0x120f   :  { %v4790_v46 = vpop.eup %4789 }
0x1210   :  { %v4792_v37 = vpop.eup %4791  ;;  %v3656_v31 = vmul.f32 %v4790_v46, %v4788_v30 }
0x1211   :  { %v3655_v58 = vmul.f32 %v4792_v37, %v7204_v41  ;;  %v3874_v5 = vpop.f32.mrb[112].mxu0  ;;  %v4291_v18 = vpop.f32.mrb[112].mxu1 }
0x1212   :  { %3978 = vst [vmem:[#allocation18] sm:$0xff] %v3874_v5  ;;  %3986 = vst [vmem:[#allocation18 + $0x40] sm:$0xff] %v4291_v18  ;;  %v3876_v9 = vpop.f32.mrb[113].mxu0  ;;  %v3947_v16 = vpop.f32.mrb[113].mxu1 }
0x1213   :  { %3979 = vst [vmem:[#allocation18 + $0x8] sm:$0xff] %v3876_v9  ;;  %3980 = vst [vmem:[#allocation18 + $0x10] sm:$0xff] %v3947_v16  ;;  %v3878_v52 = vpop.f32.mrb[114].mxu0  ;;  %v4292_v33 = vpop.f32.mrb[114].mxu1  ;;  %v3657_v54 = vadd.f32 %v3656_v31, %v3655_v58 }
0x1214   :  { %3981 = vst [vmem:[#allocation18 + $0x18] sm:$0xff] %v3878_v52  ;;  %3989 = vst [vmem:[#allocation18 + $0x58] sm:$0xff] %v4292_v33  ;;  %v3880_v35 = vpop.f32.mrb[115].mxu0  ;;  %v3950_v63 = vpop.f32.mrb[115].mxu1 }
0x1215   :  { %3982 = vst [vmem:[#allocation18 + $0x20] sm:$0xff] %v3880_v35  ;;  %3983 = vst [vmem:[#allocation18 + $0x28] sm:$0xff] %v3950_v63  ;;  %4795 = vtanh.f32 %v3657_v54  ;;  %v4794_v21 = vpop.eup %4793 }
0x1216   :  { %3667 = vst [vmem:[#allocation21 + $0x8] sm:$0xff] %v3657_v54 }
0x1219   :  { %v3884_v41 = vpop.f32.mrb[116].mxu0 }
0x121a   :  { %3984 = vst [vmem:[#allocation18 + $0x30] sm:$0xff] %v3884_v41  ;;  %v3886_v42 = vpop.f32.mrb[117].mxu0 }
0x121b   :  { %3985 = vst [vmem:[#allocation18 + $0x38] sm:$0xff] %v3886_v42  ;;  %v3888_v36 = vpop.f32.mrb[118].mxu0 }
0x121c   :  { %3987 = vst [vmem:[#allocation18 + $0x48] sm:$0xff] %v3888_v36  ;;  %v3890_v13 = vpop.f32.mrb[119].mxu0 }
0x121d   :  { %3988 = vst [vmem:[#allocation18 + $0x50] sm:$0xff] %v3890_v13 }
0x121f   :  { %v4796_v15 = vpop.eup %4795 }
0x1220   :  { %v3659_v4 = vmul.f32 %v4796_v15, %v4794_v21 }
0x1221   :  { %v3894_v50 = vpop.f32.mrb[120].mxu0 }
0x1222   :  { %3990 = vst [vmem:[#allocation18 + $0x60] sm:$0xff] %v3894_v50  ;;  %v3896_v17 = vpop.f32.mrb[121].mxu0  ;;  %v3679_v62 = vpack.c.bf16 %v3659_v4, %v7207_v44  ;;  %3664 = vst [vmem:[#allocation19 + $0x8] sm:$0xff] %v3659_v4 }
0x1223   :  { %3991 = vst [vmem:[#allocation18 + $0x68] sm:$0xff] %v3896_v17  ;;  %v3898_v61 = vpop.f32.mrb[122].mxu0 }
0x1224   :  { %3993 = vst [vmem:[#allocation18 + $0x78] sm:$0xff] %v3898_v61  ;;  %v3900_v26 = vpop.f32.mrb[123].mxu0  ;;  %3903 = vmatmul.mubr.bf16.gmra.mrb[124].mxu0 %v3679_v62  ;;  %4294 = vmatmul.mubr.bf16.gmra.mrb[116].mxu1 %v3679_v62 }
0x1225   :  { %3994 = vst [vmem:[#allocation18 + $0x80] sm:$0xff] %v3900_v26 }
0x1226   :  { %5176 = shalt.err (!%p5173_p12)
}
0x1227   :  { %s5177_s23 = scalar_lea.hbm %s7365_s11, 256 }
0x1228   :  { %p5178_p13 = scmp.ne.s32.totalorder %s7365_s11, %s5177_s23  ;;  %p5181_p0 = scmp.lt.u32.totalorder %s5177_s23, %s7365_s11 }
0x122a   :  { %p5183_p1 = pnand %p5181_p0, %p5178_p13 }
0x122c   :  { %5186 = shalt.err (!%p5183_p1)
}
0x122d   :  { %4025 = dma.vmem_to_hbm [thread:$0]  %s4020_s0, 256, %s7365_s11, [#allocation20], %s5247_s15, %s5247_s15, %s5248_s16  }
0x122e   :  { %s5261_s24 = smov [#allocation21]  }
0x122f   :  { %s4031_s28 = sshll.u32 %s5261_s24, 4  ;;  %s4032_s28 = int_to_ptr.vmem [resolvable:$true] %s4031_s28 }
0x1230   :  { %s5187_s2 = scalar_lea.vmem %s4032_s28, 256  ;;  %p5192_p3 = scmp.lt.s32.totalorder %s4032_s28, %s4032_s28 }
0x1231   :  { %p5188_p2 = scmp.ne.s32.totalorder %s4032_s28, %s5187_s2  ;;  %p5193_p4 = scmp.lt.s32.totalorder %s5187_s2, %s5187_s2 }
0x1233   :  { %p5194_p5 = por %p5193_p4, %p5192_p3 }
0x1235   :  { %p5195_p6 = pnand %p5194_p5, %p5188_p2 }
0x1237   :  { %5198 = shalt.err (!%p5195_p6)
}
0x1238   :  { %s5199_s13 = scalar_lea.hbm %s7366_s12, 256 }
0x1239   :  { %p5200_p7 = scmp.ne.s32.totalorder %s7366_s12, %s5199_s13  ;;  %p5203_p8 = scmp.lt.u32.totalorder %s5199_s13, %s7366_s12 }
0x123b   :  { %p5205_p9 = pnand %p5203_p8, %p5200_p7 }
0x123d   :  { %5208 = shalt.err (!%p5205_p9)
}
0x123e   :  { %4037 = dma.vmem_to_hbm [thread:$0]  %s4032_s28, 256, %s7366_s12, [#allocation20], %s5247_s15, %s5247_s15, %s5248_s16  }
0x123f   :  { %s5262_s17 = smov [#allocation18]  }
0x1240   :  { %s4007_s5 = sshll.u32 %s5262_s17, 4  ;;  %s4008_s5 = int_to_ptr.vmem [resolvable:$true] %s4007_s5 }
0x1241   :  { %s5209_s12 = scalar_lea.vmem %s4008_s5, 3072  ;;  %p5214_p11 = scmp.lt.s32.totalorder %s4008_s5, %s4008_s5 }
0x1242   :  { %p5210_p10 = scmp.ne.s32.totalorder %s4008_s5, %s5209_s12  ;;  %p5215_p12 = scmp.lt.s32.totalorder %s5209_s12, %s5209_s12 }
0x1244   :  { %p5216_p13 = por %p5215_p12, %p5214_p11 }
0x1246   :  { %p5217_p0 = pnand %p5216_p13, %p5210_p10 }
0x12f7   :  { %v3904_v44 = vpop.f32.mrb[124].mxu0  ;;  %v4295_v2 = vpop.f32.mrb[116].mxu1 }
0x12f8   :  { %3996 = vst [vmem:[#allocation18 + $0x90] sm:$0xff] %v3904_v44  ;;  %3998 = vst [vmem:[#allocation18 + $0xa0] sm:$0xff] %v4295_v2  ;;  %v3906_v14 = vpop.f32.mrb[125].mxu0  ;;  %v3963_v53 = vpop.f32.mrb[117].mxu1 }
0x12f9   :  { %3997 = vst [vmem:[#allocation18 + $0x98] sm:$0xff] %v3906_v14  ;;  %3992 = vst [vmem:[#allocation18 + $0x70] sm:$0xff] %v3963_v53  ;;  %v3908_v27 = vpop.f32.mrb[126].mxu0  ;;  %v4296_v11 = vpop.f32.mrb[118].mxu1 }
0x12fa   :  { %3999 = vst [vmem:[#allocation18 + $0xa8] sm:$0xff] %v3908_v27  ;;  %4001 = vst [vmem:[#allocation18 + $0xb8] sm:$0xff] %v4296_v11  ;;  %v3910_v19 = vpop.f32.mrb[127].mxu0  ;;  %v3966_v49 = vpop.f32.mrb[119].mxu1 }
0x12fb   :  { %4000 = vst [vmem:[#allocation18 + $0xb0] sm:$0xff] %v3910_v19  ;;  %3995 = vst [vmem:[#allocation18 + $0x88] sm:$0xff] %v3966_v49 }
0x12fc   :  { %5220 = shalt.err (!%p5217_p0)
}
0x12fd   :  { %s5221_s19 = scalar_lea.hbm %s7364_s10, 3072 }
0x12fe   :  { %p5222_p1 = scmp.ne.s32.totalorder %s7364_s10, %s5221_s19  ;;  %p5225_p2 = scmp.lt.u32.totalorder %s5221_s19, %s7364_s10 }
0x1300   :  { %p5227_p3 = pnand %p5225_p2, %p5222_p1 }
0x1302   :  { %5230 = shalt.err (!%p5227_p3)
}
0x1303   :  { %s5263_s21 = smov 384   ;;  %s5264_s23 = smov 24  }
0x1304   :  { %4013 = dma.vmem_to_hbm [thread:$0]  %s4008_s5, 3072, %s7364_s10, [#allocation6], %s5263_s21, %s5263_s21, %s5264_s23  }
0x1305   :  { %5241 = dma.done.wait [#allocation6], 3072  }
0x1306   :  { %5242 = vsyncadd [#allocation6], 4294964224 }
0x1307   :  { %5243 = dma.done.wait [#allocation20], 512  }
0x1308   :  { %5244 = vsyncadd [#allocation20], 4294966784 }
0x1309   :  { %4047 = vsyncpa [#allocation5], 1 }
0x130a   :  { %4048 = vsyncpa [#allocation8], 1 }
0x130b   :  { %4049 = vsyncpa [#allocation11], 1 }
0x130c   :  { %4050 = vsyncpa [#allocation14], 1 }
0x130d   :  { %4051 = vsyncpa [#allocation17], 1 }
0x130e   :  { %4052 = vsyncpa [#allocation6], 1 }
0x130f   :  { %4053 = vsyncpa [#allocation20], 1 }

</bundles_post_ra>
